<compile_context>
chip_gen: v6e
topology: v6e:2x2x1
jax: 0.10.0
libtpu: 0.0.40
codegen_flags: <defaults>
</compile_context>

<pallas_src>
import functools

import jax
import jax.numpy as jnp
import numpy as np
from jax import lax
from jax.experimental import pallas as pl
from jax.experimental.pallas import tpu as pltpu


def _conv_upsample_kernel(
    xf_ref,    # (Cin_p, Mx)  f32   flat, row-padded input (one batch element)
    w1_ref,    # (Chid_p, 9*Cin_p)  bf16  conv1 weights, taps folded into K
    s1_ref,    # (Chid_p, 1)  f32   folded BN1 scale
    t1_ref,    # (Chid_p, 1)  f32   folded BN1 shift (includes conv bias)
    w2_ref,    # (Cout, 9*Chid_p)   bf16
    s2_ref,    # (Cout, 1)    f32
    t2_ref,    # (Cout, 1)    f32
    wh_ref,    # (Hout, H)    bf16  bilinear interp matrix (rows)
    ww_ref,    # (Wout, W)    bf16  bilinear interp matrix (cols)
    m1_ref,    # (3, Mh)      f32   [left, right, real-pixel] masks for the h domain
    m2_ref,    # (2, HW)      f32   [left, right] masks for the output domain
    out_ref,   # (Wout, Hout*Cout)  f32   lane-dense output slab
    *, H, W, Cout, Hout, Wout,
):
    f32 = jnp.float32
    bf16 = jnp.bfloat16
    HW = H * W
    Mh = (H + 2) * W + 2   # conv1 output domain: image + 1-pixel ring, flattened

    m1 = m1_ref[...]
    left1, right1, real1 = m1[0:1], m1[1:2], m1[2:3]    # (1, Mh) each
    m2 = m2_ref[...]
    left2, right2 = m2[0:1], m2[1:2]                     # (1, HW) each

    def im2col(src, n, left_mask, right_mask):
        # src: (C, n + 2*W + 2) flat buffer.  Tap (ky, kx) of a 3x3/pad-1 conv at flat
        # output position m reads src[:, m + ky*W + kx]; horizontal taps that would
        # cross an image-row boundary are zeroed by the left/right masks.
        pieces = []
        for ky in range(3):
            for kx in range(3):
                off = ky * W + kx
                p = src[:, off:off + n]
                if kx == 0:
                    p = p * left_mask
                elif kx == 2:
                    p = p * right_mask
                pieces.append(p)
        # 8-aligned row counts -> tile-aligned concatenation along sublanes.
        return jnp.concatenate(pieces, axis=0)           # (9*C, n)

    # ---- conv1 + BN1 + ReLU: one fused MXU matmul over the ring-extended domain ----
    p1 = im2col(xf_ref[...], Mh, left1, right1).astype(bf16)          # (9*Cin_p, Mh)
    acc1 = lax.dot_general(w1_ref[...], p1, (((1,), (0,)), ((), ())),
                           preferred_element_type=f32)                # (Chid_p, Mh)
    # real1 zeroes the 1-pixel ring, which then acts as conv2's zero padding
    # (replaces the old padded VMEM scratch round trip).
    h = jnp.maximum(acc1 * s1_ref[...] + t1_ref[...], 0.0) * real1

    # ---- conv2 + BN2 + ReLU: one fused MXU matmul ----
    p2 = im2col(h, HW, left2, right2).astype(bf16)                    # (9*Chid_p, HW)
    acc2 = lax.dot_general(w2_ref[...], p2, (((1,), (0,)), ((), ())),
                           preferred_element_type=f32)                # (Cout, HW)
    y = jnp.maximum(acc2 * s2_ref[...] + t2_ref[...], 0.0)            # lane-dense

    # ---- bilinear upsample (align_corners=True) as two separable matmuls ----
    y3 = y.T.reshape(H, W, Cout)                                      # (H, W, Cout)
    t = lax.dot_general(wh_ref[...], y3.astype(bf16), (((1,), (0,)), ((), ())),
                        preferred_element_type=f32)                   # (Hout, W, Cout)
    t4 = jnp.swapaxes(t, 1, 2).reshape(Hout * Cout, W).T              # (W, Hout*Cout)
    up = lax.dot_general(ww_ref[...], t4.astype(bf16), (((1,), (0,)), ((), ())),
                         preferred_element_type=f32)                  # (Wout, Hout*Cout)

    out_ref[...] = up.astype(out_ref.dtype)                           # unmasked, lane-dense store


def _bilinear_matrix(n_out, n_in):
    """Row-interpolation matrix for bilinear resize with align_corners=True."""
    m = np.zeros((n_out, n_in), dtype=np.float32)
    for p in range(n_out):
        src = 0.0 if n_out == 1 else p * (n_in - 1) / (n_out - 1)
        i0 = int(np.floor(src))
        i1 = min(i0 + 1, n_in - 1)
        frac = src - i0
        m[p, i0] += 1.0 - frac
        m[p, i1] += frac
    return m


def _round_up(x, m):
    return (x + m - 1) // m * m


def conv_upsample_pallas(x_nchw, params, scale):
    """x_nchw: (B, Cin, H, W) float32. Returns (B, Cout, H*scale, W*scale) float32."""
    w1, s1, t1, w2, s2, t2 = params          # w1/w2: HWIO, s*/t*: per-channel f32
    B, Cin, H, W = x_nchw.shape
    Chid = w1.shape[-1]
    Cout = w2.shape[-1]
    Hout, Wout = H * scale, W * scale
    Cin_p = _round_up(Cin, 8)
    Chid_p = _round_up(Chid, 8)
    HW = H * W
    Mh = (H + 2) * W + 2                     # conv1 ("h") flat domain length
    Mx = Mh + 2 * W + 2                      # flat input length = (H+4)*W + 4
    bf16 = jnp.bfloat16

    # Input stays in native NCHW (no transpose, no W padding, no full padded copy):
    # pad 2 zero rows top/bottom, flatten spatial, add 2 zero lanes at each end and
    # pad channels to a multiple of 8 (tile-aligned im2col inside the kernel).
    xp = jnp.pad(x_nchw, ((0, 0), (0, Cin_p - Cin), (2, 2), (0, 0)))
    xf = jnp.pad(xp.reshape(B, Cin_p, (H + 4) * W), ((0, 0), (0, 0), (2, 2)))

    # Weights: fold 3x3 taps into the contraction dim; bf16 MXU operands.
    w1p = jnp.pad(w1, ((0, 0), (0, 0), (0, Cin_p - Cin), (0, Chid_p - Chid)))
    w2p = jnp.pad(w2, ((0, 0), (0, 0), (0, Chid_p - Chid), (0, 0)))
    w1f = jnp.transpose(w1p, (3, 0, 1, 2)).reshape(Chid_p, 9 * Cin_p).astype(bf16)
    w2f = jnp.transpose(w2p, (3, 0, 1, 2)).reshape(Cout, 9 * Chid_p).astype(bf16)
    s1p = jnp.pad(s1, (0, Chid_p - Chid)).reshape(Chid_p, 1)
    t1p = jnp.pad(t1, (0, Chid_p - Chid)).reshape(Chid_p, 1)
    s2r = s2.reshape(Cout, 1)
    t2r = t2.reshape(Cout, 1)
    wh = jnp.asarray(_bilinear_matrix(Hout, H)).astype(bf16)
    ww = jnp.asarray(_bilinear_matrix(Wout, W)).astype(bf16)

    # Precomputed boundary masks (numpy constants; avoids int div/mod in-kernel).
    jj = np.arange(Mh)
    c1 = (jj - 1) % W
    r1 = (jj - 1) // W - 1
    m1 = np.stack([
        c1 != 0,                                             # valid for kx == 0 taps
        c1 != W - 1,                                         # valid for kx == 2 taps
        (jj >= 1) & (jj <= Mh - 2) & (r1 >= 0) & (r1 <= H - 1),  # real pixel (not ring)
    ]).astype(np.float32)
    mm = np.arange(HW)
    c2 = mm % W
    m2 = np.stack([c2 != 0, c2 != W - 1]).astype(np.float32)
    m1 = jnp.asarray(m1)
    m2 = jnp.asarray(m2)

    kernel = functools.partial(
        _conv_upsample_kernel, H=H, W=W, Cout=Cout, Hout=Hout, Wout=Wout)

    # NOTE: for production-size images, tile H (and the matching Hout rows) via the
    # grid so the per-step footprint stays well under v7x's 64 MiB VMEM; and for
    # B == 1 on v7x add a spatial parallel axis so both TensorCores get work.
    out2d = pl.pallas_call(
        kernel,
        out_shape=jax.ShapeDtypeStruct((B, Wout, Hout * Cout), jnp.float32),
        grid_spec=pltpu.PrefetchScalarGridSpec(
            num_scalar_prefetch=0,
            grid=(B,),
            in_specs=[
                pl.BlockSpec((None, Cin_p, Mx), lambda b: (b, 0, 0)),
                pl.BlockSpec((Chid_p, 9 * Cin_p), lambda b: (0, 0)),
                pl.BlockSpec((Chid_p, 1), lambda b: (0, 0)),
                pl.BlockSpec((Chid_p, 1), lambda b: (0, 0)),
                pl.BlockSpec((Cout, 9 * Chid_p), lambda b: (0, 0)),
                pl.BlockSpec((Cout, 1), lambda b: (0, 0)),
                pl.BlockSpec((Cout, 1), lambda b: (0, 0)),
                pl.BlockSpec((Hout, H), lambda b: (0, 0)),
                pl.BlockSpec((Wout, W), lambda b: (0, 0)),
                pl.BlockSpec((3, Mh), lambda b: (0, 0)),
                pl.BlockSpec((2, HW), lambda b: (0, 0)),
            ],
            out_specs=pl.BlockSpec((None, Wout, Hout * Cout), lambda b: (b, 0, 0)),
        ),
        compiler_params=pltpu.CompilerParams(
            dimension_semantics=("parallel",)),
    )(xf, w1f, s1p, t1p, w2f, s2r, t2r, wh, ww, m1, m2)

    # (B, Wout, Hout*Cout) -> (B, Wout, Hout, Cout) -> NCHW (B, Cout, Hout, Wout)
    return jnp.transpose(out2d.reshape(B, Wout, Hout, Cout), (0, 3, 2, 1))


def conv_upsample_reference(x_nchw, params, scale):
    """Pure-JAX f32 reference (same math) used to verify the kernel."""
    w1, s1, t1, w2, s2, t2 = params
    x = jnp.transpose(x_nchw, (0, 2, 3, 1))
    dn = ('NHWC', 'HWIO', 'NHWC')
    y = lax.conv_general_dilated(x, w1, (1, 1), 'SAME', dimension_numbers=dn)
    y = jnp.maximum(y * s1 + t1, 0.0)
    y = lax.conv_general_dilated(y, w2, (1, 1), 'SAME', dimension_numbers=dn)
    y = jnp.maximum(y * s2 + t2, 0.0)
    H, W = x.shape[1], x.shape[2]
    wh = jnp.asarray(_bilinear_matrix(H * scale, H))
    ww = jnp.asarray(_bilinear_matrix(W * scale, W))
    y = jnp.einsum('ph,bhwc->bpwc', wh, y)
    y = jnp.einsum('qw,bpwc->bpqc', ww, y)
    return jnp.transpose(y, (0, 3, 1, 2))


def make_params(key, in_dim, out_dim):
    hidden_dim = int((in_dim + out_dim) / 2)
    eps = 1e-5
    ks = jax.random.split(key, 12)

    def fold_bn(kidx, cin, cout):
        w = jax.random.normal(ks[kidx + 0], (3, 3, cin, cout), jnp.float32) * 0.1
        b = jax.random.normal(ks[kidx + 1], (cout,), jnp.float32) * 0.1
        gamma = 1.0 + 0.1 * jax.random.normal(ks[kidx + 2], (cout,), jnp.float32)
        beta = 0.1 * jax.random.normal(ks[kidx + 3], (cout,), jnp.float32)
        mean = 0.1 * jax.random.normal(ks[kidx + 4], (cout,), jnp.float32)
        var = jax.random.uniform(ks[kidx + 5], (cout,), jnp.float32, 0.5, 1.5)
        s = gamma / jnp.sqrt(var + eps)
        t = beta + (b - mean) * s
        return w, s, t

    w1, s1, t1 = fold_bn(0, in_dim, hidden_dim)
    w2, s2, t2 = fold_bn(6, hidden_dim, out_dim)
    return (w1, s1, t1, w2, s2, t2)


if __name__ == "__main__":
    key = jax.random.PRNGKey(0)
    k_in, k_par = jax.random.split(key)

    B, Cin, H, W = 2, 4, 16, 16
    out_dim = 32
    scale = 2

    x = jax.random.normal(k_in, (B, Cin, H, W), jnp.float32)
    params = make_params(k_par, Cin, out_dim)

    out = conv_upsample_pallas(x, params, scale)
    out = jax.block_until_ready(out)

    ref = conv_upsample_reference(x, params, scale)
    # Tolerance relaxed vs. the f32 reference because MXU operands are bf16
    # (f32 accumulation); observed error is well inside this bound.
    np.testing.assert_allclose(np.asarray(out), np.asarray(ref), rtol=5e-2, atol=5e-2)

    assert out.shape == (B, out_dim, H * scale, W * scale)
    print("KERNEL_OK")
</pallas_src>

<mosaic_0001>
module attributes {stable_mosaic.version = 11 : i64} {
  func.func @_conv_upsample_kernel(%arg0: i32, %arg1: memref<1x8x324xf32, #tpu.memory_space<vmem>>, %arg2: memref<24x72xbf16, #tpu.memory_space<vmem>>, %arg3: memref<24x1xf32, #tpu.memory_space<vmem>>, %arg4: memref<24x1xf32, #tpu.memory_space<vmem>>, %arg5: memref<32x216xbf16, #tpu.memory_space<vmem>>, %arg6: memref<32x1xf32, #tpu.memory_space<vmem>>, %arg7: memref<32x1xf32, #tpu.memory_space<vmem>>, %arg8: memref<32x16xbf16, #tpu.memory_space<vmem>>, %arg9: memref<32x16xbf16, #tpu.memory_space<vmem>>, %arg10: memref<3x290xf32, #tpu.memory_space<vmem>>, %arg11: memref<2x256xf32, #tpu.memory_space<vmem>>, %arg12: memref<1x32x1024xf32, #tpu.memory_space<vmem>>) attributes {dimension_semantics = [#tpu.dimension_semantics<parallel>], iteration_bounds = array<i64: 2>, scalar_prefetch = 0 : i64, scratch_operands = 0 : i64, tpu.core_type = #tpu.core_type<tc>, window_params = [{transform_indices = @transform_0, window_bounds = array<i64: 1, 8, 324>}, {pipeline_mode = #tpu.pipeline_mode<synchronous>, transform_indices = @transform_1, window_bounds = array<i64: 24, 72>}, {pipeline_mode = #tpu.pipeline_mode<synchronous>, transform_indices = @transform_2, window_bounds = array<i64: 24, 1>}, {pipeline_mode = #tpu.pipeline_mode<synchronous>, transform_indices = @transform_3, window_bounds = array<i64: 24, 1>}, {pipeline_mode = #tpu.pipeline_mode<synchronous>, transform_indices = @transform_4, window_bounds = array<i64: 32, 216>}, {pipeline_mode = #tpu.pipeline_mode<synchronous>, transform_indices = @transform_5, window_bounds = array<i64: 32, 1>}, {pipeline_mode = #tpu.pipeline_mode<synchronous>, transform_indices = @transform_6, window_bounds = array<i64: 32, 1>}, {pipeline_mode = #tpu.pipeline_mode<synchronous>, transform_indices = @transform_7, window_bounds = array<i64: 32, 16>}, {pipeline_mode = #tpu.pipeline_mode<synchronous>, transform_indices = @transform_8, window_bounds = array<i64: 32, 16>}, {pipeline_mode = #tpu.pipeline_mode<synchronous>, transform_indices = @transform_9, window_bounds = array<i64: 3, 290>}, {pipeline_mode = #tpu.pipeline_mode<synchronous>, transform_indices = @transform_10, window_bounds = array<i64: 2, 256>}, {transform_indices = @transform_11, window_bounds = array<i64: 1, 32, 1024>}]} {
    %c0 = arith.constant 0 : index
    %c0_0 = arith.constant 0 : index
    %0 = vector.load %arg10[%c0, %c0_0] : memref<3x290xf32, #tpu.memory_space<vmem>>, vector<3x290xf32>
    %1 = vector.extract_strided_slice %0 {offsets = [0, 0], sizes = [1, 290], strides = [1, 1]} : vector<3x290xf32> to vector<1x290xf32>
    %2 = vector.extract_strided_slice %0 {offsets = [1, 0], sizes = [1, 290], strides = [1, 1]} : vector<3x290xf32> to vector<1x290xf32>
    %3 = vector.extract_strided_slice %0 {offsets = [2, 0], sizes = [1, 290], strides = [1, 1]} : vector<3x290xf32> to vector<1x290xf32>
    %c0_1 = arith.constant 0 : index
    %c0_2 = arith.constant 0 : index
    %4 = vector.load %arg11[%c0_1, %c0_2] : memref<2x256xf32, #tpu.memory_space<vmem>>, vector<2x256xf32>
    %5 = vector.extract_strided_slice %4 {offsets = [0, 0], sizes = [1, 256], strides = [1, 1]} : vector<2x256xf32> to vector<1x256xf32>
    %6 = vector.extract_strided_slice %4 {offsets = [1, 0], sizes = [1, 256], strides = [1, 1]} : vector<2x256xf32> to vector<1x256xf32>
    %c0_3 = arith.constant 0 : index
    %c0_4 = arith.constant 0 : index
    %c0_5 = arith.constant 0 : index
    %7 = vector.load %arg1[%c0_3, %c0_4, %c0_5] : memref<1x8x324xf32, #tpu.memory_space<vmem>>, vector<1x8x324xf32>
    %8 = vector.shape_cast %7 : vector<1x8x324xf32> to vector<8x324xf32>
    %9 = vector.extract_strided_slice %8 {offsets = [0, 0], sizes = [8, 290], strides = [1, 1]} : vector<8x324xf32> to vector<8x290xf32>
    %10 = vector.broadcast %1 : vector<1x290xf32> to vector<8x290xf32>
    %11 = arith.mulf %9, %10 : vector<8x290xf32>
    %12 = vector.extract_strided_slice %8 {offsets = [0, 1], sizes = [8, 290], strides = [1, 1]} : vector<8x324xf32> to vector<8x290xf32>
    %13 = vector.extract_strided_slice %8 {offsets = [0, 2], sizes = [8, 290], strides = [1, 1]} : vector<8x324xf32> to vector<8x290xf32>
    %14 = vector.broadcast %2 : vector<1x290xf32> to vector<8x290xf32>
    %15 = arith.mulf %13, %14 : vector<8x290xf32>
    %16 = vector.extract_strided_slice %8 {offsets = [0, 16], sizes = [8, 290], strides = [1, 1]} : vector<8x324xf32> to vector<8x290xf32>
    %17 = vector.broadcast %1 : vector<1x290xf32> to vector<8x290xf32>
    %18 = arith.mulf %16, %17 : vector<8x290xf32>
    %19 = vector.extract_strided_slice %8 {offsets = [0, 17], sizes = [8, 290], strides = [1, 1]} : vector<8x324xf32> to vector<8x290xf32>
    %20 = vector.extract_strided_slice %8 {offsets = [0, 18], sizes = [8, 290], strides = [1, 1]} : vector<8x324xf32> to vector<8x290xf32>
    %21 = vector.broadcast %2 : vector<1x290xf32> to vector<8x290xf32>
    %22 = arith.mulf %20, %21 : vector<8x290xf32>
    %23 = vector.extract_strided_slice %8 {offsets = [0, 32], sizes = [8, 290], strides = [1, 1]} : vector<8x324xf32> to vector<8x290xf32>
    %24 = vector.broadcast %1 : vector<1x290xf32> to vector<8x290xf32>
    %25 = arith.mulf %23, %24 : vector<8x290xf32>
    %26 = vector.extract_strided_slice %8 {offsets = [0, 33], sizes = [8, 290], strides = [1, 1]} : vector<8x324xf32> to vector<8x290xf32>
    %27 = vector.extract_strided_slice %8 {offsets = [0, 34], sizes = [8, 290], strides = [1, 1]} : vector<8x324xf32> to vector<8x290xf32>
    %28 = vector.broadcast %2 : vector<1x290xf32> to vector<8x290xf32>
    %29 = arith.mulf %27, %28 : vector<8x290xf32>
    %30 = tpu.concatenate %11, %12, %15, %18, %19, %22, %25, %26, %29 in 0 : vector<8x290xf32>, vector<8x290xf32>, vector<8x290xf32>, vector<8x290xf32>, vector<8x290xf32>, vector<8x290xf32>, vector<8x290xf32>, vector<8x290xf32>, vector<8x290xf32> -> vector<72x290xf32>
    %31 = arith.truncf %30 : vector<72x290xf32> to vector<72x290xbf16>
    %c0_6 = arith.constant 0 : index
    %c0_7 = arith.constant 0 : index
    %32 = vector.load %arg2[%c0_6, %c0_7] : memref<24x72xbf16, #tpu.memory_space<vmem>>, vector<24x72xbf16>
    %cst = arith.constant dense<0.000000e+00> : vector<24x290xf32>
    %33 = tpu.matmul %32, %31, %cst {dimension_numbers = #tpu.dot_dimension_numbers<[1], [0], [0], [1], [0, 0, 1, 1], [], []>} : vector<24x72xbf16>, vector<72x290xbf16>, vector<24x290xf32> -> vector<24x290xf32>
    %c0_8 = arith.constant 0 : index
    %c0_9 = arith.constant 0 : index
    %34 = vector.load %arg3[%c0_8, %c0_9] : memref<24x1xf32, #tpu.memory_space<vmem>>, vector<24x1xf32>
    %35 = vector.broadcast %34 : vector<24x1xf32> to vector<24x290xf32>
    %36 = arith.mulf %33, %35 : vector<24x290xf32>
    %c0_10 = arith.constant 0 : index
    %c0_11 = arith.constant 0 : index
    %37 = vector.load %arg4[%c0_10, %c0_11] : memref<24x1xf32, #tpu.memory_space<vmem>>, vector<24x1xf32>
    %38 = vector.broadcast %37 : vector<24x1xf32> to vector<24x290xf32>
    %39 = arith.addf %36, %38 : vector<24x290xf32>
    %cst_12 = arith.constant 0.000000e+00 : f32
    %40 = vector.broadcast %cst_12 : f32 to vector<24x290xf32>
    %41 = arith.maximumf %39, %40 : vector<24x290xf32>
    %42 = vector.broadcast %3 : vector<1x290xf32> to vector<24x290xf32>
    %43 = arith.mulf %41, %42 : vector<24x290xf32>
    %44 = vector.extract_strided_slice %43 {offsets = [0, 0], sizes = [24, 256], strides = [1, 1]} : vector<24x290xf32> to vector<24x256xf32>
    %45 = vector.broadcast %5 : vector<1x256xf32> to vector<24x256xf32>
    %46 = arith.mulf %44, %45 : vector<24x256xf32>
    %47 = vector.extract_strided_slice %43 {offsets = [0, 1], sizes = [24, 256], strides = [1, 1]} : vector<24x290xf32> to vector<24x256xf32>
    %48 = vector.extract_strided_slice %43 {offsets = [0, 2], sizes = [24, 256], strides = [1, 1]} : vector<24x290xf32> to vector<24x256xf32>
    %49 = vector.broadcast %6 : vector<1x256xf32> to vector<24x256xf32>
    %50 = arith.mulf %48, %49 : vector<24x256xf32>
    %51 = vector.extract_strided_slice %43 {offsets = [0, 16], sizes = [24, 256], strides = [1, 1]} : vector<24x290xf32> to vector<24x256xf32>
    %52 = vector.broadcast %5 : vector<1x256xf32> to vector<24x256xf32>
    %53 = arith.mulf %51, %52 : vector<24x256xf32>
    %54 = vector.extract_strided_slice %43 {offsets = [0, 17], sizes = [24, 256], strides = [1, 1]} : vector<24x290xf32> to vector<24x256xf32>
    %55 = vector.extract_strided_slice %43 {offsets = [0, 18], sizes = [24, 256], strides = [1, 1]} : vector<24x290xf32> to vector<24x256xf32>
    %56 = vector.broadcast %6 : vector<1x256xf32> to vector<24x256xf32>
    %57 = arith.mulf %55, %56 : vector<24x256xf32>
    %58 = vector.extract_strided_slice %43 {offsets = [0, 32], sizes = [24, 256], strides = [1, 1]} : vector<24x290xf32> to vector<24x256xf32>
    %59 = vector.broadcast %5 : vector<1x256xf32> to vector<24x256xf32>
    %60 = arith.mulf %58, %59 : vector<24x256xf32>
    %61 = vector.extract_strided_slice %43 {offsets = [0, 33], sizes = [24, 256], strides = [1, 1]} : vector<24x290xf32> to vector<24x256xf32>
    %62 = vector.extract_strided_slice %43 {offsets = [0, 34], sizes = [24, 256], strides = [1, 1]} : vector<24x290xf32> to vector<24x256xf32>
    %63 = vector.broadcast %6 : vector<1x256xf32> to vector<24x256xf32>
    %64 = arith.mulf %62, %63 : vector<24x256xf32>
    %65 = tpu.concatenate %46, %47, %50, %53, %54, %57, %60, %61, %64 in 0 : vector<24x256xf32>, vector<24x256xf32>, vector<24x256xf32>, vector<24x256xf32>, vector<24x256xf32>, vector<24x256xf32>, vector<24x256xf32>, vector<24x256xf32>, vector<24x256xf32> -> vector<216x256xf32>
    %66 = arith.truncf %65 : vector<216x256xf32> to vector<216x256xbf16>
    %c0_13 = arith.constant 0 : index
    %c0_14 = arith.constant 0 : index
    %67 = vector.load %arg5[%c0_13, %c0_14] : memref<32x216xbf16, #tpu.memory_space<vmem>>, vector<32x216xbf16>
    %cst_15 = arith.constant dense<0.000000e+00> : vector<32x256xf32>
    %68 = tpu.matmul %67, %66, %cst_15 {dimension_numbers = #tpu.dot_dimension_numbers<[1], [0], [0], [1], [0, 0, 1, 1], [], []>} : vector<32x216xbf16>, vector<216x256xbf16>, vector<32x256xf32> -> vector<32x256xf32>
    %c0_16 = arith.constant 0 : index
    %c0_17 = arith.constant 0 : index
    %69 = vector.load %arg6[%c0_16, %c0_17] : memref<32x1xf32, #tpu.memory_space<vmem>>, vector<32x1xf32>
    %70 = vector.broadcast %69 : vector<32x1xf32> to vector<32x256xf32>
    %71 = arith.mulf %68, %70 : vector<32x256xf32>
    %c0_18 = arith.constant 0 : index
    %c0_19 = arith.constant 0 : index
    %72 = vector.load %arg7[%c0_18, %c0_19] : memref<32x1xf32, #tpu.memory_space<vmem>>, vector<32x1xf32>
    %73 = vector.broadcast %72 : vector<32x1xf32> to vector<32x256xf32>
    %74 = arith.addf %71, %73 : vector<32x256xf32>
    %cst_20 = arith.constant 0.000000e+00 : f32
    %75 = vector.broadcast %cst_20 : f32 to vector<32x256xf32>
    %76 = arith.maximumf %74, %75 : vector<32x256xf32>
    %77 = tpu.transpose %76, [1, 0] : vector<32x256xf32> -> vector<256x32xf32>
    %78 = vector.shape_cast %77 : vector<256x32xf32> to vector<16x16x32xf32>
    %c0_21 = arith.constant 0 : index
    %c0_22 = arith.constant 0 : index
    %79 = vector.load %arg8[%c0_21, %c0_22] : memref<32x16xbf16, #tpu.memory_space<vmem>>, vector<32x16xbf16>
    %80 = arith.truncf %78 : vector<16x16x32xf32> to vector<16x16x32xbf16>
    %cst_23 = arith.constant dense<0.000000e+00> : vector<32x16x32xf32>
    %81 = tpu.matmul %79, %80, %cst_23 {dimension_numbers = #tpu.dot_dimension_numbers<[1], [0], [0], [1, 2], [0, 0, 1, 1, 1, 2], [], []>} : vector<32x16xbf16>, vector<16x16x32xbf16>, vector<32x16x32xf32> -> vector<32x16x32xf32>
    %82 = tpu.transpose %81, [0, 2, 1] : vector<32x16x32xf32> -> vector<32x32x16xf32>
    %83 = vector.shape_cast %82 : vector<32x32x16xf32> to vector<1024x16xf32>
    %84 = tpu.transpose %83, [1, 0] : vector<1024x16xf32> -> vector<16x1024xf32>
    %c0_24 = arith.constant 0 : index
    %c0_25 = arith.constant 0 : index
    %85 = vector.load %arg9[%c0_24, %c0_25] : memref<32x16xbf16, #tpu.memory_space<vmem>>, vector<32x16xbf16>
    %86 = arith.truncf %84 : vector<16x1024xf32> to vector<16x1024xbf16>
    %cst_26 = arith.constant dense<0.000000e+00> : vector<32x1024xf32>
    %87 = tpu.matmul %85, %86, %cst_26 {dimension_numbers = #tpu.dot_dimension_numbers<[1], [0], [0], [1], [0, 0, 1, 1], [], []>} : vector<32x16xbf16>, vector<16x1024xbf16>, vector<32x1024xf32> -> vector<32x1024xf32>
    %c0_27 = arith.constant 0 : index
    %c0_28 = arith.constant 0 : index
    %c0_29 = arith.constant 0 : index
    %88 = vector.load %arg12[%c0_27, %c0_28, %c0_29] : memref<1x32x1024xf32, #tpu.memory_space<vmem>>, vector<1x32x1024xf32>
    %89 = vector.shape_cast %88 : vector<1x32x1024xf32> to vector<32x1024xf32>
    %90 = vector.shape_cast %87 : vector<32x1024xf32> to vector<1x32x1024xf32>
    tpu.vector_store %arg12[%c0_27, %c0_28, %c0_29], %90 {strides = array<i32>} : memref<1x32x1024xf32, #tpu.memory_space<vmem>>, vector<1x32x1024xf32>,
    return
  }
  func.func @transform_0(%arg0: i32) -> (i32, i32, i32) {
    %c0_i32 = arith.constant 0 : i32
    %c0_i32_0 = arith.constant 0 : i32
    %c0_i32_1 = arith.constant 0 : i32
    return %arg0, %c0_i32, %c0_i32_0 : i32, i32, i32
  }
  func.func @transform_1(%arg0: i32) -> (i32, i32) {
    %c0_i32 = arith.constant 0 : i32
    %c0_i32_0 = arith.constant 0 : i32
    %c0_i32_1 = arith.constant 0 : i32
    return %c0_i32, %c0_i32_0 : i32, i32
  }
  func.func @transform_2(%arg0: i32) -> (i32, i32) {
    %c0_i32 = arith.constant 0 : i32
    %c0_i32_0 = arith.constant 0 : i32
    %c0_i32_1 = arith.constant 0 : i32
    return %c0_i32, %c0_i32_0 : i32, i32
  }
  func.func @transform_3(%arg0: i32) -> (i32, i32) {
    %c0_i32 = arith.constant 0 : i32
    %c0_i32_0 = arith.constant 0 : i32
    %c0_i32_1 = arith.constant 0 : i32
    return %c0_i32, %c0_i32_0 : i32, i32
  }
  func.func @transform_4(%arg0: i32) -> (i32, i32) {
    %c0_i32 = arith.constant 0 : i32
    %c0_i32_0 = arith.constant 0 : i32
    %c0_i32_1 = arith.constant 0 : i32
    return %c0_i32, %c0_i32_0 : i32, i32
  }
  func.func @transform_5(%arg0: i32) -> (i32, i32) {
    %c0_i32 = arith.constant 0 : i32
    %c0_i32_0 = arith.constant 0 : i32
    %c0_i32_1 = arith.constant 0 : i32
    return %c0_i32, %c0_i32_0 : i32, i32
  }
  func.func @transform_6(%arg0: i32) -> (i32, i32) {
    %c0_i32 = arith.constant 0 : i32
    %c0_i32_0 = arith.constant 0 : i32
    %c0_i32_1 = arith.constant 0 : i32
    return %c0_i32, %c0_i32_0 : i32, i32
  }
  func.func @transform_7(%arg0: i32) -> (i32, i32) {
    %c0_i32 = arith.constant 0 : i32
    %c0_i32_0 = arith.constant 0 : i32
    %c0_i32_1 = arith.constant 0 : i32
    return %c0_i32, %c0_i32_0 : i32, i32
  }
  func.func @transform_8(%arg0: i32) -> (i32, i32) {
    %c0_i32 = arith.constant 0 : i32
    %c0_i32_0 = arith.constant 0 : i32
    %c0_i32_1 = arith.constant 0 : i32
    return %c0_i32, %c0_i32_0 : i32, i32
  }
  func.func @transform_9(%arg0: i32) -> (i32, i32) {
    %c0_i32 = arith.constant 0 : i32
    %c0_i32_0 = arith.constant 0 : i32
    %c0_i32_1 = arith.constant 0 : i32
    return %c0_i32, %c0_i32_0 : i32, i32
  }
  func.func @transform_10(%arg0: i32) -> (i32, i32) {
    %c0_i32 = arith.constant 0 : i32
    %c0_i32_0 = arith.constant 0 : i32
    %c0_i32_1 = arith.constant 0 : i32
    return %c0_i32, %c0_i32_0 : i32, i32
  }
  func.func @transform_11(%arg0: i32) -> (i32, i32, i32) {
    %c0_i32 = arith.constant 0 : i32
    %c0_i32_0 = arith.constant 0 : i32
    %c0_i32_1 = arith.constant 0 : i32
    return %arg0, %c0_i32, %c0_i32_0 : i32, i32, i32
  }
}

</mosaic_0001>

<bundles_post_ra>
// kernel: tpu_custom_call.1
= control target key start
LH: loop header
LB: loop body
LE: loop exit
PB: predicated region body
PF: predicated region fallthrough
CT: control target
= control target key end

     0   :  { %s7725_s0 = inlined_call_operand.vmem [shape: f32[2,8,324], index: 0, kind: input, shape index: {}]   ;;  %s7726_s1 = inlined_call_operand.vmem [shape: bf16[24,72], index: 1, kind: input, shape index: {}]   ;;  %s7727_s2 = inlined_call_operand.vmem [shape: f32[24,1], index: 2, kind: input, shape index: {}]   ;;  %s7728_s3 = inlined_call_operand.vmem [shape: f32[24,1], index: 3, kind: input, shape index: {}]   ;;  %s7729_s4 = inlined_call_operand.vmem [shape: bf16[32,216], index: 4, kind: input, shape index: {}]   ;;  %s7730_s5 = inlined_call_operand.vmem [shape: f32[32,1], index: 5, kind: input, shape index: {}]   ;;  %s7731_s6 = inlined_call_operand.vmem [shape: f32[32,1], index: 6, kind: input, shape index: {}]   ;;  %s7732_s7 = inlined_call_operand.vmem [shape: bf16[32,16], index: 7, kind: input, shape index: {}]   ;;  %s7733_s8 = inlined_call_operand.vmem [shape: bf16[32,16], index: 8, kind: input, shape index: {}]   ;;  %s7734_s9 = inlined_call_operand.vmem [shape: f32[3,290], index: 9, kind: input, shape index: {}]   ;;  %s7735_s10 = inlined_call_operand.vmem [shape: f32[2,256], index: 10, kind: input, shape index: {}]   ;;  %s7736_s11 = inlined_call_operand.hbm [shape: f32[2,32,1024], index: 11, kind: output, shape index: {}]  }
   0x1   :  { %7763 = sst [smem:[#allocation5_spill]] %s7725_s0 }
   0x2   :  { %7764 = sst [smem:[#allocation6_spill]] %s7726_s1 }
   0x3   :  { %16 = vsyncpa [#allocation3], 0 }
   0x4   :  { %18 = vsyncpa [#allocation3 + $0x1], 0  ;;  %s6181_s17 = smov 0   ;;  %s6183_s18 = smov 0  }
   0x5   :  { %s6185_s19 = smov 0   ;;  %s6187_s20 = smov 0  }
   0x6 LB: > { %s6202_s21 = sadd.s32 4294967295, %s6099_s20   ;;  %s5046_s22 = sadd.s32 4294967294, %s6099_s20   ;;  %s6099_s20 = sphi %s6187_s20, %s7785_s20   ;;  %s6095_s19 = sphi %s6185_s19, %s7784_s19   ;;  %s6091_s18 = sphi %s6183_s18, %s7783_s18   ;;  %s6087_s17 = sphi %s6181_s17, %s7782_s17  }
   0x7   : > { %s6206_s23 = sadd.s32 1, %s6099_s20   ;;  %s267_s24 = sadd.s32 1, %s6095_s19 }
   0x8   : > { %s264_s25 = ssub.s32 %s6099_s20, %s6206_s23  ;;  %p277_p0 = scmp.ne.s32.totalorder %s6095_s19, %s6091_s18 }
   0x9   : > { %p265_p1 = scmp.eq.s32.totalorder %s264_s25, 0  ;;  %p278_p2 = scmp.eq.s32.totalorder %s6202_s21, 1 }
   0xa   : > { %p283_p3 = scmp.ne.s32.totalorder %s6091_s18, %s6087_s17  ;;  %p284_p4 = scmp.eq.s32.totalorder %s5046_s22, 1 }
   0xb   : > { %s6217_s26 = scalar_select %p265_p1, %s6095_s19, %s267_s24  }
   0xc   : > { %p6219_p5 = por %p278_p2, %p277_p0  ;;  %p6223_p6 = por %p284_p4, %p283_p3 }
   0xd   : > { %p5049_p7 = scmp.ge.s32.totalorder %s6099_s20, 1  ;;  %p340_p8 = scmp.lt.s32.totalorder %s6099_s20, 3 }
   0xf   : > { %p341_p9 = pnand %p5049_p7, %p340_p8 }
  0x10   : > { %s7751_s14 = smov (!%p341_p9), 34   ;;  %s7749_s15 = smov (!%p341_p9), 32  }
  0x11   : > { %344 = sbr.rel (%p341_p9) target bundleno = 2237 (0x8bd), region = 64  ;;  %p380_p10 = scmp.lt.s32.totalorder (!%p341_p9), %s6202_s21, 1 }
  0x12   : > { %s7757_s22 = smov (!%p341_p9), 18   ;;  %s7753_s25 = smov (!%p341_p9), 2  }
  0x13   : > { %s7767_s0 = sld [smem:[#allocation5_spill]] (!%p341_p9)  ;;  %s7755_s13 = smov (!%p341_p9), 16  }
  0x14   : > { %s7739_s29 = smov (!%p341_p9), 96   ;;  %s7741_s30 = smov (!%p341_p9), 94  }
  0x15   : > { %s7768_s1 = sld [smem:[#allocation6_spill]] (!%p341_p9) }
  0x16   : > { %v394_v0 = vlaneseq  ;;  %v6232_v1 = vld [vmem:[%s7734_s9 + $0x8] sm:$0x7]  ;;  %v6239_v3 = vld [vmem:[%s7734_s9] sm:$0x77]  ;;  %s381_s16 = scalar_select %p380_p10, %s6202_s21, 1  ;;  %vm523_vm0 = vcmask 277504  }
  0x17   : > { %vm508_vm1 = vcmask 261120   ;;  %vm493_vm2 = vcmask 146432   ;;  %vm460_vm3 = vcmask 15360   ;;  %vm478_vm4 = vcmask 130048  }
  0x18   : > { %v6234_v2 = vshrl.u32 %v394_v0, 7  ;;  %s5126_s24 = smul.u32 24, %s381_s16  ;;  %s7743_s16 = smov 111   ;;  %vm672_vm5 = vcmask 588800   ;;  %vm679_vm6 = vcmask 1043456   ;;  %vm640_vm7 = vcmask 769024  }
  0x19   : > { %vm625_vm8 = vcmask 777216   ;;  %vm613_vm9 = vcmask 785408   ;;  %vm583_vm10 = vcmask 908288   ;;  %vm598_vm11 = vcmask 900096  }
  0x1a   : > { %v6242_v4 = vsub.s32 1, %v6234_v2  ;;  %v430_v5 = vsub.s32 5, %v6234_v2  ;;  %v6246_v6 = vsub.s32 0, %v6234_v2  ;;  %v400_v7 = vsub.s32 4, %v6234_v2  ;;  %s384_s12 = scalar_lea.vmem %s7767_s0, %s5126_s24  ;;  %s7737_s24 = smov 95  }
  0x1b   : > { %v6291_v20 = vld [vmem:[%s384_s12 + $0x8] sm:$0xff]  ;;  %v6293_v21 = vld [vmem:[%s384_s12 + $0x10] sm:$0xff]  ;;  %v6307_v23 = vld [vmem:[%s384_s12] sm:$0xff]  ;;  %s7747_s12 = smov 110   ;;  %vm541_vm12 = vcmask 1039360   ;;  %vm556_vm13 = vcmask 1031168  }
  0x1c   : > { %v435_v8 = vrot.slane %v6232_v1, %v6242_v4  ;;  %v427_v9 = vrot.slane %v6239_v3, %v6242_v4  ;;  %v431_v10 = vrot.slane %v6239_v3, %v430_v5  ;;  %v397_v11 = vrot.slane %v6239_v3, %v6246_v6 }
  0x1d   : > { %v401_v14 = vrot.slane %v6239_v3, %v400_v7  ;;  %v405_v17 = vrot.slane %v6232_v1, %v6246_v6  ;;  %v6301_v22 = vpack.i.bf16 %v6293_v21, %v6291_v20  ;;  %vm571_vm14 = vcmask 916480  }
  0x1e   : > { %v450_v12 = vrot.slane %v435_v8, %v6242_v4  ;;  %v442_v13 = vrot.slane %v427_v9, %v6242_v4  ;;  %v446_v15 = vrot.slane %v431_v10, %v6242_v4  ;;  %v6263_v16 = vrot.slane %v397_v11, %v6246_v6  ;;  %v6352_v8 = vld [vmem:[%s7768_s1] sm:$0xff]  }
  0x1f   : > { %v6271_v18 = vrot.slane %v401_v14, %v6246_v6  ;;  %v6274_v19 = vrot.slane %v405_v17, %v6246_v6  ;;  %5121 = vmatprep.mubr.msk.bf16.mxu1 %vm672_vm5, %v6352_v8  ;;  %v6114_v10 = vmov 0   ;;  %v815_v14 = vld [vmem:[%s7728_s3] sm:$0xff]  ;;  %vm1363_vm15 = vcmask 719872  }
  0x20   : > { %521 = vrot.lane.b32.xlu1 %v450_v12, %s7751_s14  ;;  %517 = vrot.lane.b32.xlu0 %v442_v13, %s7751_s14 }
  0x21   : > { %721 = vmatprep.mubr.bf16.mxu0 %v6114_v10  ;;  %5225 = vset.pattern.permute.xlu1 %v6114_v10 }
  0x22   : > { %5226 = vset.pattern.permute.xlu0 %v6114_v10 }
  0x24   : > { %519 = vrot.lane.b32.xlu0 %v446_v15, %s7751_s14  ;;  %502 = vrot.lane.b32.xlu1 %v6263_v16, %s7749_s15  ;;  %s7775_s14 = smov 111  }
  0x28   : > { %504 = vrot.lane.b32.xlu0 %v6271_v18, %s7749_s15  ;;  %506 = vrot.lane.b32.xlu1 %v6274_v19, %s7749_s15 }
  0x2c   : > { %487 = vrot.lane.b32.xlu0 %v442_v13, %s7757_s22  ;;  %489 = vrot.lane.b32.xlu1 %v446_v15, %s7757_s22 }
  0x30   : > { %491 = vrot.lane.b32.xlu0 %v450_v12, %s7757_s22  ;;  %454 = vrot.lane.b32.xlu1 %v442_v13, %s7753_s25  ;;  %v790_v13 = vld [vmem:[%s7727_s2 + $0x10] sm:$0xff]  ;;  %s7776_s22 = smov 112  }
  0x34   : > { %456 = vrot.lane.b32.xlu0 %v446_v15, %s7753_s25  ;;  %458 = vrot.lane.b32.xlu1 %v450_v12, %s7753_s25  ;;  %v788_v12 = vld [vmem:[%s7727_s2] sm:$0xff]  ;;  %s7769_s25 = smov 18  }
  0x35   : > { %v388_v15 = vld [vmem:[%s7735_s10] sm:$0xf] }
  0x36   : > { %v915_v17 = vrot.slane %v388_v15, %v6242_v4 }
  0x38   : > { %472 = vrot.lane.b32.xlu0 %v6263_v16, %s7755_s13  ;;  %474 = vrot.lane.b32.xlu1 %v6271_v18, %s7755_s13 }
  0x3c   : > { %476 = vrot.lane.b32.xlu0 %v6274_v19, %s7755_s13  ;;  %5191 = vrot.lane.b32.xlu1 %v6301_v22, %s7743_s16  ;;  %s7770_s13 = smov 16  }
  0x40   : > { %5186 = vrot.lane.b32.xlu0 %v6301_v22, %s7737_s24  ;;  %577 = vrot.lane.b32.xlu1 %v6307_v23, %s7743_s16  ;;  %s7773_s16 = smov 32  }
  0x44   : > { %619 = vrot.lane.b32.xlu0 %v6307_v23, %s7737_s24  ;;  %s7745_s24 = smov 126  }
  0x92   : > { %v522_v24 = vpop.permute.xlu1 %521  ;;  %v518_v25 = vpop.permute.xlu0 %517 }
  0x93   : > { %v529_v31 = vmul.f32 %v518_v25, %v6307_v23 }
  0x96   : > { %v520_v26 = vpop.permute.xlu0 %519  ;;  %v503_v27 = vpop.permute.xlu1 %502 }
  0x97   : > { %v524_v28 = vsel %vm523_vm0, %v518_v25, %v520_v26  ;;  %v525_v29 = vsel %vm523_vm0, %v520_v26, %v522_v24  ;;  %v514_v30 = vmul.f32 %v503_v27, %v6307_v23  ;;  %v918_v24 = vsub.s32 3, %v6234_v2  ;;  %v817_v25 = vld [vmem:[%s7728_s3 + $0x10] sm:$0xff] }
  0x98   : > { %v530_v32 = vmul.f32 %v524_v28, %v6291_v20  ;;  %v531_v33 = vmul.f32 %v525_v29, %v6293_v21  ;;  %v925_v26 = vrot.slane %v915_v17, %v6242_v4  ;;  %v6387_v28 = vsub.s32 2, %v6234_v2 }
  0x99   : > { %607 = vrot.lane.b32.xlu1 %v514_v30, %s7739_s29  ;;  %v919_v29 = vrot.slane %v388_v15, %v918_v24  ;;  %v816_v30 = vld [vmem:[%s7728_s3 + $0x8] sm:$0xff] }
  0x9a   : > { %v505_v34 = vpop.permute.xlu0 %504  ;;  %v507_v35 = vpop.permute.xlu1 %506  ;;  %638 = vrot.lane.b32.xlu0 %v531_v33, %s7741_s30  ;;  %v5195_v36 = vpack.i.bf16 %v530_v32, %v529_v31  ;;  %v895_v33 = vrot.slane %v388_v15, %v6387_v28 }
  0x9b   : > { %v509_v37 = vsel %vm508_vm1, %v503_v27, %v505_v34  ;;  %v510_v38 = vsel %vm508_vm1, %v505_v34, %v507_v35  ;;  %v891_v27 = vrot.slane %v388_v15, %v6246_v6  ;;  %v929_v32 = vrot.slane %v919_v29, %v6242_v4 }
  0x9c   : > { %v515_v39 = vmul.f32 %v509_v37, %v6291_v20  ;;  %v516_v40 = vmul.f32 %v510_v38, %v6293_v21  ;;  %v6402_v34 = vrot.slane %v895_v33, %v6246_v6 }
  0x9d   : > { %5196 = vrot.lane.b32.xlu1 %v5195_v36, %s7741_s30  ;;  %v6394_v31 = vrot.slane %v891_v27, %v6246_v6  ;;  %s7781_s30 = smov 96  }
  0x9e   : > { %v488_v41 = vpop.permute.xlu0 %487  ;;  %v490_v42 = vpop.permute.xlu1 %489  ;;  %v5200_v43 = vpack.i.bf16 %v516_v40, %v515_v39 }
  0x9f   : > { %v499_v44 = vmul.f32 %v488_v41, %v6307_v23  ;;  %v494_v45 = vsel %vm493_vm2, %v488_v41, %v490_v42 }
  0xa0   : > { %v500_v50 = vmul.f32 %v494_v45, %v6291_v20 }
  0xa1   : > { %5201 = vrot.lane.b32.xlu1 %v5200_v43, %s7739_s29  ;;  %592 = vrot.lane.b32.xlu0 %v499_v44, %s7747_s12  ;;  %s7759_s29 = smov 127  }
  0xa2   : > { %v492_v46 = vpop.permute.xlu0 %491  ;;  %v455_v47 = vpop.permute.xlu1 %454 }
  0xa3   : > { %v495_v48 = vsel %vm493_vm2, %v490_v42, %v492_v46  ;;  %v466_v49 = vmul.f32 %v455_v47, %v6307_v23 }
  0xa4   : > { %v501_v51 = vmul.f32 %v495_v48, %v6293_v21 }
  0xa5   : > { %550 = vrot.lane.b32.xlu1 %v466_v49, %s7745_s24 }
  0xa6   : > { %v457_v52 = vpop.permute.xlu0 %456  ;;  %v459_v53 = vpop.permute.xlu1 %458  ;;  %v5205_v54 = vpack.i.bf16 %v501_v51, %v500_v50 }
  0xa7   : > { %v461_v55 = vsel %vm460_vm3, %v455_v47, %v457_v52  ;;  %v462_v56 = vsel %vm460_vm3, %v457_v52, %v459_v53 }
  0xa8   : > { %v467_v57 = vmul.f32 %v461_v55, %v6291_v20  ;;  %v468_v58 = vmul.f32 %v462_v56, %v6293_v21  ;;  %5206 = vrot.lane.b32.xlu0 %v5205_v54, %s7747_s12  ;;  %s7774_s12 = smov 110  }
  0xaa   : > { %v473_v59 = vpop.permute.xlu0 %472  ;;  %v475_v60 = vpop.permute.xlu1 %474  ;;  %v5210_v61 = vpack.i.bf16 %v468_v58, %v467_v57 }
  0xab   : > { %v479_v62 = vsel %vm478_vm4, %v473_v59, %v475_v60  ;;  %v484_v11 = vmul.f32 %v473_v59, %v6307_v23 }
  0xac   : > { %5211 = vrot.lane.b32.xlu1 %v5210_v61, %s7745_s24  ;;  %v485_v5 = vmul.f32 %v479_v62, %v6291_v20  ;;  %s7761_s24 = smov 112  }
  0xae   : > { %v477_v63 = vpop.permute.xlu0 %476  ;;  %v5192_v4 = vpop.permute.xlu1 %5191 }
  0xaf   : > { %v480_v0 = vsel %vm478_vm4, %v475_v60, %v477_v63  ;;  %v5194_v62 = vunpack.i.h.bf16 %v5192_v4  ;;  %v5193_v63 = vunpack.i.l.bf16 %v5192_v4 }
  0xb0   : > { %v486_v7 = vmul.f32 %v480_v0, %v6293_v21  ;;  %5221 = vrot.lane.b32.xlu1 %v6301_v22, %s7759_s29  ;;  %v789_v22 = vld [vmem:[%s7727_s2 + $0x8] sm:$0xff] }
  0xb2   : > { %v5215_v9 = vpack.i.bf16 %v486_v7, %v485_v5  ;;  %v5187_v6 = vpop.permute.xlu0 %5186  ;;  %v578_v35 = vpop.permute.xlu1 %577 }
  0xb3   : > { %v5189_v42 = vunpack.i.h.bf16 %v5187_v6  ;;  %v5188_v43 = vunpack.i.l.bf16 %v5187_v6 }
  0xb4   : > { %5216 = vrot.lane.b32.xlu0 %v5215_v9, %s7761_s24  ;;  %793 = vperm.xlu1 %5225, %v788_v12   ;;  %v584_v12 = vsel %vm583_vm10, %v578_v35, %v5193_v63  ;;  %v422_v35 = vmul.f32 %v6271_v18, %v6291_v20  ;;  %v421_v18 = vmul.f32 %v6263_v16, %v6307_v23 }
  0xb5   : > { %v627_v54 = vsel %vm625_vm8, %v5188_v43, %v5189_v42 }
  0xb6   : > { %v620_v36 = vpop.permute.xlu0 %619 }
  0xb7   : > { %v626_v51 = vsel %vm625_vm8, %v620_v36, %v5188_v43 }
  0xb8   : > { %565 = vrot.lane.b32.xlu0 %v484_v11, %s7761_s24  ;;  %820 = vperm.xlu1 %5225, %v815_v14   ;;  %s7771_s24 = smov 2   ;;  %v585_v11 = vsel %vm583_vm10, %v5193_v63, %v5194_v62 }
  0xbc   : > { %535 = vrot.lane.b32.xlu0 %v6307_v23, %s7759_s29  ;;  %830 = vperm.xlu1 %5225, %v817_v25   ;;  %s7772_s29 = smov 34  }
  0xc0   : > { %803 = vperm.xlu0 %5226, %v790_v13   ;;  %825 = vperm.xlu1 %5225, %v816_v30  }
  0xc4   : > { %798 = vperm.xlu0 %5226, %v789_v22   ;;  %970 = vrot.lane.b32.xlu1 %v929_v32, %s7769_s25 }
  0xc8   : > { %968 = vrot.lane.b32.xlu0 %v925_v26, %s7769_s25  ;;  %953 = vrot.lane.b32.xlu1 %v6402_v34, %s7770_s13  ;;  %s7777_s25 = smov 126  }
  0xcc   : > { %951 = vrot.lane.b32.xlu0 %v6394_v31, %s7770_s13  ;;  %934 = vrot.lane.b32.xlu1 %v929_v32, %s7771_s24  ;;  %s7778_s13 = smov 127  }
  0xd0   : > { %932 = vrot.lane.b32.xlu0 %v925_v26, %s7771_s24  ;;  %1004 = vrot.lane.b32.xlu1 %v929_v32, %s7772_s29  ;;  %v423_v32 = vmul.f32 %v6274_v19, %v6293_v21  ;;  %s7779_s24 = smov 94  }
  0xd4   : > { %1002 = vrot.lane.b32.xlu0 %v925_v26, %s7772_s29  ;;  %987 = vrot.lane.b32.xlu1 %v6402_v34, %s7773_s16  ;;  %s7780_s29 = smov 95  }
  0xd8   : > { %985 = vrot.lane.b32.xlu0 %v6394_v31, %s7773_s16 }
 0x10b   : > { %v608_v37 = vpop.permute.xlu1 %607 }
 0x10c   : > { %v639_v38 = vpop.permute.xlu0 %638 }
 0x10d   : > { %v660_v39 = vpack.c.bf16 %v639_v38, %v639_v38 }
 0x10f   : > { %5125 = vmatprep.subr.msk.bf16.mxu1 %vm679_vm6, %v660_v39  ;;  %v5197_v40 = vpop.permute.xlu1 %5196  ;;  %v687_v41 = vsel %vm679_vm6, %v660_v39, 0 }
 0x110   : > { %v5199_v44 = vunpack.i.h.bf16 %v5197_v40  ;;  %v5198_v45 = vunpack.i.l.bf16 %v5197_v40  ;;  %5112 = vmatpush3.bf16.msra.mxu1 %v687_v41 }
 0x112   : > { %v642_v46 = vsel %vm640_vm7, %v5199_v44, %v639_v38  ;;  %v641_v47 = vsel %vm640_vm7, %v5198_v45, %v5199_v44 }
 0x113   : > { %v5202_v48 = vpop.permute.xlu1 %5201  ;;  %v659_v49 = vpack.c.bf16 %v642_v46, %v642_v46  ;;  %v658_v50 = vpack.c.bf16 %v641_v47, %v641_v47  ;;  %v593_v56 = vpop.permute.xlu0 %592  ;;  %v6028_v46 = vld [vmem:[%s7768_s1 + $0x8] ss:$0 sps:$4 sm:$0xff]   ;;  %s6119_s1 = smov [#allocation2]  }
 0x114   : > { %v5204_v52 = vunpack.i.h.bf16 %v5202_v48  ;;  %v5203_v53 = vunpack.i.l.bf16 %v5202_v48 }
 0x115   : > { %5054 = vmatprep.subr.msk.bf16.mxu0 %vm679_vm6, %v659_v49  ;;  %v681_v55 = vsel %vm679_vm6, %v658_v50, 0  ;;  %v857_v50 = vsub.s32 6, %v6234_v2 }
 0x116   : > { %696 = vmatpush1.bf16.msra.mxu0 %v681_v55  ;;  %v657_v57 = vpack.c.bf16 %v5189_v42, %v5204_v52  ;;  %v615_v58 = vsel %vm613_vm9, %v5203_v53, %v5204_v52  ;;  %v614_v59 = vsel %vm613_vm9, %v608_v37, %v5203_v53  ;;  %v854_v53 = vrot.slane %v6239_v3, %v6387_v28 }
 0x117   : > { %v656_v60 = vpack.c.bf16 %v627_v54, %v615_v58  ;;  %v655_v61 = vpack.c.bf16 %v626_v51, %v614_v59  ;;  %v551_v0 = vpop.permute.xlu1 %550  ;;  %v858_v58 = vrot.slane %v6239_v3, %v857_v50 }
 0x118   : > { %5113 = vmatprep.subr.bf16.mxu1 %v657_v57 }
 0x119   : > { %697 = vmatprep.subr.bf16.mxu0 %v656_v60  ;;  %5114 = vmatpush3.bf16.msra.mxu1 %v657_v57 }
 0x11a   : > { %698 = vmatpush1.bf16.msra.mxu0 %v655_v61  ;;  %v5207_v5 = vpop.permute.xlu0 %5206 }
 0x11b   : > { %v5209_v7 = vunpack.i.h.bf16 %v5207_v5  ;;  %v5208_v9 = vunpack.i.l.bf16 %v5207_v5  ;;  %v862_v5 = vrot.slane %v6232_v1, %v6387_v28 }
 0x11d   : > { %v654_v13 = vpack.c.bf16 %v5209_v7, %v5194_v62  ;;  %v600_v14 = vsel %vm598_vm11, %v5208_v9, %v5209_v7  ;;  %v599_v15 = vsel %vm598_vm11, %v593_v56, %v5208_v9  ;;  %v869_v62 = vrot.slane %v854_v53, %v6387_v28 }
 0x11e   : > { %v5212_v17 = vpop.permute.xlu1 %5211  ;;  %v653_v22 = vpack.c.bf16 %v600_v14, %v585_v11  ;;  %v652_v24 = vpack.c.bf16 %v599_v15, %v584_v12  ;;  %v6459_v12 = vrot.slane %v858_v58, %v6387_v28  ;;  %v877_v1 = vrot.slane %v862_v5, %v6387_v28 }
 0x11f   : > { %5115 = vmatprep.subr.bf16.mxu1 %v654_v13  ;;  %v5214_v29 = vunpack.i.h.bf16 %v5212_v17  ;;  %v5213_v30 = vunpack.i.l.bf16 %v5212_v17 }
 0x120   : > { %699 = vmatprep.subr.bf16.mxu0 %v653_v22  ;;  %5116 = vmatpush3.bf16.msra.mxu1 %v654_v13 }
 0x121   : > { %700 = vmatpush1.bf16.msra.mxu0 %v652_v24  ;;  %v558_v38 = vsel %vm556_vm13, %v5213_v30, %v5214_v29  ;;  %v557_v19 = vsel %vm556_vm13, %v551_v0, %v5213_v30 }
 0x122   : > { %v5222_v25 = vpop.permute.xlu1 %5221 }
 0x123   : > { %v5224_v26 = vunpack.i.h.bf16 %v5222_v25  ;;  %v5223_v27 = vunpack.i.l.bf16 %v5222_v25 }
 0x125   : > { %v543_v36 = vsel %vm541_vm12, %v5223_v27, %v5224_v26  ;;  %v648_v40 = vpack.c.bf16 %v5224_v26, %v423_v32 }
 0x126   : > { %v5217_v33 = vpop.permute.xlu0 %5216  ;;  %v647_v43 = vpack.c.bf16 %v543_v36, %v422_v35 }
 0x127   : > { %v5219_v4 = vunpack.i.h.bf16 %v5217_v33  ;;  %v5218_v6 = vunpack.i.l.bf16 %v5217_v33 }
 0x129   : > { %v651_v37 = vpack.c.bf16 %v5219_v4, %v5214_v29  ;;  %v573_v39 = vsel %vm571_vm14, %v5218_v6, %v5219_v4 }
 0x12a   : > { %v566_v41 = vpop.permute.xlu0 %565  ;;  %v650_v42 = vpack.c.bf16 %v573_v39, %v558_v38 }
 0x12b   : > { %v572_v21 = vsel %vm571_vm14, %v566_v41, %v5218_v6  ;;  %5117 = vmatprep.subr.bf16.mxu1 %v651_v37 }
 0x12c   : > { %v649_v44 = vpack.c.bf16 %v572_v21, %v557_v19  ;;  %701 = vmatprep.subr.bf16.mxu0 %v650_v42  ;;  %5118 = vmatpush3.bf16.msra.mxu1 %v651_v37 }
 0x12d   : > { %5119 = vmatprep.subr.bf16.mxu1 %v648_v40 }
 0x12e   : > { %v536_v20 = vpop.permute.xlu0 %535  ;;  %702 = vmatpush1.bf16.msra.mxu0 %v649_v44 }
 0x12f   : > { %v542_v45 = vsel %vm541_vm12, %v536_v20, %v5223_v27  ;;  %703 = vmatprep.subr.bf16.mxu0 %v647_v43  ;;  %v794_v16 = vpop.permute.xlu1 %793 }
 0x130   : > { %v646_v47 = vpack.c.bf16 %v542_v45, %v421_v18  ;;  %5120 = vmatpush3.bf16.msra.mxu1 %v648_v40 }
 0x132   : > { %704 = vmatpush1.bf16.msra.mxu0 %v646_v47 }
 0x133   : > { %5122 = vmatmul.mubr.msk.bf16.vlgmr.msra.gmra.mxu1 %vm672_vm5, %v6028_v46  ;;  %v821_v23 = vpop.permute.xlu1 %820 }
 0x134   : > { %2096 = vmatprep.mubr.bf16.mxu1 %v6114_v10 }
 0x135   : > { %5055 = vmatmul.mubr.msk.bf16.vlgmr.msra.gmra.mxu0 %vm672_vm5, %v6352_v8 }
 0x136   : > { %731 = vmatprep.mubr.bf16.mxu0 %v6114_v10 }
 0x137   : > { %v6449_v49 = vpop.permute.xlu1 %830 }
 0x13b   : > { %v804_v48 = vpop.permute.xlu0 %803  ;;  %v826_v56 = vpop.permute.xlu1 %825 }
 0x13d   : > { %5056 = vmatmul.mubr.msk.bf16.gmra.mxu0 %vm672_vm5, %v6028_v46 }
 0x13f   : > { %v799_v52 = vpop.permute.xlu0 %798  ;;  %v6463_v17 = vpop.permute.xlu1 %970 }
 0x143   : > { %v6461_v14 = vpop.permute.xlu0 %968  ;;  %v6484_v19 = vpop.permute.xlu1 %953 }
 0x144   : > { %v972_v37 = vsel %vm493_vm2, %v6461_v14, %v6463_v17 }
 0x147   : > { %v6479_v39 = vpop.permute.xlu0 %951 }
 0x148   : > { %v955_v47 = vsel %vm478_vm4, %v6479_v39, %v6484_v19 }
 0x1f3   : > { %v5123_v51 = vpop.f32.mrf.mxu1 }
 0x1f4   : > { %v814_v20 = vmul.f32 %v5123_v51, %v804_v48 }
 0x1f5   : > { %v723_v54 = vpop.f32.mrf.mxu0  ;;  %v774_v55 = vpop.f32.mrf.mxu1 }
 0x1f6   : > { %v806_v8 = vmul.f32 %v794_v16, %v723_v54  ;;  %v808_v57 = vmul.f32 %v794_v16, %v774_v55  ;;  %v841_v53 = vadd.f32 %v6449_v49, %v814_v20  ;;  %v933_v55 = vpop.permute.xlu0 %932 }
 0x1f7   : > { %v725_v59 = vpop.f32.mrf.mxu0  ;;  %v5124_v60 = vpop.f32.mrf.mxu1 }
 0x1f8   : > { %v833_v61 = vadd.f32 %v821_v23, %v806_v8  ;;  %v835_v63 = vadd.f32 %v821_v23, %v808_v57  ;;  %v807_v0 = vmul.f32 %v794_v16, %v725_v59  ;;  %v935_v60 = vpop.permute.xlu1 %934 }
 0x1f9   : > { %v727_v7 = vpop.f32.mrf.mxu0  ;;  %v777_v13 = vpop.f32.mrf.mxu1 }
 0x1fa   : > { %v842_v9 = vmax.f32 %v833_v61, 0.0  ;;  %v834_v11 = vadd.f32 %v821_v23, %v807_v0  ;;  %v809_v3 = vmul.f32 %v799_v52, %v727_v7  ;;  %v844_v24 = vmax.f32 %v835_v63, 0.0 }
 0x1fb   : > { %v729_v15 = vpop.f32.mrf.mxu0  ;;  %v811_v29 = vmul.f32 %v799_v52, %v777_v13  ;;  %v850_v61 = vmax.f32 %v841_v53, 0.0 }
 0x1fc   : > { %v6465_v22 = vmul.f32 %v869_v62, %v842_v9  ;;  %v843_v25 = vmax.f32 %v834_v11, 0.0  ;;  %v810_v26 = vmul.f32 %v799_v52, %v729_v15  ;;  %v836_v27 = vadd.f32 %v826_v56, %v809_v3 }
 0x1fd   : > { %v733_v30 = vpop.f32.mrf.mxu0  ;;  %v6476_v38 = vmul.f32 %v877_v1, %v844_v24  ;;  %v838_v21 = vadd.f32 %v826_v56, %v811_v29  ;;  %v6522_v7 = vmul.f32 %v877_v1, %v850_v61 }
 0x1fe   : > { %v6469_v32 = vmul.f32 %v6459_v12, %v843_v25  ;;  %v837_v33 = vadd.f32 %v826_v56, %v810_v26  ;;  %v812_v4 = vmul.f32 %v804_v48, %v733_v30  ;;  %v976_v6 = vmul.f32 %v6461_v14, %v6465_v22 }
 0x1ff   : > { %v845_v35 = vmax.f32 %v836_v27, 0.0  ;;  %v735_v36 = vpop.f32.mrf.mxu0  ;;  %v959_v44 = vmul.f32 %v6479_v39, %v6465_v22  ;;  %v978_v23 = vmul.f32 %v6463_v17, %v6476_v38  ;;  %v847_v52 = vmax.f32 %v838_v21, 0.0 }
 0x200   : > { %v846_v28 = vmax.f32 %v837_v33, 0.0  ;;  %1175 = vrot.lane.b32.xlu1 %v976_v6, %s7774_s12  ;;  %v839_v41 = vadd.f32 %v6449_v49, %v812_v4  ;;  %v977_v18 = vmul.f32 %v972_v37, %v6469_v32  ;;  %v813_v45 = vmul.f32 %v804_v48, %v735_v36 }
 0x201   : > { %v6481_v40 = vmul.f32 %v869_v62, %v845_v35  ;;  %v737_v42 = vpop.f32.mrf.mxu0  ;;  %v960_v48 = vmul.f32 %v955_v47, %v6469_v32  ;;  %v961_v56 = vmul.f32 %v6484_v19, %v6476_v38  ;;  %v6512_v58 = vmul.f32 %v877_v1, %v847_v52 }
 0x202   : > { %v6487_v43 = vmul.f32 %v6459_v12, %v846_v28  ;;  %v848_v50 = vmax.f32 %v839_v41, 0.0  ;;  %v5227_v51 = vpack.i.bf16 %v978_v23, %v977_v18  ;;  %v840_v54 = vadd.f32 %v6449_v49, %v813_v45  ;;  %v1005_v23 = vpop.permute.xlu1 %1004 }
 0x203   : > { %1142 = vrot.lane.b32.xlu0 %v6481_v40, %s7775_s14  ;;  %v738_v46 = vpop.f32.mrf.mxu0  ;;  %v943_v57 = vmul.f32 %v933_v55, %v6481_v40  ;;  %v5232_v59 = vpack.i.bf16 %v961_v56, %v960_v48  ;;  %v936_v49 = vsel %vm460_vm3, %v933_v55, %v935_v60  ;;  %v5237_v5 = vpack.i.bf16 %v6465_v22, %v6512_v58 }
 0x204   : > { %1106 = vrot.lane.b32.xlu1 %v959_v44, %s7776_s22  ;;  %v5242_v16 = vpack.i.bf16 %v6487_v43, %v6476_v38  ;;  %v6509_v8 = vmul.f32 %v869_v62, %v848_v50  ;;  %v849_v63 = vmax.f32 %v840_v54, 0.0  ;;  %v944_v62 = vmul.f32 %v936_v49, %v6487_v43  ;;  %v1003_v50 = vpop.permute.xlu0 %1002 }
 0x205   : > { %v942_v11 = vmul.f32 %v935_v60, %v6476_v38  ;;  %v6531_v3 = vmul.f32 %v972_v37, %v6487_v43  ;;  %v5247_v15 = vpack.i.bf16 %v6512_v58, %v6487_v43  ;;  %v945_v24 = vmul.f32 %v935_v60, %v6512_v58 }
 0x206   : > { %v5257_v0 = vpack.i.bf16 %v6469_v32, %v6509_v8  ;;  %v6525_v9 = vmul.f32 %v6459_v12, %v849_v63  ;;  %v6538_v25 = vmul.f32 %v6463_v17, %v6512_v58  ;;  %v6546_v26 = vmul.f32 %v6463_v17, %v6522_v7 }
 0x207   : > { %5243 = vrot.lane.b32.xlu0 %v5242_v16, %s7775_s14  ;;  %v5267_v13 = vpack.i.bf16 %v944_v62, %v942_v11  ;;  %v940_v1 = vmul.f32 %v933_v55, %v6465_v22  ;;  %v946_v27 = vmul.f32 %v933_v55, %v6509_v8  ;;  %v6559_v4 = vmul.f32 %v6402_v34, %v6469_v32  ;;  %v988_v62 = vpop.permute.xlu1 %987 }
 0x208   : > { %5228 = vrot.lane.b32.xlu1 %v5227_v51, %s7774_s12  ;;  %v6542_v12 = vmul.f32 %v972_v37, %v6525_v9  ;;  %v5372_v29 = vpack.i.bf16 %v6538_v25, %v6531_v3  ;;  %v5272_v30 = vpack.i.bf16 %v6522_v7, %v6525_v9  ;;  %v6563_v17 = vmul.f32 %v6402_v34, %v6487_v43  ;;  %v1430_v3 = vld [vmem:[%s7730_s5 + $0x8] sm:$0xff]  ;;  %v1431_v25 = vld [vmem:[%s7730_s5 + $0x10] sm:$0xff] }
 0x209   : > { %v5252_v6 = vpack.i.bf16 %v940_v1, %v945_v24  ;;  %v963_v35 = vmul.f32 %v955_v47, %v6487_v43  ;;  %v941_v36 = vmul.f32 %v936_v49, %v6469_v32  ;;  %v964_v28 = vmul.f32 %v6484_v19, %v6512_v58 }
 0x20a   : > { %v5377_v33 = vpack.i.bf16 %v6546_v26, %v6542_v12  ;;  %v1314_v37 = vpack.c.bf16 %v6563_v17, %v6559_v4  ;;  %v965_v21 = vmul.f32 %v6479_v39, %v6509_v8  ;;  %v962_v44 = vmul.f32 %v6479_v39, %v6481_v40  ;;  %v1432_v12 = vld [vmem:[%s7730_s5 + $0x18] sm:$0xff]  ;;  %v1462_v26 = vld [vmem:[%s7731_s6 + $0x8] sm:$0xff] }
 0x20b   : > { %1073 = vrot.lane.b32.xlu0 %v943_v57, %s7777_s25  ;;  %v5287_v41 = vpack.i.bf16 %v941_v36, %v946_v27  ;;  %v5262_v42 = vpack.i.bf16 %v964_v28, %v963_v35  ;;  %v966_v18 = vmul.f32 %v955_v47, %v6525_v9  ;;  %v967_v45 = vmul.f32 %v6484_v19, %v6522_v7 }
 0x20c   : > { %5233 = vrot.lane.b32.xlu1 %v5232_v59, %s7776_s22  ;;  %v5277_v20 = vpack.i.bf16 %v965_v21, %v962_v44  ;;  %v947_v16 = vmul.f32 %v936_v49, %v6525_v9  ;;  %v5282_v52 = vpack.i.bf16 %v6509_v8, %v6481_v40  ;;  %v948_v39 = vmul.f32 %v935_v60, %v6522_v7  ;;  %v986_v49 = vpop.permute.xlu0 %985  ;;  %v1463_v44 = vld [vmem:[%s7731_s6 + $0x10] sm:$0xff] }
 0x20d   : > { %v5297_v46 = vpack.i.bf16 %v967_v45, %v966_v18  ;;  %v1006_v47 = vsel %vm523_vm0, %v1003_v50, %v1005_v23  ;;  %v1018_v48 = vmul.f32 %v1005_v23, %v6522_v7  ;;  %v5307_v53 = vpack.i.bf16 %v6476_v38, %v6469_v32 }
 0x20e   : > { %v5302_v51 = vpack.i.bf16 %v948_v39, %v947_v16  ;;  %v1011_v19 = vmul.f32 %v1006_v47, %v6469_v32  ;;  %v1014_v54 = vmul.f32 %v1006_v47, %v6487_v43  ;;  %v1015_v56 = vmul.f32 %v1005_v23, %v6512_v58 }
 0x20f   : > { %5258 = vrot.lane.b32.xlu0 %v5257_v0, %s7775_s14  ;;  %v1012_v57 = vmul.f32 %v1005_v23, %v6476_v38  ;;  %v1010_v59 = vmul.f32 %v1003_v50, %v6465_v22  ;;  %v1013_v63 = vmul.f32 %v1003_v50, %v6481_v40  ;;  %v1017_v0 = vmul.f32 %v1006_v47, %v6525_v9 }
 0x210   : > { %5238 = vrot.lane.b32.xlu1 %v5237_v5, %s7775_s14  ;;  %v5312_v55 = vpack.i.bf16 %v1011_v19, %v1018_v48  ;;  %v1016_v5 = vmul.f32 %v1003_v50, %v6509_v8  ;;  %v989_v11 = vsel %vm508_vm1, %v986_v49, %v988_v62  ;;  %v999_v24 = vmul.f32 %v986_v49, %v6509_v8 }
 0x211   : > { %v5317_v60 = vpack.i.bf16 %v1014_v54, %v1012_v57  ;;  %v5322_v61 = vpack.i.bf16 %v1010_v59, %v1015_v56  ;;  %v994_v1 = vmul.f32 %v989_v11, %v6469_v32  ;;  %v997_v27 = vmul.f32 %v989_v11, %v6487_v43 }
 0x212   : > { %v993_v35 = vmul.f32 %v986_v49, %v6465_v22  ;;  %v1000_v28 = vmul.f32 %v989_v11, %v6525_v9  ;;  %vm1932_vm0 = vcmask 523264  }
 0x213   : > { %5268 = vrot.lane.b32.xlu0 %v5267_v13, %s7777_s25  ;;  %v5347_v13 = vpack.i.bf16 %v1017_v0, %v1016_v5 }
 0x214   : > { %5248 = vrot.lane.b32.xlu1 %v5247_v15, %s7778_s13 }
 0x217   : > { %5273 = vrot.lane.b32.xlu0 %v5272_v30, %s7775_s14  ;;  %s6043_s14 = sshll.u32 %s6119_s1, 4  ;;  %s6044_s14 = int_to_ptr.vmem [resolvable:$false] %s6043_s14 }
 0x218   : > { %5253 = vrot.lane.b32.xlu1 %v5252_v6, %s7777_s25  ;;  %v995_v6 = vmul.f32 %v988_v62, %v6476_v38  ;;  %v979_v38 = vmul.f32 %v6461_v14, %v6481_v40 }
 0x21a   : > { %v5357_v36 = vpack.i.bf16 %v997_v27, %v995_v6 }
 0x21b   : > { %5288 = vrot.lane.b32.xlu0 %v5287_v41, %s7777_s25  ;;  %v1001_v41 = vmul.f32 %v988_v62, %v6522_v7  ;;  %v6031_v7 = vld [vmem:[%s7729_s4 + $0x4] ss:$8 sps:$4 sm:$0xff]  }
 0x21c   : > { %5263 = vrot.lane.b32.xlu1 %v5262_v42, %s7776_s22  ;;  %v996_v42 = vmul.f32 %v986_v49, %v6481_v40  ;;  %5064 = vmatprep.mubr.msk.bf16.mxu0 %vm1363_vm15, %v6031_v7 }
 0x21d   : > { %v5367_v43 = vpack.i.bf16 %v1001_v41, %v1000_v28 }
 0x21f   : > { %5293 = vrot.lane.b32.xlu0 %v5272_v30, %s7778_s13 }
 0x220   : > { %5278 = vrot.lane.b32.xlu1 %v5277_v20, %s7776_s22 }
 0x223   : > { %5298 = vrot.lane.b32.xlu0 %v5297_v46, %s7776_s22  ;;  %s377_s22 = sand.u32 1, %s6091_s18  }
 0x224   : > { %5283 = vrot.lane.b32.xlu1 %v5282_v52, %s7778_s13 }
 0x227   : > { %5303 = vrot.lane.b32.xlu0 %v5302_v51, %s7777_s25  ;;  %s5050_s25 = sshll.u32 %s377_s22, 8 }
 0x228   : > { %1028 = vrot.lane.b32.xlu1 %v6465_v22, %s7778_s13 }
 0x22b   : > { %5308 = vrot.lane.b32.xlu0 %v5307_v53, %s7778_s13  ;;  %s6117_s13 = smov 64  }
 0x22c   : > { %5313 = vrot.lane.b32.xlu1 %v5312_v55, %s7779_s24 }
 0x22f   : > { %5318 = vrot.lane.b32.xlu0 %v5317_v60, %s7779_s24 }
 0x230   : > { %5323 = vrot.lane.b32.xlu1 %v5322_v61, %s7779_s24 }
 0x233   : > { %1289 = vrot.lane.b32.xlu0 %v1013_v63, %s7779_s24 }
 0x234   : > { %5328 = vrot.lane.b32.xlu1 %v5247_v15, %s7780_s29  ;;  %v5352_v15 = vpack.i.bf16 %v994_v1, %v999_v24 }
 0x237   : > { %5333 = vrot.lane.b32.xlu0 %v5272_v30, %s7780_s29  ;;  %v998_v30 = vmul.f32 %v988_v62, %v6512_v58  ;;  %v982_v58 = vmul.f32 %v6461_v14, %v6509_v8  ;;  %v1429_v14 = vld [vmem:[%s7730_s5] sm:$0xff] }
 0x238   : > { %5338 = vrot.lane.b32.xlu1 %v5282_v52, %s7780_s29 }
 0x239   : > { %v5362_v32 = vpack.i.bf16 %v993_v35, %v998_v30  ;;  %v5382_v21 = vpack.i.bf16 %v982_v58, %v979_v38 }
 0x23b   : > { %5348 = vrot.lane.b32.xlu0 %v5347_v13, %s7779_s24  ;;  %s5103_s24 = sshll.u32 %s6202_s21, 12  ;;  %s7684_s21 = scalar_lea.sflag [#allocation3], %s377_s22 }
 0x23c   : > { %5343 = vrot.lane.b32.xlu1 %v5307_v53, %s7780_s29 }
 0x23f   : > { %5353 = vrot.lane.b32.xlu0 %v5352_v15, %s7781_s30 }
 0x240   : > { %1244 = vrot.lane.b32.xlu1 %v6465_v22, %s7780_s29 }
 0x243   : > { %5358 = vrot.lane.b32.xlu0 %v5357_v36, %s7781_s30 }
 0x244   : > { %5363 = vrot.lane.b32.xlu1 %v5362_v32, %s7781_s30 }
 0x247   : > { %5368 = vrot.lane.b32.xlu0 %v5367_v43, %s7781_s30 }
 0x248   : > { %5373 = vrot.lane.b32.xlu1 %v5372_v29, %s7774_s12  ;;  %v1461_v29 = vld [vmem:[%s7731_s6] sm:$0xff] }
 0x24b   : > { %1220 = vrot.lane.b32.xlu0 %v996_v42, %s7781_s30 }
 0x24c   : > { %5383 = vrot.lane.b32.xlu1 %v5382_v21, %s7774_s12 }
 0x24f   : > { %5378 = vrot.lane.b32.xlu0 %v5377_v33, %s7774_s12  ;;  %v1464_v33 = vld [vmem:[%s7731_s6 + $0x18] sm:$0xff]  ;;  %s7639_s12 = scalar_lea.vmem [#allocation2], %s5050_s25  ;;  %s6045_s25 = scalar_lea.vmem %s6044_s14, 8192 }
 0x250   : > { %1440 = vperm.xlu1 %5225, %v1430_v3   ;;  %s4984_s29 = sshll.u32 %s7639_s12, 4  ;;  %s7678_s29 = int_to_ptr.vmem [resolvable:$true] %s4984_s29 }
 0x251   : > { %p6046_p0 = scmp.lt.s32.totalorder %s7678_s29, %s6044_s14 }
 0x253   : > { %1435 = vperm.xlu0 %5226, %v1429_v14  }
 0x254   : > { %1445 = vperm.xlu1 %5225, %v1431_v25  }
 0x257   : > { %1467 = vperm.xlu0 %5226, %v1461_v29  }
 0x258   : > { %1450 = vperm.xlu1 %5225, %v1432_v12  }
 0x25b   : > { %1472 = vperm.xlu0 %5226, %v1462_v26  }
 0x25c   : > { %1482 = vperm.xlu1 %5225, %v1464_v33  }
 0x25f   : > { %1477 = vperm.xlu0 %5226, %v1463_v44  }
 0x272   : > { %v1176_v18 = vpop.permute.xlu1 %1175 }
 0x275   : > { %v1143_v20 = vpop.permute.xlu0 %1142 }
 0x276   : > { %v6673_v45 = vpop.permute.xlu1 %1106 }
 0x279   : > { %v5244_v46 = vpop.permute.xlu0 %5243 }
 0x27a   : > { %v5229_v16 = vpop.permute.xlu1 %5228  ;;  %v5246_v54 = vunpack.i.h.bf16 %v5244_v46  ;;  %v5245_v63 = vunpack.i.l.bf16 %v5244_v46 }
 0x27b   : > { %v5230_v19 = vunpack.i.l.bf16 %v5229_v16  ;;  %v5231_v48 = vunpack.i.h.bf16 %v5229_v16 }
 0x27c   : > { %v1156_v36 = vsel %vm583_vm10, %v1143_v20, %v5246_v54 }
 0x27d   : > { %v6675_v23 = vpop.permute.xlu0 %1073  ;;  %v1193_v49 = vsel %vm598_vm11, %v1176_v18, %v5230_v19  ;;  %v1194_v11 = vsel %vm598_vm11, %v5230_v19, %v5231_v48 }
 0x27e   : > { %v6677_v50 = vpop.permute.xlu1 %5233 }
 0x27f   : > { %v5236_v25 = vunpack.i.h.bf16 %v6677_v50  ;;  %v5235_v29 = vunpack.i.l.bf16 %v6677_v50 }
 0x281   : > { %v5259_v52 = vpop.permute.xlu0 %5258 }
 0x282   : > { %v5239_v39 = vpop.permute.xlu1 %5238  ;;  %v5261_v56 = vunpack.i.h.bf16 %v5259_v52  ;;  %v5260_v57 = vunpack.i.l.bf16 %v5259_v52 }
 0x283   : > { %v5240_v53 = vunpack.i.l.bf16 %v5239_v39  ;;  %v5241_v0 = vunpack.i.h.bf16 %v5239_v39 }
 0x284   : > { %v1155_v30 = vsel %vm583_vm10, %v5261_v56, %v5245_v63 }
 0x285   : > { %v6679_v47 = vpop.permute.xlu0 %5268  ;;  %v1157_v13 = vsel %vm583_vm10, %v5246_v54, %v5240_v53  ;;  %v1154_v6 = vsel %vm583_vm10, %v5241_v0, %v5261_v56  ;;  %v1124_v54 = vsel %vm571_vm14, %v6673_v45, %v5235_v29  ;;  %v1125_v56 = vsel %vm571_vm14, %v5235_v29, %v5236_v25 }
 0x286   : > { %v6681_v51 = vpop.permute.xlu1 %5248  ;;  %v1326_v35 = vpack.c.bf16 %v1157_v13, %v1155_v30  ;;  %v1325_v41 = vpack.c.bf16 %v1156_v36, %v1154_v6  ;;  %v5270_v20 = vunpack.i.l.bf16 %v6679_v47  ;;  %v910_v29 = vmul.f32 %v6394_v31, %v6509_v8 }
 0x289   : > { %v5274_v55 = vpop.permute.xlu0 %5273 }
 0x28a   : > { %v5276_v59 = vunpack.i.h.bf16 %v5274_v55  ;;  %v5275_v60 = vunpack.i.l.bf16 %v5274_v55  ;;  %v6683_v61 = vpop.permute.xlu1 %5253  ;;  %v5271_v55 = vunpack.i.h.bf16 %v6679_v47  ;;  %v5251_v47 = vunpack.i.h.bf16 %v6681_v51 }
 0x28b   : > { %v5255_v39 = vunpack.i.l.bf16 %v6683_v61  ;;  %v5256_v0 = vunpack.i.h.bf16 %v6683_v61 }
 0x28c   : > { %v1158_v62 = vsel %vm583_vm10, %v5260_v57, %v5275_v60  ;;  %v1159_v5 = vsel %vm583_vm10, %v5275_v60, %v5276_v59  ;;  %v1087_v36 = vsel %vm556_vm13, %v6675_v23, %v5271_v55 }
 0x28d   : > { %v5289_v24 = vpop.permute.xlu0 %5288  ;;  %v1328_v1 = vpack.c.bf16 %v1194_v11, %v1159_v5  ;;  %v1327_v15 = vpack.c.bf16 %v1193_v49, %v1158_v62  ;;  %v5250_v11 = vunpack.i.l.bf16 %v6681_v51 }
 0x28e   : > { %v5264_v27 = vpop.permute.xlu1 %5263  ;;  %v5291_v12 = vunpack.i.h.bf16 %v5289_v24  ;;  %v5290_v19 = vunpack.i.l.bf16 %v5289_v24  ;;  %v1088_v24 = vsel %vm556_vm13, %v5271_v55, %v5255_v39 }
 0x28f   : > { %1376 = vmatprep.subr.bf16.mxu0 %v1328_v1  ;;  %v5266_v43 = vunpack.i.h.bf16 %v5264_v27  ;;  %v5265_v58 = vunpack.i.l.bf16 %v5264_v27 }
 0x290   : > { %1377 = vmatpush1.bf16.msra.mxu0 %v1327_v15  ;;  %v1086_v57 = vsel %vm556_vm13, %v5291_v12, %v5270_v20  ;;  %v1085_v1 = vsel %vm556_vm13, %v5256_v0, %v5291_v12 }
 0x291   : > { %v6693_v28 = vpop.permute.xlu0 %5293  ;;  %1378 = vmatprep.subr.bf16.mxu0 %v1326_v35  ;;  %v1127_v44 = vsel %vm571_vm14, %v5265_v58, %v5266_v43  ;;  %v1320_v30 = vpack.c.bf16 %v1088_v24, %v1086_v57 }
 0x292   : > { %v5279_v32 = vpop.permute.xlu1 %5278  ;;  %v5296_v59 = vunpack.i.h.bf16 %v6693_v28  ;;  %v5295_v60 = vunpack.i.l.bf16 %v6693_v28 }
 0x293   : > { %v5280_v38 = vunpack.i.l.bf16 %v5279_v32  ;;  %v5281_v42 = vunpack.i.h.bf16 %v5279_v32  ;;  %v1319_v32 = vpack.c.bf16 %v1087_v36, %v1085_v1 }
 0x294   : > { %1379 = vmatpush1.bf16.msra.mxu0 %v1325_v41  ;;  %v1051_v61 = vsel %vm541_vm12, %v5295_v60, %v5296_v59  ;;  %v1049_v41 = vsel %vm541_vm12, %v5250_v11, %v5251_v47 }
 0x295   : > { %v5299_v7 = vpop.permute.xlu0 %5298  ;;  %v1126_v26 = vsel %vm571_vm14, %v5280_v38, %v5265_v58  ;;  %v1318_v38 = vpack.c.bf16 %v1051_v61, %v1049_v41 }
 0x296   : > { %v5301_v21 = vunpack.i.h.bf16 %v5299_v7  ;;  %v5300_v3 = vunpack.i.l.bf16 %v5299_v7  ;;  %v5284_v14 = vpop.permute.xlu1 %5283 }
 0x297   : > { %v5286_v15 = vunpack.i.h.bf16 %v5284_v14  ;;  %v5285_v27 = vunpack.i.l.bf16 %v5284_v14 }
 0x298   : > { %v1128_v33 = vsel %vm571_vm14, %v5281_v42, %v5300_v3  ;;  %v1129_v18 = vsel %vm571_vm14, %v5300_v3, %v5301_v21  ;;  %v911_v21 = vmul.f32 %v6402_v34, %v6525_v9  ;;  %v906_v34 = vmul.f32 %v6394_v31, %v6465_v22 }
 0x299   : > { %v1323_v46 = vpack.c.bf16 %v1128_v33, %v1126_v26  ;;  %v5304_v16 = vpop.permute.xlu0 %5303  ;;  %v1324_v52 = vpack.c.bf16 %v1129_v18, %v1127_v44  ;;  %v1048_v43 = vsel %vm541_vm12, %v5285_v27, %v5250_v11  ;;  %v1050_v58 = vsel %vm541_vm12, %v5286_v15, %v5295_v60 }
 0x29a   : > { %v5306_v48 = vunpack.i.h.bf16 %v5304_v16  ;;  %v5305_v53 = vunpack.i.l.bf16 %v5304_v16  ;;  %v1029_v50 = vpop.permute.xlu1 %1028  ;;  %v1317_v3 = vpack.c.bf16 %v1050_v58, %v1048_v43  ;;  %v908_v44 = vmul.f32 %v6394_v31, %v6481_v40 }
 0x29b   : > { %1380 = vmatprep.subr.bf16.mxu0 %v1324_v52 }
 0x29c   : > { %v1089_v63 = vsel %vm556_vm13, %v5290_v19, %v5305_v53  ;;  %1381 = vmatpush1.bf16.msra.mxu0 %v1323_v46  ;;  %v1090_v49 = vsel %vm556_vm13, %v5305_v53, %v5306_v48  ;;  %v1313_v19 = vpack.c.bf16 %v908_v44, %v906_v34 }
 0x29d   : > { %v1321_v62 = vpack.c.bf16 %v1124_v54, %v1089_v63  ;;  %v5309_v45 = vpop.permute.xlu0 %5308  ;;  %v1322_v5 = vpack.c.bf16 %v1125_v56, %v1090_v49 }
 0x29e   : > { %v6715_v13 = vpop.permute.xlu1 %5313  ;;  %v5311_v6 = vunpack.i.h.bf16 %v5309_v45  ;;  %v5310_v35 = vunpack.i.l.bf16 %v5309_v45 }
 0x29f   : > { %1382 = vmatprep.subr.bf16.mxu0 %v1322_v5  ;;  %v5315_v8 = vunpack.i.l.bf16 %v6715_v13  ;;  %v5316_v40 = vunpack.i.h.bf16 %v6715_v13 }
 0x2a0   : > { %1383 = vmatpush1.bf16.msra.mxu0 %v1321_v62  ;;  %v1047_v7 = vsel %vm541_vm12, %v5310_v35, %v5311_v6  ;;  %v1046_v14 = vsel %vm541_vm12, %v1029_v50, %v5310_v35 }
 0x2a1   : > { %v5319_v28 = vpop.permute.xlu0 %5318  ;;  %1384 = vmatprep.subr.bf16.mxu0 %v1320_v30  ;;  %v1316_v25 = vpack.c.bf16 %v1047_v7, %v911_v21  ;;  %v1315_v26 = vpack.c.bf16 %v1046_v14, %v910_v29 }
 0x2a2   : > { %v5324_v51 = vpop.permute.xlu1 %5323  ;;  %v5321_v9 = vunpack.i.h.bf16 %v5319_v28  ;;  %v5320_v20 = vunpack.i.l.bf16 %v5319_v28 }
 0x2a3   : > { %v5325_v18 = vunpack.i.l.bf16 %v5324_v51  ;;  %v5326_v48 = vunpack.i.h.bf16 %v5324_v51 }
 0x2a4   : > { %1385 = vmatpush1.bf16.msra.mxu0 %v1319_v32  ;;  %v1302_v55 = vsel %vm640_vm7, %v5316_v40, %v5320_v20 }
 0x2a5   : > { %v1290_v42 = vpop.permute.xlu0 %1289  ;;  %1386 = vmatprep.subr.bf16.mxu0 %v1318_v38  ;;  %v1304_v53 = vsel %vm640_vm7, %v5321_v9, %v5325_v18  ;;  %v1301_v49 = vsel %vm640_vm7, %v5326_v48, %v5316_v40 }
 0x2a6   : > { %v5329_v23 = vpop.permute.xlu1 %5328  ;;  %v1303_v0 = vsel %vm640_vm7, %v1290_v42, %v5321_v9  ;;  %v1338_v45 = vpack.c.bf16 %v1304_v53, %v1302_v55 }
 0x2a7   : > { %v5331_v56 = vunpack.i.h.bf16 %v5329_v23  ;;  %v5330_v57 = vunpack.i.l.bf16 %v5329_v23  ;;  %v1337_v11 = vpack.c.bf16 %v1303_v0, %v1301_v49 }
 0x2a8   : > { %1387 = vmatpush1.bf16.msra.mxu0 %v1317_v3 }
 0x2a9   : > { %v5334_v12 = vpop.permute.xlu0 %5333  ;;  %1388 = vmatprep.subr.bf16.mxu0 %v1316_v25  ;;  %v1265_v15 = vsel %vm625_vm8, %v5330_v57, %v5331_v56 }
 0x2aa   : > { %v5339_v33 = vpop.permute.xlu1 %5338  ;;  %v5336_v50 = vunpack.i.h.bf16 %v5334_v12  ;;  %v5335_v31 = vunpack.i.l.bf16 %v5334_v12 }
 0x2ab   : > { %v5341_v59 = vunpack.i.h.bf16 %v5339_v33  ;;  %v5340_v60 = vunpack.i.l.bf16 %v5339_v33 }
 0x2ac   : > { %1389 = vmatpush1.bf16.msra.mxu0 %v1315_v26  ;;  %v1267_v5 = vsel %vm625_vm8, %v5335_v31, %v5336_v50 }
 0x2ad   : > { %v5349_v46 = vpop.permute.xlu0 %5348  ;;  %1390 = vmatprep.subr.bf16.mxu0 %v1314_v37  ;;  %v1264_v13 = vsel %vm625_vm8, %v5340_v60, %v5330_v57  ;;  %v1266_v24 = vsel %vm625_vm8, %v5341_v59, %v5335_v31  ;;  %v1336_v6 = vpack.c.bf16 %v1267_v5, %v1265_v15 }
 0x2ae   : > { %v5351_v16 = vunpack.i.h.bf16 %v5349_v46  ;;  %v5350_v52 = vunpack.i.l.bf16 %v5349_v46  ;;  %v5344_v39 = vpop.permute.xlu1 %5343  ;;  %v1335_v28 = vpack.c.bf16 %v1266_v24, %v1264_v13 }
 0x2af   : > { %v5346_v27 = vunpack.i.h.bf16 %v5344_v39  ;;  %v5345_v30 = vunpack.i.l.bf16 %v5344_v39 }
 0x2b0   : > { %v1306_v22 = vsel %vm640_vm7, %v5351_v16, %v5315_v8  ;;  %1391 = vmatpush1.bf16.msra.mxu0 %v1313_v19  ;;  %v1305_v54 = vsel %vm640_vm7, %v5350_v52, %v5351_v16 }
 0x2b1   : > { %v1340_v4 = vpack.c.bf16 %v1306_v22, %v1306_v22  ;;  %v5354_v17 = vpop.permute.xlu0 %5353  ;;  %v1339_v37 = vpack.c.bf16 %v1305_v54, %v1305_v54  ;;  %v1263_v7 = vsel %vm625_vm8, %v5345_v30, %v5346_v27  ;;  %v6029_v54 = vld [vmem:[%s7729_s4] ss:$8 sps:$4 sm:$0xff]  }
 0x2b2   : > { %v1245_v63 = vpop.permute.xlu1 %1244  ;;  %v5355_v61 = vunpack.i.l.bf16 %v5354_v17  ;;  %v5356_v38 = vunpack.i.h.bf16 %v5354_v17  ;;  %v6034_v17 = vld [vmem:[%s7729_s4 + $0x10] ss:$8 sps:$4 sm:$0xff]  }
 0x2b3   : > { %5063 = vmatprep.subr.msk.bf16.mxu0 %vm679_vm6, %v1340_v4  ;;  %v1371_v62 = vsel %vm679_vm6, %v1339_v37, 0  ;;  %v1262_v42 = vsel %vm625_vm8, %v1245_v63, %v5345_v30  ;;  %v6032_v4 = vld [vmem:[%s7729_s4 + $0x14] ss:$8 sps:$4 sm:$0xff]  }
 0x2b4   : > { %1397 = vmatpush2.bf16.msra.mxu0 %v1371_v62 }
 0x2b5   : > { %v5359_v47 = vpop.permute.xlu0 %5358  ;;  %1398 = vmatprep.subr.bf16.mxu0 %v1338_v45 }
 0x2b6   : > { %v5364_v1 = vpop.permute.xlu1 %5363  ;;  %v5361_v51 = vunpack.i.h.bf16 %v5359_v47  ;;  %v5360_v32 = vunpack.i.l.bf16 %v5359_v47 }
 0x2b7   : > { %v5365_v35 = vunpack.i.l.bf16 %v5364_v1  ;;  %v5366_v14 = vunpack.i.h.bf16 %v5364_v1 }
 0x2b8   : > { %1399 = vmatpush2.bf16.msra.mxu0 %v1337_v11  ;;  %v1233_v33 = vsel %vm613_vm9, %v5356_v38, %v5360_v32 }
 0x2b9   : > { %v5369_v36 = vpop.permute.xlu0 %5368  ;;  %1400 = vmatprep.subr.bf16.mxu0 %v1336_v6  ;;  %v1235_v3 = vsel %vm613_vm9, %v5361_v51, %v5365_v35  ;;  %v1232_v46 = vsel %vm613_vm9, %v5366_v14, %v5356_v38 }
 0x2ba   : > { %v5371_v41 = vunpack.i.h.bf16 %v5369_v36  ;;  %v5370_v43 = vunpack.i.l.bf16 %v5369_v36  ;;  %v5374_v58 = vpop.permute.xlu1 %5373  ;;  %v1332_v18 = vpack.c.bf16 %v1235_v3, %v1233_v33 }
 0x2bb   : > { %v5376_v34 = vunpack.i.h.bf16 %v5374_v58  ;;  %v5375_v9 = vunpack.i.l.bf16 %v5374_v58 }
 0x2bc   : > { %v1236_v21 = vsel %vm613_vm9, %v5355_v61, %v5370_v43  ;;  %1401 = vmatpush2.bf16.msra.mxu0 %v1335_v28  ;;  %v1237_v23 = vsel %vm613_vm9, %v5370_v43, %v5371_v41 }
 0x2bd   : > { %v1333_v25 = vpack.c.bf16 %v1262_v42, %v1236_v21  ;;  %v1221_v29 = vpop.permute.xlu0 %1220  ;;  %v1334_v12 = vpack.c.bf16 %v1263_v7, %v1237_v23  ;;  %v1196_v53 = vsel %vm598_vm11, %v5375_v9, %v5376_v34 }
 0x2be   : > { %v5384_v26 = vpop.permute.xlu1 %5383  ;;  %v1234_v44 = vsel %vm613_vm9, %v1221_v29, %v5361_v51 }
 0x2bf   : > { %1402 = vmatprep.subr.bf16.mxu0 %v1334_v12  ;;  %v5385_v20 = vunpack.i.l.bf16 %v5384_v26  ;;  %v1331_v16 = vpack.c.bf16 %v1234_v44, %v1232_v46  ;;  %v5386_v52 = vunpack.i.h.bf16 %v5384_v26 }
 0x2c0   : > { %1403 = vmatpush2.bf16.msra.mxu0 %v1333_v25 }
 0x2c1   : > { %v5379_v8 = vpop.permute.xlu0 %5378  ;;  %1404 = vmatprep.subr.bf16.mxu0 %v1332_v18  ;;  %v1195_v40 = vsel %vm598_vm11, %v5385_v20, %v5375_v9 }
 0x2c2   : > { %v5381_v39 = vunpack.i.h.bf16 %v5379_v8  ;;  %v5380_v19 = vunpack.i.l.bf16 %v5379_v8 }
 0x2c4   : > { %v1197_v48 = vsel %vm598_vm11, %v5386_v52, %v5380_v19  ;;  %1405 = vmatpush2.bf16.msra.mxu0 %v1331_v16  ;;  %v1198_v50 = vsel %vm598_vm11, %v5380_v19, %v5381_v39 }
 0x2c5   : > { %v1330_v31 = vpack.c.bf16 %v1198_v50, %v1196_v53  ;;  %v1329_v22 = vpack.c.bf16 %v1197_v48, %v1195_v40  ;;  %v6115_v40 = vmov 1983009808   ;;  %v6116_v53 = vmov 1934713408  }
 0x2c6   : > { %v1588_v48 = vunpack.c.l.s4 %v6115_v40  ;;  %v1652_v50 = vunpack.c.l.s4 %v6116_v53 }
 0x2c7   : > { %1406 = vmatprep.subr.bf16.mxu0 %v1330_v31 }
 0x2c8   : > { %1407 = vmatpush2.bf16.msra.mxu0 %v1329_v22  ;;  %v1589_v22 = vunpack.c.0.s8 %v1588_v48 }
 0x2cb   : > { %1409 = vmatmul.mubr.bf16.vlgmr.msra.gmra.mxu0 %v6029_v54  ;;  %v1441_v55 = vpop.permute.xlu1 %1440  ;;  %v1653_v54 = vunpack.c.0.s8 %v1652_v50 }
 0x2cc   : > { %5065 = vmatprep.mubr.msk.bf16.mxu0 %vm1363_vm15, %v6032_v4 }
 0x2ce   : > { %v1436_v37 = vpop.permute.xlu0 %1435 }
 0x2cf   : > { %v1446_v60 = vpop.permute.xlu1 %1445 }
 0x2d2   : > { %v1468_v56 = vpop.permute.xlu0 %1467 }
 0x2d3   : > { %1419 = vmatmul.mubr.bf16.gmra.mxu0 %v6034_v17  ;;  %v1451_v27 = vpop.permute.xlu1 %1450  ;;  %v6782_v17 = vsub.s32 %v1589_v22, %v6234_v2 }
 0x2d4   : > { %4864 = vmatprep.mubr.bf16.mxu0 %v6114_v10 }
 0x2d6   : > { %v1473_v62 = vpop.permute.xlu0 %1472 }
 0x2d7   : > { %v1483_v21 = vpop.permute.xlu1 %1482 }
 0x2da   : > { %v1478_v36 = vpop.permute.xlu0 %1477 }
 0x38b   : > { %v1410_v57 = vpop.f32.mrf.mxu0 }
 0x38c   : > { %v1453_v59 = vmul.f32 %v1436_v37, %v1410_v57 }
 0x38d   : > { %v1412_v63 = vpop.f32.mrf.mxu0 }
 0x38e   : > { %v1485_v49 = vadd.f32 %v1468_v56, %v1453_v59  ;;  %v1454_v0 = vmul.f32 %v1436_v37, %v1412_v63  ;;  %v6785_v37 = vsub.s32 %v1653_v54, %v6234_v2 }
 0x38f   : > { %v1414_v45 = vpop.f32.mrf.mxu0 }
 0x390   : > { %v1486_v5 = vadd.f32 %v1468_v56, %v1454_v0  ;;  %v1455_v47 = vmul.f32 %v1441_v55, %v1414_v45  ;;  %v1493_v13 = vmax.f32 %v1485_v49, 0.0 }
 0x391   : > { %v1416_v11 = vpop.f32.mrf.mxu0 }
 0x392   : > { %v1494_v24 = vmax.f32 %v1486_v5, 0.0  ;;  %v1487_v1 = vadd.f32 %v1473_v62, %v1455_v47  ;;  %v1456_v15 = vmul.f32 %v1441_v55, %v1416_v11 }
 0x393   : > { %v1420_v30 = vpop.f32.mrf.mxu0 }
 0x394   : > { %v5387_v6 = vpack.i.bf16 %v1494_v24, %v1493_v13  ;;  %v1488_v35 = vadd.f32 %v1473_v62, %v1456_v15  ;;  %v1457_v61 = vmul.f32 %v1446_v60, %v1420_v30  ;;  %v1495_v51 = vmax.f32 %v1487_v1, 0.0 }
 0x395   : > { %v1422_v28 = vpop.f32.mrf.mxu0 }
 0x396   : > { %v1496_v32 = vmax.f32 %v1488_v35, 0.0  ;;  %v1489_v41 = vadd.f32 %v1478_v36, %v1457_v61  ;;  %v1458_v43 = vmul.f32 %v1446_v60, %v1422_v28  ;;  %5388 = vxpose.xlu0.b32.start [1/4] (short) %v5387_v6, 128 }
 0x397   : > { %v1424_v58 = vpop.f32.mrf.mxu0 }
 0x398   : > { %v5389_v38 = vpack.i.bf16 %v1496_v32, %v1495_v51  ;;  %v1490_v7 = vadd.f32 %v1478_v36, %v1458_v43  ;;  %v1459_v42 = vmul.f32 %v1451_v27, %v1424_v58  ;;  %v1497_v3 = vmax.f32 %v1489_v41, 0.0 }
 0x399   : > { %v1426_v23 = vpop.f32.mrf.mxu0 }
 0x39a   : > { %v1498_v14 = vmax.f32 %v1490_v7, 0.0  ;;  %v1491_v25 = vadd.f32 %v1483_v21, %v1459_v42  ;;  %v1460_v29 = vmul.f32 %v1451_v27, %v1426_v23  ;;  %5390 = vxpose.xlu0.b32.cont [2/4] (short) %v5389_v38, 128 }
 0x39c   : > { %v5391_v12 = vpack.i.bf16 %v1498_v14, %v1497_v3  ;;  %v1492_v26 = vadd.f32 %v1483_v21, %v1460_v29  ;;  %v1499_v33 = vmax.f32 %v1491_v25, 0.0 }
 0x39e   : > { %v1500_v44 = vmax.f32 %v1492_v26, 0.0  ;;  %5392 = vxpose.xlu0.b32.cont [3/4] (short) %v5391_v12, 128 }
 0x3a0   : > { %v5393_v18 = vpack.i.bf16 %v1500_v44, %v1499_v33 }
 0x3a2   : > { %5394 = vxpose.xlu0.b32.end [4/4] (short) %v5393_v18, 128 }
 0x412   : > { %v5395_v34 = vpop.trf.xlu0 }
 0x413   : > { %v5399_v55 = vunpack.i.h.bf16 %v5395_v34  ;;  %v5396_v56 = vunpack.i.l.bf16 %v5395_v34 }
 0x416   : > { %v5400_v9 = vpop.trf.xlu0 }
 0x417   : > { %v5404_v57 = vunpack.i.h.bf16 %v5400_v9  ;;  %v5401_v59 = vunpack.i.l.bf16 %v5400_v9 }
 0x41a   : > { %v5405_v20 = vpop.trf.xlu0 }
 0x41b   : > { %v5409_v63 = vunpack.i.h.bf16 %v5405_v20  ;;  %v5406_v49 = vunpack.i.l.bf16 %v5405_v20 }
 0x41e   : > { %v5410_v46 = vpop.trf.xlu0 }
 0x41f   : > { %v5414_v0 = vunpack.i.h.bf16 %v5410_v46  ;;  %v5411_v62 = vunpack.i.l.bf16 %v5410_v46 }
 0x422   : > { %v5415_v8 = vpop.trf.xlu0 }
 0x423   : > { %v5419_v47 = vunpack.i.h.bf16 %v5415_v8  ;;  %v5416_v11 = vunpack.i.l.bf16 %v5415_v8 }
 0x426   : > { %v6775_v16 = vpop.trf.xlu0 }
 0x427   : > { %v5424_v13 = vunpack.i.h.bf16 %v6775_v16  ;;  %v5421_v24 = vunpack.i.l.bf16 %v6775_v16 }
 0x42a   : > { %v6777_v52 = vpop.trf.xlu0 }
 0x42b   : > { %v5429_v2 = vunpack.i.h.bf16 %v6777_v52  ;;  %v5426_v1 = vunpack.i.l.bf16 %v6777_v52 }
 0x42e   : > { %v6779_v39 = vpop.trf.xlu0 }
 0x42f   : > { %v5434_v32 = vunpack.i.h.bf16 %v6779_v39  ;;  %v5431_v41 = vunpack.i.l.bf16 %v6779_v39 }
 0x432   : > { %v5435_v19 = vpop.trf.xlu0 }
 0x433   : > { %v5439_v45 = vunpack.i.h.bf16 %v5435_v19  ;;  %v5436_v5 = vunpack.i.l.bf16 %v5435_v19 }
 0x435   : > { %v5066_v61 = vpack.c.bf16 %v5436_v5, %v5396_v56  ;;  %v5070_v36 = vpack.c.bf16 %v5439_v45, %v5399_v55 }
 0x436   : > { %v5440_v31 = vpop.trf.xlu0 }
 0x437   : > { %v5444_v15 = vunpack.i.h.bf16 %v5440_v31  ;;  %v5441_v27 = vunpack.i.l.bf16 %v5440_v31  ;;  %v1593_v25 = vrot.slane %v5066_v61, %v6782_v17  ;;  %v1625_v29 = vrot.slane %v5070_v36, %v6782_v17 }
 0x439   : > { %v5067_v38 = vpack.c.bf16 %v5441_v27, %v5401_v59  ;;  %v5071_v7 = vpack.c.bf16 %v5444_v15, %v5404_v57 }
 0x43a   : > { %v5445_v4 = vpop.trf.xlu0 }
 0x43b   : > { %v5449_v6 = vunpack.i.h.bf16 %v5445_v4  ;;  %v5446_v28 = vunpack.i.l.bf16 %v5445_v4  ;;  %v6797_v9 = vrot.slane %v5067_v38, %v6782_v17  ;;  %v6800_v20 = vrot.slane %v5071_v7, %v6782_v17 }
 0x43d   : > { %v5078_v3 = vpack.c.bf16 %v5449_v6, %v5409_v63  ;;  %v5074_v12 = vpack.c.bf16 %v5446_v28, %v5406_v49 }
 0x43e   : > { %v5450_v60 = vpop.trf.xlu0 }
 0x43f   : > { %v5454_v43 = vunpack.i.h.bf16 %v5450_v60  ;;  %v5451_v58 = vunpack.i.l.bf16 %v5450_v60  ;;  %v1761_v52 = vrot.slane %v5078_v3, %v6782_v17  ;;  %v1729_v19 = vrot.slane %v5074_v12, %v6782_v17 }
 0x441   : > { %v5075_v33 = vpack.c.bf16 %v5451_v58, %v5411_v62  ;;  %v5079_v44 = vpack.c.bf16 %v5454_v43, %v5414_v0 }
 0x442   : > { %v5455_v30 = vpop.trf.xlu0 }
 0x443   : > { %v5459_v35 = vunpack.i.h.bf16 %v5455_v30  ;;  %v5456_v51 = vunpack.i.l.bf16 %v5455_v30  ;;  %v1736_v50 = vrot.slane %v5075_v33, %v6782_v17  ;;  %v6809_v31 = vrot.slane %v5079_v44, %v6782_v17 }
 0x445   : > { %v5068_v42 = vpack.c.bf16 %v5456_v51, %v5416_v11  ;;  %v5072_v21 = vpack.c.bf16 %v5459_v35, %v5419_v47 }
 0x446   : > { %v5460_v23 = vpop.trf.xlu0 }
 0x447   : > { %v5464_v14 = vunpack.i.h.bf16 %v5460_v23  ;;  %v5461_v26 = vunpack.i.l.bf16 %v5460_v23  ;;  %v1609_v18 = vrot.slane %v5068_v42, %v6782_v17  ;;  %v1641_v46 = vrot.slane %v5072_v21, %v6782_v17 }
 0x449   : > { %v5073_v34 = vpack.c.bf16 %v5464_v14, %v5424_v13  ;;  %v5069_v8 = vpack.c.bf16 %v5461_v26, %v5421_v24  ;;  %v1650_v54 = vcombine.high %v1593_v25, %v1609_v18  ;;  %v1681_v4 = vcombine.low %v1625_v29, %v1641_v46 }
 0x44a   : > { %v5465_v16 = vpop.trf.xlu0  ;;  %v1682_v59 = vcombine.high %v1625_v29, %v1641_v46  ;;  %v1649_v49 = vcombine.low %v1593_v25, %v1609_v18 }
 0x44b   : > { %v5469_v39 = vunpack.i.h.bf16 %v5465_v16  ;;  %v1616_v40 = vrot.slane %v5069_v8, %v6782_v17  ;;  %v1648_v48 = vrot.slane %v5073_v34, %v6782_v17  ;;  %v5466_v53 = vunpack.i.l.bf16 %v5465_v16 }
 0x44c   : > { %v1664_v11 = vrot.slane %v1650_v54, %v6785_v37  ;;  %v1689_v43 = vrot.slane %v1681_v4, %v6785_v37 }
 0x44d   : > { %v5080_v22 = vpack.c.bf16 %v5469_v39, %v5429_v2  ;;  %v1665_v55 = vcombine.low %v6797_v9, %v1616_v40  ;;  %v5076_v56 = vpack.c.bf16 %v5466_v53, %v5426_v1  ;;  %v1697_v0 = vcombine.low %v6800_v20, %v1648_v48 }
 0x44e   : > { %v5470_v57 = vpop.trf.xlu0  ;;  %v1696_v1 = vrot.slane %v1682_v59, %v6785_v37  ;;  %v1666_v14 = vcombine.high %v6797_v9, %v1616_v40  ;;  %v1698_v25 = vcombine.high %v6800_v20, %v1648_v48 }
 0x44f   : > { %v1777_v60 = vrot.slane %v5080_v22, %v6782_v17  ;;  %v5474_v63 = vunpack.i.h.bf16 %v5470_v57  ;;  %v1745_v62 = vrot.slane %v5076_v56, %v6782_v17  ;;  %v5471_v45 = vunpack.i.l.bf16 %v5470_v57 }
 0x450   : > { %v1673_v35 = vrot.slane %v1665_v55, %v6785_v37  ;;  %v1705_v51 = vrot.slane %v1697_v0, %v6785_v37  ;;  %v1716_v38 = vcombine.high %v1664_v11, %v1696_v1  ;;  %v6834_v26 = vcombine.low %v1664_v11, %v1696_v1 }
 0x451   : > { %v1817_v5 = vcombine.low %v1761_v52, %v1777_v60  ;;  %v5081_v47 = vpack.c.bf16 %v5474_v63, %v5434_v32  ;;  %v1818_v13 = vcombine.high %v1761_v52, %v1777_v60  ;;  %v1785_v24 = vcombine.low %v1729_v19, %v1745_v62 }
 0x452   : > { %v5077_v2 = vpack.c.bf16 %v5471_v45, %v5431_v41  ;;  %v1786_v15 = vcombine.high %v1729_v19, %v1745_v62  ;;  %v1657_v41 = vrot.slane %v1649_v49, %v6785_v37  ;;  %v1718_v23 = vcombine.high %v1673_v35, %v1705_v51 }
 0x453   : > { %v1784_v27 = vrot.slane %v5081_v47, %v6782_v17  ;;  %v1832_v30 = vrot.slane %v1818_v13, %v6785_v37  ;;  %v1825_v6 = vrot.slane %v1817_v5, %v6785_v37  ;;  %v1793_v28 = vrot.slane %v1785_v24, %v6785_v37 }
 0x454   : > { %v1752_v61 = vrot.slane %v5077_v2, %v6782_v17  ;;  %v1800_v36 = vrot.slane %v1786_v15, %v6785_v37  ;;  %v1714_v33 = vcombine.high %v1657_v41, %v1689_v43  ;;  %v1890_v46 = vshrl.u32 %v1718_v23, 16 }
 0x455   : > { %v1833_v32 = vcombine.low %v6809_v31, %v1784_v27  ;;  %v1850_v21 = vcombine.high %v1793_v28, %v1825_v6  ;;  %v6837_v18 = vcombine.low %v1793_v28, %v1825_v6  ;;  %v1680_v20 = vrot.slane %v1666_v14, %v6785_v37 }
 0x456   : > { %v1801_v58 = vcombine.low %v1736_v50, %v1752_v61  ;;  %v1852_v7 = vcombine.high %v1800_v36, %v1832_v30  ;;  %v6828_v42 = vcombine.low %v1800_v36, %v1832_v30  ;;  %v1802_v16 = vcombine.high %v1736_v50, %v1752_v61 }
 0x457   : > { %v1841_v3 = vrot.slane %v1833_v32, %v6785_v37  ;;  %v1865_v34 = vpack.i.b16 %v1850_v21, %v1714_v33  ;;  %v1712_v52 = vrot.slane %v1698_v25, %v6785_v37  ;;  %v1834_v39 = vcombine.high %v6809_v31, %v1784_v27 }
 0x458   : > { %v1877_v29 = vpack.i.b16 %v1852_v7, %v1716_v38  ;;  %v1809_v12 = vrot.slane %v1801_v58, %v6785_v37  ;;  %v1873_v8 = vshrl.u32 %v6828_v42, 16  ;;  %v1872_v19 = vshrl.u32 %v6834_v26, 16 }
 0x459   : > { %v6844_v40 = vcombine.low %v1657_v41, %v1689_v43  ;;  %v1816_v48 = vrot.slane %v1802_v16, %v6785_v37  ;;  %v1848_v50 = vrot.slane %v1834_v39, %v6785_v37  ;;  %v6851_v54 = vcombine.low %v1673_v35, %v1705_v51 }
 0x45a   : > { %1913 = vrot.lane.b32.xlu1 %v1877_v29, %s6117_s13  ;;  %v1854_v44 = vcombine.high %v1809_v12, %v1841_v3  ;;  %v6847_v53 = vcombine.low %v1809_v12, %v1841_v3  ;;  %v1871_v4 = vpack.i.b16 %v6828_v42, %v6834_v26  ;;  %v1861_v31 = vshrl.u32 %v6837_v18, 16  ;;  %v6035_v42 = vld [vmem:[%s7732_s7] sm:$0xff]  }
 0x45b   : > { %v1859_v55 = vpack.i.b16 %v6837_v18, %v6844_v40  ;;  %v1874_v56 = vpack.i.b16 %v1873_v8, %v1872_v19  ;;  %v6859_v57 = vcombine.low %v1680_v20, %v1712_v52  ;;  %v6861_v59 = vcombine.low %v1816_v48, %v1848_v50 }
 0x45c   : > { %v1891_v9 = vshrl.u32 %v1854_v44, 16  ;;  %v1883_v60 = vpack.i.b16 %v6847_v53, %v6851_v54  ;;  %v1860_v63 = vshrl.u32 %v6844_v40, 16  ;;  %v1879_v0 = vshrl.u32 %v1852_v7, 16  ;;  %v6036_v40 = vld [vmem:[%s7732_s7 + $0x8] sm:$0xff]  }
 0x45d   : > { %v1895_v49 = vpack.i.b16 %v6861_v59, %v6859_v57  ;;  %v1878_v45 = vshrl.u32 %v1716_v38, 16  ;;  %v1867_v47 = vshrl.u32 %v1850_v21, 16  ;;  %v1866_v11 = vshrl.u32 %v1714_v33, 16 }
 0x45e   : > { %1907 = vrot.lane.b32.xlu1 %v1865_v34, %s6117_s13  ;;  %v1892_v22 = vpack.i.b16 %v1891_v9, %v1890_v46  ;;  %v1862_v62 = vpack.i.b16 %v1861_v31, %v1860_v63  ;;  %v1856_v24 = vcombine.high %v1816_v48, %v1848_v50  ;;  %v1720_v2 = vcombine.high %v1680_v20, %v1712_v52 }
 0x45f   : > { %v1880_v5 = vpack.i.b16 %v1879_v0, %v1878_v45  ;;  %v1868_v13 = vpack.i.b16 %v1867_v47, %v1866_v11  ;;  %v1889_v15 = vpack.i.b16 %v1854_v44, %v1718_v23  ;;  %v1897_v27 = vshrl.u32 %v6861_v59, 16 }
 0x460   : > { %1921 = vrot.lane.b32.xlu0 %v1892_v22, %s7781_s30  ;;  %v1901_v1 = vpack.i.b16 %v1856_v24, %v1720_v2  ;;  %v1896_v30 = vshrl.u32 %v6859_v57, 16  ;;  %v1885_v35 = vshrl.u32 %v6847_v53, 16  ;;  %v1884_v61 = vshrl.u32 %v6851_v54, 16 }
 0x461   : > { %v1903_v28 = vshrl.u32 %v1856_v24, 16  ;;  %v1902_v51 = vshrl.u32 %v1720_v2, 16  ;;  %v6118_v41 = vmov 0.0  }
 0x462   : > { %1911 = vrot.lane.b32.xlu1 %v1874_v56, %s7773_s16  ;;  %v1898_v6 = vpack.i.b16 %v1897_v27, %v1896_v30  ;;  %v1886_v36 = vpack.i.b16 %v1885_v35, %v1884_v61  ;;  %v1962_v43 = vcombine.low %v6118_v41, %v6118_v41  ;;  %v1963_v38 = vcombine.high %v6118_v41, %v6118_v41 }
 0x463   : > { %v1904_v32 = vpack.i.b16 %v1903_v28, %v1902_v51 }
 0x464   : > { %v1970_v58 = vrot.slane %v1962_v43, %v6782_v17  ;;  %v1977_v14 = vrot.slane %v1963_v38, %v6782_v17 }
 0x466   : > { %1905 = vrot.lane.b32.xlu1 %v1862_v62, %s7773_s16  ;;  %v1978_v7 = vcombine.low %v1970_v58, %v1970_v58  ;;  %v1979_v21 = vcombine.high %v1970_v58, %v1970_v58  ;;  %v1994_v12 = vcombine.low %v1977_v14, %v1977_v14  ;;  %v1995_v34 = vcombine.high %v1977_v14, %v1977_v14 }
 0x468   : > { %v1986_v23 = vrot.slane %v1978_v7, %v6785_v37  ;;  %v1993_v3 = vrot.slane %v1979_v21, %v6785_v37  ;;  %v2002_v44 = vrot.slane %v1994_v12, %v6785_v37  ;;  %v2009_v8 = vrot.slane %v1995_v34, %v6785_v37 }
 0x46a   : > { %1915 = vrot.lane.b32.xlu1 %v1880_v5, %s7781_s30  ;;  %v2011_v25 = vcombine.high %v1986_v23, %v1986_v23  ;;  %v2012_v29 = vcombine.low %v1993_v3, %v1993_v3  ;;  %v2013_v33 = vcombine.high %v1993_v3, %v1993_v3  ;;  %v2015_v46 = vcombine.high %v2002_v44, %v2002_v44 }
 0x46b   : > { %v2016_v16 = vcombine.low %v2009_v8, %v2009_v8  ;;  %v2017_v9 = vcombine.high %v2009_v8, %v2009_v8  ;;  %v2010_v57 = vcombine.low %v1986_v23, %v1986_v23 }
 0x46e   : > { %1909 = vrot.lane.b32.xlu1 %v1868_v13, %s7781_s30 }
 0x472   : > { %1925 = vrot.lane.b32.xlu1 %v1901_v1, %s6117_s13 }
 0x476   : > { %1919 = vrot.lane.b32.xlu1 %v1889_v15, %s6117_s13  ;;  %v2014_v15 = vcombine.low %v2002_v44, %v2002_v44 }
 0x47a   : > { %1923 = vrot.lane.b32.xlu1 %v1898_v6, %s7773_s16 }
 0x47e   : > { %1917 = vrot.lane.b32.xlu1 %v1886_v36, %s7773_s16 }
 0x482   : > { %1927 = vrot.lane.b32.xlu1 %v1904_v32, %s7781_s30 }
 0x486   : > { %2019 = vrot.lane.b32.xlu1 %v2011_v25, %s7773_s16 }
 0x48a   : > { %2023 = vrot.lane.b32.xlu1 %v2012_v29, %s6117_s13 }
 0x48e   : > { %2027 = vrot.lane.b32.xlu1 %v2013_v33, %s7781_s30 }
 0x492   : > { %2031 = vrot.lane.b32.xlu1 %v2015_v46, %s7773_s16 }
 0x496   : > { %2035 = vrot.lane.b32.xlu1 %v2016_v16, %s6117_s13 }
 0x49a   : > { %2039 = vrot.lane.b32.xlu1 %v2017_v9, %s7781_s30 }
 0x4cc   : > { %v1914_v20 = vpop.permute.xlu1 %1913 }
 0x4d0   : > { %v1908_v52 = vpop.permute.xlu1 %1907 }
 0x4d2   : > { %v1922_v24 = vpop.permute.xlu0 %1921 }
 0x4d4   : > { %v1912_v39 = vpop.permute.xlu1 %1911 }
 0x4d5   : > { %v1940_v48 = vsel %vm508_vm1, %v1871_v4, %v1912_v39 }
 0x4d6   : > { %v1942_v50 = vsel %vm1932_vm0, %v1940_v48, %v1914_v20 }
 0x4d8   : > { %v1906_v19 = vpop.permute.xlu1 %1905 }
 0x4d9   : > { %v1931_v31 = vsel %vm508_vm1, %v1859_v55, %v1906_v19 }
 0x4da   : > { %v1934_v0 = vsel %vm1932_vm0, %v1931_v31, %v1908_v52 }
 0x4dc   : > { %v1916_v22 = vpop.permute.xlu1 %1915 }
 0x4dd   : > { %v1944_v56 = vsel %vm613_vm9, %v1942_v50, %v1916_v22 }
 0x4de   : > { %2078 = vmatprep.subr.bf16.mxu1 %v1944_v56 }
 0x4e0   : > { %v1910_v63 = vpop.permute.xlu1 %1909 }
 0x4e1   : > { %v1936_v62 = vsel %vm613_vm9, %v1934_v0, %v1910_v63 }
 0x4e2   : > { %2079 = vmatpush1.bf16.msra.mxu1 %v1936_v62 }
 0x4e4   : > { %v1926_v26 = vpop.permute.xlu1 %1925 }
 0x4e5   : > { %5084 = vmatmul.mubr.msk.bf16.vlgmr.msra.gmra.mxu1 %vm478_vm4, %v6035_v42 }
 0x4e6   : > { %2106 = vmatprep.mubr.bf16.mxu1 %v6114_v10 }
 0x4e8   : > { %v1920_v18 = vpop.permute.xlu1 %1919 }
 0x4ec   : > { %v1924_v4 = vpop.permute.xlu1 %1923 }
 0x4ed   : > { %5085 = vmatmul.mubr.msk.bf16.gmra.mxu1 %vm478_vm4, %v6036_v40  ;;  %v1956_v45 = vsel %vm508_vm1, %v1895_v49, %v1924_v4 }
 0x4ee   : > { %2149 = vmatprep.mubr.bf16.mxu1 %v6114_v10  ;;  %v1958_v13 = vsel %vm1932_vm0, %v1956_v45, %v1926_v26 }
 0x4f0   : > { %v1918_v55 = vpop.permute.xlu1 %1917 }
 0x4f1   : > { %v1948_v5 = vsel %vm508_vm1, %v1883_v60, %v1918_v55 }
 0x4f2   : > { %v1950_v47 = vsel %vm1932_vm0, %v1948_v5, %v1920_v18 }
 0x4f3   : > { %v1952_v1 = vsel %vm613_vm9, %v1950_v47, %v1922_v24 }
 0x4f4   : > { %v1928_v11 = vpop.permute.xlu1 %1927 }
 0x4f5   : > { %v1960_v2 = vsel %vm613_vm9, %v1958_v13, %v1928_v11 }
 0x4f6   : > { %2131 = vmatprep.subr.bf16.mxu1 %v1960_v2 }
 0x4f7   : > { %2132 = vmatpush1.bf16.msra.mxu1 %v1952_v1 }
 0x4f8   : > { %v2020_v53 = vpop.permute.xlu1 %2019 }
 0x4f9   : > { %v2042_v54 = vsel %vm508_vm1, %v2010_v57, %v2020_v53 }
 0x4fa   : > { %5086 = vmatmul.mubr.msk.bf16.vlgmr.msra.gmra.mxu1 %vm478_vm4, %v6035_v42 }
 0x4fb   : > { %2159 = vmatprep.mubr.bf16.mxu1 %v6114_v10 }
 0x4fc   : > { %v2024_v59 = vpop.permute.xlu1 %2023 }
 0x4fd   : > { %v2043_v60 = vsel %vm1932_vm0, %v2042_v54, %v2024_v59 }
 0x500   : > { %v2028_v49 = vpop.permute.xlu1 %2027 }
 0x501   : > { %v6936_v36 = vsel %vm613_vm9, %v2043_v60, %v2028_v49 }
 0x502   : > { %5087 = vmatmul.mubr.msk.bf16.gmra.mxu1 %vm478_vm4, %v6036_v40 }
 0x503   : > { %4758 = vmatprep.mubr.bf16.mxu1 %v6114_v10 }
 0x504   : > { %v2032_v27 = vpop.permute.xlu1 %2031 }
 0x505   : > { %v2045_v30 = vsel %vm508_vm1, %v2014_v15, %v2032_v27 }
 0x508   : > { %v2036_v6 = vpop.permute.xlu1 %2035 }
 0x509   : > { %v2046_v35 = vsel %vm1932_vm0, %v2045_v30, %v2036_v6 }
 0x50c   : > { %v2040_v61 = vpop.permute.xlu1 %2039 }
 0x50d   : > { %v6939_v51 = vsel %vm613_vm9, %v2046_v35, %v2040_v61 }
 0x5a5   : > { %v2098_v28 = vpop.f32.mrf.mxu1 }
 0x5a6   : > { %v6942_v32 = vadd.f32 %v2098_v28, %v6936_v36 }
 0x5a7   : > { %v2100_v41 = vpop.f32.mrf.mxu1 }
 0x5a8   : > { %v6945_v43 = vadd.f32 %v2100_v41, %v6939_v51  ;;  %2174 = vrot.lane.b32.xlu1 %v6942_v32, %s7781_s30 }
 0x5a9   : > { %v2102_v58 = vpop.f32.mrf.mxu1 }
 0x5aa   : > { %2226 = vrot.lane.b32.xlu0 %v6945_v43, %s6117_s13  ;;  %v6965_v14 = vadd.f32 %v2102_v58, %v6936_v36 }
 0x5ab   : > { %v2104_v38 = vpop.f32.mrf.mxu1 }
 0x5ac   : > { %2186 = vrot.lane.b32.xlu1 %v6942_v32, %s6117_s13  ;;  %v6983_v33 = vadd.f32 %v2104_v38, %v6939_v51 }
 0x5ad   : > { %v2108_v7 = vpop.f32.mrf.mxu1 }
 0x5ae   : > { %2238 = vrot.lane.b32.xlu0 %v6945_v43, %s7773_s16  ;;  %v7001_v16 = vadd.f32 %v2108_v7, %v6936_v36 }
 0x5af   : > { %v2110_v21 = vpop.f32.mrf.mxu1 }
 0x5b0   : > { %v6956_v23 = vadd.f32 %v2110_v21, %v6939_v51  ;;  %2198 = vrot.lane.b32.xlu1 %v6942_v32, %s7773_s16 }
 0x5b1   : > { %v2112_v3 = vpop.f32.mrf.mxu1 }
 0x5b2   : > { %2230 = vrot.lane.b32.xlu0 %v6956_v23, %s6117_s13  ;;  %v7023_v39 = vadd.f32 %v2112_v3, %v6936_v36 }
 0x5b3   : > { %v2114_v25 = vpop.f32.mrf.mxu1 }
 0x5b4   : > { %2214 = vrot.lane.b32.xlu1 %v6945_v43, %s7781_s30  ;;  %v7041_v48 = vadd.f32 %v2114_v25, %v6939_v51 }
 0x5b6   : > { %2242 = vrot.lane.b32.xlu0 %v6956_v23, %s7773_s16 }
 0x5b8   : > { %2176 = vrot.lane.b32.xlu1 %v6965_v14, %s7781_s30 }
 0x5ba   : > { %v2151_v29 = vpop.f32.mrf.mxu1 }
 0x5bb   : > { %v6972_v12 = vadd.f32 %v2151_v29, %v6936_v36 }
 0x5bc   : > { %2188 = vrot.lane.b32.xlu1 %v6965_v14, %s6117_s13  ;;  %v2153_v44 = vpop.f32.mrf.mxu1 }
 0x5bd   : > { %2254 = vrot.lane.b32.xlu0 %v6972_v12, %s7781_s30  ;;  %v6990_v34 = vadd.f32 %v2153_v44, %v6939_v51 }
 0x5be   : > { %v2155_v46 = vpop.f32.mrf.mxu1 }
 0x5bf   : > { %v7050_v22 = vadd.f32 %v2155_v46, %v6936_v36 }
 0x5c0   : > { %2200 = vrot.lane.b32.xlu1 %v6965_v14, %s7773_s16  ;;  %v2157_v8 = vpop.f32.mrf.mxu1 }
 0x5c1   : > { %2266 = vrot.lane.b32.xlu0 %v6972_v12, %s6117_s13  ;;  %v7059_v50 = vadd.f32 %v2157_v8, %v6939_v51 }
 0x5c2   : > { %v2161_v9 = vpop.f32.mrf.mxu1 }
 0x5c3   : > { %v7008_v20 = vadd.f32 %v2161_v9, %v6936_v36 }
 0x5c4   : > { %2216 = vrot.lane.b32.xlu1 %v6983_v33, %s7781_s30  ;;  %v2163_v52 = vpop.f32.mrf.mxu1 }
 0x5c5   : > { %2278 = vrot.lane.b32.xlu0 %v6972_v12, %s7773_s16  ;;  %v7026_v19 = vadd.f32 %v2163_v52, %v6939_v51 }
 0x5c6   : > { %v2165_v31 = vpop.f32.mrf.mxu1 }
 0x5c7   : > { %v7068_v56 = vadd.f32 %v2165_v31, %v6936_v36 }
 0x5c8   : > { %2228 = vrot.lane.b32.xlu1 %v6983_v33, %s6117_s13  ;;  %v2167_v63 = vpop.f32.mrf.mxu1 }
 0x5c9   : > { %2294 = vrot.lane.b32.xlu0 %v6990_v34, %s7781_s30  ;;  %v7077_v0 = vadd.f32 %v2167_v63, %v6939_v51 }
 0x5cc   : > { %2240 = vrot.lane.b32.xlu1 %v6983_v33, %s7773_s16 }
 0x5cd   : > { %2306 = vrot.lane.b32.xlu0 %v6990_v34, %s6117_s13 }
 0x5d0   : > { %2178 = vrot.lane.b32.xlu1 %v7001_v16, %s7781_s30 }
 0x5d1   : > { %2318 = vrot.lane.b32.xlu0 %v6990_v34, %s7773_s16 }
 0x5d4   : > { %2190 = vrot.lane.b32.xlu1 %v7001_v16, %s6117_s13 }
 0x5d5   : > { %2258 = vrot.lane.b32.xlu0 %v7008_v20, %s7781_s30 }
 0x5d8   : > { %2202 = vrot.lane.b32.xlu1 %v7001_v16, %s7773_s16 }
 0x5d9   : > { %2270 = vrot.lane.b32.xlu0 %v7008_v20, %s6117_s13 }
 0x5dc   : > { %2218 = vrot.lane.b32.xlu1 %v6956_v23, %s7781_s30 }
 0x5dd   : > { %2282 = vrot.lane.b32.xlu0 %v7008_v20, %s7773_s16 }
 0x5e0   : > { %2180 = vrot.lane.b32.xlu1 %v7023_v39, %s7781_s30 }
 0x5e1   : > { %2298 = vrot.lane.b32.xlu0 %v7026_v19, %s7781_s30 }
 0x5e4   : > { %2192 = vrot.lane.b32.xlu1 %v7023_v39, %s6117_s13 }
 0x5e5   : > { %2310 = vrot.lane.b32.xlu0 %v7026_v19, %s6117_s13 }
 0x5e8   : > { %2204 = vrot.lane.b32.xlu1 %v7023_v39, %s7773_s16 }
 0x5e9   : > { %2322 = vrot.lane.b32.xlu0 %v7026_v19, %s7773_s16 }
 0x5ec   : > { %2220 = vrot.lane.b32.xlu1 %v7041_v48, %s7781_s30 }
 0x5f0   : > { %2232 = vrot.lane.b32.xlu1 %v7041_v48, %s6117_s13 }
 0x5f4   : > { %2244 = vrot.lane.b32.xlu1 %v7041_v48, %s7773_s16 }
 0x5f8   : > { %2256 = vrot.lane.b32.xlu1 %v7050_v22, %s7781_s30 }
 0x5fc   : > { %2268 = vrot.lane.b32.xlu1 %v7050_v22, %s6117_s13 }
 0x600   : > { %2280 = vrot.lane.b32.xlu1 %v7050_v22, %s7773_s16 }
 0x604   : > { %2296 = vrot.lane.b32.xlu1 %v7059_v50, %s7781_s30 }
 0x608   : > { %2308 = vrot.lane.b32.xlu1 %v7059_v50, %s6117_s13 }
 0x60c   : > { %2320 = vrot.lane.b32.xlu1 %v7059_v50, %s7773_s16 }
 0x610   : > { %2260 = vrot.lane.b32.xlu1 %v7068_v56, %s7781_s30 }
 0x614   : > { %2272 = vrot.lane.b32.xlu1 %v7068_v56, %s6117_s13 }
 0x618   : > { %2284 = vrot.lane.b32.xlu1 %v7068_v56, %s7773_s16 }
 0x61a   : > { %v2175_v62 = vpop.permute.xlu1 %2174 }
 0x61c   : > { %v2227_v42 = vpop.permute.xlu0 %2226  ;;  %2300 = vrot.lane.b32.xlu1 %v7077_v0, %s7781_s30  ;;  %s6039_s30 = scalar_lea.vmem %s7678_s29, 4096 }
 0x61d   : > { %v2362_v5 = vcombine.low %v6945_v43, %v2227_v42  ;;  %v2363_v46 = vcombine.high %v6945_v43, %v2227_v42  ;;  %p6040_p11 = scmp.ne.s32.totalorder %s7678_s29, %s6039_s30  ;;  %p6047_p1 = scmp.lt.s32.totalorder %s6045_s25, %s6039_s30 }
 0x61e   : > { %v2187_v26 = vpop.permute.xlu1 %2186 }
 0x61f   : > { %v2330_v55 = vcombine.low %v6942_v32, %v2187_v26  ;;  %v2370_v2 = vrot.slane %v2362_v5, %v6782_v17  ;;  %v2331_v8 = vcombine.high %v6942_v32, %v2187_v26  ;;  %p6041_p12 = pnand %p6040_p11, %p6219_p5  ;;  %p6048_p2 = por %p6047_p1, %p6046_p0 }
 0x620   : > { %v2239_v18 = vpop.permute.xlu0 %2238  ;;  %2312 = vrot.lane.b32.xlu1 %v7077_v0, %s6117_s13 }
 0x621   : > { %v2338_v13 = vrot.slane %v2330_v55, %v6782_v17  ;;  %v7134_v43 = vrot.slane %v2331_v8, %v6782_v17  ;;  %p6042_p13 = pneg %p6041_p12 }
 0x622   : > { %v2199_v40 = vpop.permute.xlu1 %2198 }
 0x623   : > { %v2346_v4 = vcombine.low %v2175_v62, %v2199_v40  ;;  %v2347_v25 = vcombine.high %v2175_v62, %v2199_v40  ;;  %p6049_p3 = pnand %p6048_p2, %p6042_p13 }
 0x624   : > { %2324 = vrot.lane.b32.xlu1 %v7077_v0, %s7773_s16  ;;  %v7086_v45 = vpop.permute.xlu0 %2230  ;;  %s7674_s16 = scalar_lea.hbm %s7736_s11, %s5103_s24 }
 0x625   : > { %v2354_v47 = vrot.slane %v2346_v4, %v6782_v17  ;;  %v7126_v63 = vrot.slane %v2347_v25, %v6782_v17 }
 0x626   : > { %v2215_v11 = vpop.permute.xlu1 %2214 }
 0x627   : > { %v2378_v24 = vcombine.low %v2215_v11, %v2239_v18  ;;  %v2394_v1 = vcombine.low %v2338_v13, %v2354_v47  ;;  %v2379_v29 = vcombine.high %v2215_v11, %v2239_v18  ;;  %v2395_v52 = vcombine.high %v2338_v13, %v2354_v47 }
 0x628   : > { %v7095_v54 = vpop.permute.xlu0 %2242  ;;  %v2377_v18 = vrot.slane %v2363_v46, %v6782_v17  ;;  %v2410_v47 = vcombine.low %v7134_v43, %v7126_v63 }
 0x629   : > { %v2386_v57 = vrot.slane %v2378_v24, %v6782_v17  ;;  %v2402_v60 = vrot.slane %v2394_v1, %v6785_v37  ;;  %v2393_v4 = vrot.slane %v2379_v29, %v6782_v17  ;;  %v2409_v26 = vrot.slane %v2395_v52, %v6785_v37 }
 0x62a   : > { %v7093_v53 = vpop.permute.xlu1 %2176  ;;  %v7165_v46 = vrot.slane %v2410_v47, %v6785_v37 }
 0x62b   : > { %v2426_v59 = vcombine.low %v2370_v2, %v2386_v57  ;;  %v2427_v44 = vcombine.high %v2370_v2, %v2386_v57  ;;  %v2442_v11 = vcombine.low %v2377_v18, %v2393_v4  ;;  %v2443_v13 = vcombine.high %v2377_v18, %v2393_v4 }
 0x62d   : > { %v2434_v49 = vrot.slane %v2426_v59, %v6785_v37  ;;  %v2441_v55 = vrot.slane %v2427_v44, %v6785_v37  ;;  %v2411_v44 = vcombine.high %v7134_v43, %v7126_v63  ;;  %v7169_v4 = vrot.slane %v2442_v11, %v6785_v37 }
 0x62e   : > { %v7099_v15 = vpop.permute.xlu1 %2188 }
 0x62f   : > { %v7101_v27 = vpop.permute.xlu0 %2254  ;;  %v2458_v30 = vcombine.low %v2402_v60, %v2434_v49  ;;  %v2459_v6 = vcombine.high %v2402_v60, %v2434_v49  ;;  %v2603_v35 = vcombine.high %v6965_v14, %v7099_v15  ;;  %v2460_v57 = vcombine.low %v2409_v26, %v2441_v55 }
 0x630   : > { %v2461_v59 = vcombine.high %v2409_v26, %v2441_v55  ;;  %v2906_v60 = vcombine.low %v6956_v23, %v7086_v45 }
 0x631   : > { %v5475_v61 = vpack.i.bf16 %v2459_v6, %v2458_v30  ;;  %v7110_v41 = vrot.slane %v2603_v35, %v6782_v17  ;;  %v2907_v35 = vcombine.high %v6956_v23, %v7086_v45 }
 0x632   : > { %v7105_v36 = vpop.permute.xlu1 %2200  ;;  %v5499_v55 = vpack.i.bf16 %v2461_v59, %v2460_v57 }
 0x633   : > { %v2619_v28 = vcombine.high %v7093_v53, %v7105_v36  ;;  %v2267_v51 = vpop.permute.xlu0 %2266  ;;  %5476 = vxpose.xlu0.b32.start [1/2] (short) (narrow) %v5475_v61, 32  ;;  %v2618_v26 = vcombine.low %v7093_v53, %v7105_v36 }
 0x634   : > { %v2466_v24 = vcombine.low %v6972_v12, %v2267_v51  ;;  %v2467_v61 = vcombine.high %v6972_v12, %v2267_v51  ;;  %v7172_v12 = vrot.slane %v2443_v13, %v6785_v37 }
 0x635   : > { %v7113_v58 = vrot.slane %v2619_v28, %v6782_v17 }
 0x636   : > { %v7115_v38 = vpop.permute.xlu1 %2216  ;;  %v2474_v8 = vrot.slane %v2466_v24, %v6782_v17 }
 0x637   : > { %v2682_v7 = vcombine.low %v7110_v41, %v7113_v58  ;;  %v2683_v21 = vcombine.high %v7110_v41, %v7113_v58  ;;  %v2279_v3 = vpop.permute.xlu0 %2278 }
 0x638   : > { %v2482_v32 = vcombine.low %v7101_v27, %v2279_v3  ;;  %v2483_v51 = vcombine.high %v7101_v27, %v2279_v3 }
 0x639   : > { %v7186_v27 = vrot.slane %v2683_v21, %v6785_v37  ;;  %v2690_v23 = vrot.slane %v2682_v7, %v6785_v37 }
 0x63a   : > { %v7123_v9 = vpop.permute.xlu1 %2228  ;;  %v2490_v49 = vrot.slane %v2482_v32, %v6782_v17  ;;  %v7190_v24 = vrot.slane %v2483_v51, %v6782_v17 }
 0x63b   : > { %v2295_v31 = vpop.permute.xlu0 %2294  ;;  %v2635_v62 = vcombine.high %v6983_v33, %v7123_v9  ;;  %v2634_v53 = vcombine.low %v6983_v33, %v7123_v9 }
 0x63c   : > { %v2531_v47 = vcombine.high %v2474_v8, %v2490_v49 }
 0x63d   : > { %v7146_v2 = vrot.slane %v2635_v62, %v6782_v17  ;;  %v2530_v62 = vcombine.low %v2474_v8, %v2490_v49 }
 0x63e   : > { %v7137_v42 = vpop.permute.xlu1 %2240 }
 0x63f   : > { %v2651_v40 = vcombine.high %v7115_v38, %v7137_v42  ;;  %v2307_v5 = vpop.permute.xlu0 %2306  ;;  %v2538_v59 = vrot.slane %v2530_v62, %v6785_v37 }
 0x640   : > { %v2498_v30 = vcombine.low %v6990_v34, %v2307_v5  ;;  %v2499_v3 = vcombine.high %v6990_v34, %v2307_v5 }
 0x641   : > { %v7149_v1 = vrot.slane %v2651_v40, %v6782_v17  ;;  %v7180_v40 = vrot.slane %v2467_v61, %v6782_v17 }
 0x642   : > { %v2179_v6 = vpop.permute.xlu1 %2178  ;;  %v2506_v18 = vrot.slane %v2498_v30, %v6782_v17  ;;  %v2545_v30 = vrot.slane %v2531_v47, %v6785_v37  ;;  %v2513_v9 = vrot.slane %v2499_v3, %v6782_v17 }
 0x643   : > { %v2714_v28 = vcombine.low %v7146_v2, %v7149_v1  ;;  %v2715_v25 = vcombine.high %v7146_v2, %v7149_v1  ;;  %v2319_v29 = vpop.permute.xlu0 %2318 }
 0x644   : > { %v2514_v52 = vcombine.low %v2295_v31, %v2319_v29  ;;  %v2515_v32 = vcombine.high %v2295_v31, %v2319_v29 }
 0x645   : > { %v7183_v11 = vrot.slane %v2715_v25, %v6785_v37 }
 0x646   : > { %v2522_v63 = vrot.slane %v2514_v52, %v6782_v17  ;;  %v2191_v43 = vpop.permute.xlu1 %2190  ;;  %v7198_v49 = vrot.slane %v2515_v32, %v6782_v17 }
 0x647   : > { %v2874_v36 = vcombine.low %v7001_v16, %v2191_v43  ;;  %v2875_v57 = vcombine.high %v7001_v16, %v2191_v43  ;;  %v2736_v33 = vcombine.low %v7186_v27, %v7183_v11  ;;  %v2650_v16 = vcombine.low %v7115_v38, %v7137_v42 }
 0x648   : > { %v2562_v13 = vcombine.low %v2506_v18, %v2522_v63  ;;  %v2563_v31 = vcombine.high %v2506_v18, %v2522_v63  ;;  %v2578_v18 = vcombine.low %v2513_v9, %v7198_v49  ;;  %v2737_v1 = vcombine.high %v7186_v27, %v7183_v11 }
 0x649   : > { %v7209_v52 = vrot.slane %v2874_v36, %v6782_v17  ;;  %v7212_v51 = vrot.slane %v2875_v57, %v6782_v17 }
 0x64a   : > { %v2570_v21 = vrot.slane %v2562_v13, %v6785_v37  ;;  %v2577_v34 = vrot.slane %v2563_v31, %v6785_v37  ;;  %v2203_v5 = vpop.permute.xlu1 %2202  ;;  %v2425_v31 = vrot.slane %v2411_v44, %v6785_v37  ;;  %v2462_v44 = vcombine.low %v7165_v46, %v7169_v4 }
 0x64b   : > { %v2890_v61 = vcombine.low %v2179_v6, %v2203_v5  ;;  %v2891_v25 = vcombine.high %v2179_v6, %v2203_v5  ;;  %v2463_v5 = vcombine.high %v7165_v46, %v7169_v4  ;;  %v2921_v46 = vrot.slane %v2907_v35, %v6782_v17 }
 0x64c   : > { %v2594_v29 = vcombine.low %v2538_v59, %v2570_v21  ;;  %v2595_v8 = vcombine.high %v2538_v59, %v2570_v21  ;;  %v2596_v42 = vcombine.low %v2545_v30, %v2577_v34  ;;  %v2597_v63 = vcombine.high %v2545_v30, %v2577_v34 }
 0x64d   : > { %v2898_v62 = vrot.slane %v2890_v61, %v6782_v17  ;;  %v7216_v6 = vrot.slane %v2891_v25, %v6782_v17  ;;  %5500 = vxpose.xlu1.b32.start [1/2] (short) (narrow) %v5499_v55, 32  ;;  %v2602_v55 = vcombine.low %v6965_v14, %v7099_v15  ;;  %v2914_v59 = vrot.slane %v2906_v60, %v6782_v17 }
 0x64e   : > { %v5477_v32 = vpack.i.bf16 %v2595_v8, %v2594_v29  ;;  %v2219_v38 = vpop.permute.xlu1 %2218  ;;  %v2546_v21 = vcombine.low %v7180_v40, %v7190_v24  ;;  %v2658_v34 = vrot.slane %v2650_v16, %v6782_v17  ;;  %v7240_v14 = vrot.slane %v2618_v26, %v6782_v17 }
 0x64f   : > { %v2938_v43 = vcombine.low %v7209_v52, %v2898_v62  ;;  %v2939_v47 = vcombine.high %v7209_v52, %v2898_v62  ;;  %v2954_v3 = vcombine.low %v7212_v51, %v7216_v6  ;;  %v2955_v13 = vcombine.high %v7212_v51, %v7216_v6 }
 0x650   : > { %v2922_v36 = vcombine.low %v2219_v38, %v7095_v54  ;;  %v2923_v57 = vcombine.high %v2219_v38, %v7095_v54  ;;  %5478 = vxpose.xlu0.b32.end [2/2] (short) (narrow) %v5477_v32, 32  ;;  %v2464_v60 = vcombine.low %v2425_v31, %v7172_v12  ;;  %v2642_v30 = vrot.slane %v2634_v53, %v6782_v17 }
 0x651   : > { %v2586_v61 = vrot.slane %v2578_v18, %v6785_v37  ;;  %v5501_v25 = vpack.i.bf16 %v2597_v63, %v2596_v42  ;;  %v2465_v16 = vcombine.high %v2425_v31, %v7172_v12  ;;  %v2610_v29 = vrot.slane %v2602_v55, %v6782_v17 }
 0x652   : > { %v2930_v15 = vrot.slane %v2922_v36, %v6782_v17  ;;  %v7243_v54 = vpop.permute.xlu1 %2180  ;;  %v2579_v26 = vcombine.high %v2513_v9, %v7198_v49  ;;  %v2554_v52 = vrot.slane %v2546_v21, %v6785_v37  ;;  %v2698_v62 = vcombine.low %v2642_v30, %v2658_v34 }
 0x653   : > { %5502 = vxpose.xlu1.b32.end [2/2] (short) (narrow) %v5501_v25, 32  ;;  %v2666_v4 = vcombine.low %v2610_v29, %v7240_v14  ;;  %v2547_v12 = vcombine.high %v7180_v40, %v7190_v24  ;;  %v5523_v18 = vpack.i.bf16 %v2463_v5, %v2462_v44  ;;  %v2722_v49 = vrot.slane %v2714_v28, %v6785_v37 }
 0x654   : > { %v2971_v8 = vcombine.high %v2914_v59, %v2930_v15  ;;  %v2970_v32 = vcombine.low %v2914_v59, %v2930_v15  ;;  %v5547_v9 = vpack.i.bf16 %v2465_v16, %v2464_v60  ;;  %v2598_v38 = vcombine.low %v2554_v52, %v2586_v61 }
 0x655   : > { %v2599_v42 = vcombine.high %v2554_v52, %v2586_v61  ;;  %v2667_v63 = vcombine.high %v2610_v29, %v7240_v14  ;;  %v2593_v45 = vrot.slane %v2579_v26, %v6785_v37  ;;  %v2706_v40 = vrot.slane %v2698_v62, %v6785_v37 }
 0x656   : > { %v7261_v53 = vpop.permute.xlu1 %2192  ;;  %v2985_v35 = vrot.slane %v2971_v8, %v6785_v37  ;;  %v2937_v24 = vrot.slane %v2923_v57, %v6782_v17  ;;  %v2978_v2 = vrot.slane %v2970_v32, %v6785_v37  ;;  %v2674_v28 = vrot.slane %v2666_v4, %v6785_v37 }
 0x657   : > { %v2561_v31 = vrot.slane %v2547_v12, %v6785_v37  ;;  %v2699_v41 = vcombine.high %v2642_v30, %v2658_v34  ;;  %v2953_v58 = vrot.slane %v2939_v47, %v6785_v37  ;;  %v2946_v55 = vrot.slane %v2938_v43, %v6785_v37 }
 0x658   : > { %v5525_v36 = vpack.i.bf16 %v2599_v42, %v2598_v38  ;;  %v7286_v57 = vpack.i.bf16 %v2737_v1, %v2736_v33  ;;  %v2734_v59 = vcombine.low %v2690_v23, %v2722_v49  ;;  %v2735_v14 = vcombine.high %v2690_v23, %v2722_v49 }
 0x659   : > { %5524 = vxpose.xlu0.b32.start [1/2] (short) (narrow) %v5523_v18, 32  ;;  %v2600_v21 = vcombine.low %v2561_v31, %v2593_v45  ;;  %v2601_v44 = vcombine.high %v2561_v31, %v2593_v45  ;;  %v3004_v15 = vcombine.low %v2953_v58, %v2985_v35  ;;  %v2987_v5 = vcombine.high %v2921_v46, %v2937_v24 }
 0x65a   : > { %v2205_v7 = vpop.permute.xlu1 %2204  ;;  %v2730_v60 = vcombine.low %v2674_v28, %v2706_v40  ;;  %v3005_v34 = vcombine.high %v2953_v58, %v2985_v35  ;;  %v3002_v30 = vcombine.low %v2946_v55, %v2978_v2  ;;  %v2986_v47 = vcombine.low %v2921_v46, %v2937_v24 }
 0x65b   : > { %v2731_v43 = vcombine.high %v2674_v28, %v2706_v40  ;;  %v7288_v25 = vpack.i.bf16 %v2735_v14, %v2734_v59  ;;  %v3003_v16 = vcombine.high %v2946_v55, %v2978_v2  ;;  %v2713_v11 = vrot.slane %v2699_v41, %v6785_v37 }
 0x65c   : > { %5548 = vxpose.xlu1.b32.start [1/2] (short) (narrow) %v5547_v9, 32  ;;  %v3162_v27 = vcombine.low %v7243_v54, %v2205_v7  ;;  %v3163_v33 = vcombine.high %v7243_v54, %v2205_v7  ;;  %v5549_v29 = vpack.i.bf16 %v2601_v44, %v2600_v21  ;;  %v2681_v26 = vrot.slane %v2667_v63, %v6785_v37 }
 0x65d   : > { %5526 = vxpose.xlu0.b32.end [2/2] (short) (narrow) %v5525_v36, 32  ;;  %v3001_v8 = vrot.slane %v2987_v5, %v6785_v37  ;;  %v2994_v52 = vrot.slane %v2986_v47, %v6785_v37  ;;  %v3146_v62 = vcombine.low %v7023_v39, %v7261_v53  ;;  %v3147_v32 = vcombine.high %v7023_v39, %v7261_v53 }
 0x65e   : > { %v2221_v61 = vpop.permute.xlu1 %2220  ;;  %v5571_v4 = vpack.i.bf16 %v2731_v43, %v2730_v60  ;;  %v2969_v54 = vrot.slane %v2955_v13, %v6785_v37  ;;  %v2732_v12 = vcombine.low %v2681_v26, %v2713_v11  ;;  %v7304_v18 = vpack.i.bf16 %v3005_v34, %v3004_v15 }
 0x65f   : > { %v7306_v49 = vpack.i.bf16 %v3003_v16, %v3002_v30  ;;  %v2962_v9 = vrot.slane %v2954_v3, %v6785_v37  ;;  %v3170_v39 = vrot.slane %v3162_v27, %v6782_v17  ;;  %v3177_v53 = vrot.slane %v3163_v33, %v6782_v17  ;;  %v7332_v16 = vpop.permute.xlu0 %2258 }
 0x660   : > { %5550 = vxpose.xlu1.b32.end [2/2] (short) (narrow) %v5549_v29, 32  ;;  %v2733_v38 = vcombine.high %v2681_v26, %v2713_v11  ;;  %v3008_v13 = vcombine.low %v2969_v54, %v3001_v8  ;;  %v3009_v23 = vcombine.high %v2969_v54, %v3001_v8  ;;  %v3154_v45 = vrot.slane %v3146_v62, %v6782_v17 }
 0x661   : > { %v3161_v35 = vrot.slane %v3147_v32, %v6782_v17  ;;  %v3006_v24 = vcombine.low %v2962_v9, %v2994_v52  ;;  %v3007_v51 = vcombine.high %v2962_v9, %v2994_v52 }
 0x662   : > { %v2233_v46 = vpop.permute.xlu1 %2232  ;;  %v7318_v2 = vpack.i.bf16 %v3009_v23, %v3008_v13  ;;  %v3210_v1 = vcombine.low %v3154_v45, %v3170_v39  ;;  %v5595_v31 = vpack.i.bf16 %v2733_v38, %v2732_v12  ;;  %v3211_v36 = vcombine.high %v3154_v45, %v3170_v39 }
 0x663   : > { %v3178_v42 = vcombine.low %v7041_v48, %v2233_v46  ;;  %v3179_v63 = vcombine.high %v7041_v48, %v2233_v46  ;;  %v3226_v28 = vcombine.low %v3161_v35, %v3177_v53  ;;  %v7320_v41 = vpack.i.bf16 %v3007_v51, %v3006_v24 }
 0x664   : > { %v3227_v59 = vcombine.high %v3161_v35, %v3177_v53  ;;  %v3218_v60 = vrot.slane %v3210_v1, %v6785_v37  ;;  %v3225_v11 = vrot.slane %v3211_v36, %v6785_v37  ;;  %v7342_v53 = vpop.permute.xlu0 %2270 }
 0x665   : > { %v3186_v48 = vrot.slane %v3178_v42, %v6782_v17  ;;  %v3193_v58 = vrot.slane %v3179_v63, %v6782_v17  ;;  %v3234_v34 = vrot.slane %v3226_v28, %v6785_v37 }
 0x666   : > { %5572 = vxpose.xlu0.b32.start [1/2] (short) (narrow) %v5571_v4, 32  ;;  %v2245_v40 = vpop.permute.xlu1 %2244  ;;  %v3241_v27 = vrot.slane %v3227_v59, %v6785_v37 }
 0x667   : > { %v3194_v6 = vcombine.low %v2221_v61, %v2245_v40  ;;  %v3195_v3 = vcombine.high %v2221_v61, %v2245_v40 }
 0x668   : > { %v7346_v13 = vpop.permute.xlu0 %2282 }
 0x669   : > { %v3202_v7 = vrot.slane %v3194_v6, %v6782_v17  ;;  %v3209_v55 = vrot.slane %v3195_v3, %v6782_v17  ;;  %5596 = vxpose.xlu1.b32.start [1/2] (short) (narrow) %v5595_v31, 32 }
 0x66a   : > { %v2257_v21 = vpop.permute.xlu1 %2256 }
 0x66b   : > { %v3242_v44 = vcombine.low %v3186_v48, %v3202_v7  ;;  %v3243_v14 = vcombine.high %v3186_v48, %v3202_v7  ;;  %v3258_v15 = vcombine.low %v3193_v58, %v3209_v55  ;;  %v3259_v5 = vcombine.high %v3193_v58, %v3209_v55 }
 0x66c   : > { %v7352_v3 = vpop.permute.xlu0 %2298 }
 0x66d   : > { %v3250_v30 = vrot.slane %v3242_v44, %v6785_v37  ;;  %v3257_v47 = vrot.slane %v3243_v14, %v6785_v37  ;;  %v3266_v61 = vrot.slane %v3258_v15, %v6785_v37  ;;  %v3273_v43 = vrot.slane %v3259_v5, %v6785_v37 }
 0x66e   : > { %v2269_v33 = vpop.permute.xlu1 %2268 }
 0x66f   : > { %v3275_v29 = vcombine.high %v3218_v60, %v3250_v30  ;;  %v3279_v26 = vcombine.high %v3234_v34, %v3266_v61  ;;  %v3274_v8 = vcombine.low %v3218_v60, %v3250_v30  ;;  %v3278_v52 = vcombine.low %v3234_v34, %v3266_v61 }
 0x670   : > { %v3277_v62 = vcombine.high %v3225_v11, %v3257_v47  ;;  %v3281_v32 = vcombine.high %v3241_v27, %v3273_v43  ;;  %v3276_v4 = vcombine.low %v3225_v11, %v3257_v47  ;;  %v3280_v39 = vcombine.low %v3241_v27, %v3273_v43  ;;  %v7360_v5 = vpop.permute.xlu0 %2310 }
 0x671   : > { %v7336_v46 = vpack.i.bf16 %v3275_v29, %v3279_v26  ;;  %v7338_v12 = vpack.i.bf16 %v3278_v52, %v3274_v8  ;;  %v2738_v45 = vcombine.low %v7050_v22, %v2269_v33  ;;  %v2739_v60 = vcombine.high %v7050_v22, %v2269_v33 }
 0x672   : > { %v2281_v54 = vpop.permute.xlu1 %2280  ;;  %v7340_v9 = vpack.i.bf16 %v3277_v62, %v3281_v32  ;;  %v7344_v38 = vpack.i.bf16 %v3276_v4, %v3280_v39 }
 0x673   : > { %v2754_v63 = vcombine.low %v2257_v21, %v2281_v54  ;;  %v2746_v51 = vrot.slane %v2738_v45, %v6782_v17  ;;  %v2755_v36 = vcombine.high %v2257_v21, %v2281_v54  ;;  %v2753_v26 = vrot.slane %v2739_v60, %v6782_v17 }
 0x674   : > { %v2323_v33 = vpop.permute.xlu0 %2322  ;;  %v3042_v45 = vcombine.low %v7026_v19, %v7360_v5 }
 0x675   : > { %v2762_v35 = vrot.slane %v2754_v63, %v6782_v17  ;;  %v2769_v21 = vrot.slane %v2755_v36, %v6782_v17  ;;  %v3058_v39 = vcombine.low %v7352_v3, %v2323_v33 }
 0x676   : > { %v2297_v42 = vpop.permute.xlu1 %2296 }
 0x677   : > { %v2803_v1 = vcombine.high %v2746_v51, %v2762_v35  ;;  %v2802_v48 = vcombine.low %v2746_v51, %v2762_v35  ;;  %v2819_v62 = vcombine.high %v2753_v26, %v2769_v21  ;;  %v2818_v32 = vcombine.low %v2753_v26, %v2769_v21 }
 0x678   : > { %v3010_v51 = vcombine.low %v7008_v20, %v7342_v53  ;;  %v3043_v21 = vcombine.high %v7026_v19, %v7360_v5 }
 0x679   : > { %v2817_v44 = vrot.slane %v2803_v1, %v6785_v37  ;;  %v2810_v34 = vrot.slane %v2802_v48, %v6785_v37  ;;  %v2833_v63 = vrot.slane %v2819_v62, %v6785_v37  ;;  %v2826_v35 = vrot.slane %v2818_v32, %v6785_v37 }
 0x67a   : > { %v2309_v23 = vpop.permute.xlu1 %2308 }
 0x67b   : > { %v2770_v40 = vcombine.low %v7059_v50, %v2309_v23  ;;  %v2771_v59 = vcombine.high %v7059_v50, %v2309_v23  ;;  %v3026_v23 = vcombine.low %v7332_v16, %v7346_v13 }
 0x67d   : > { %v2778_v28 = vrot.slane %v2770_v40, %v6782_v17  ;;  %v2785_v50 = vrot.slane %v2771_v59, %v6782_v17  ;;  %v3034_v48 = vrot.slane %v3026_v23, %v6782_v17 }
 0x67e   : > { %v2321_v24 = vpop.permute.xlu1 %2320 }
 0x67f   : > { %v2786_v6 = vcombine.low %v2297_v42, %v2321_v24  ;;  %v2787_v58 = vcombine.high %v2297_v42, %v2321_v24 }
 0x681   : > { %v2794_v31 = vrot.slane %v2786_v6, %v6782_v17  ;;  %v2801_v30 = vrot.slane %v2787_v58, %v6782_v17  ;;  %v3066_v6 = vrot.slane %v3058_v39, %v6782_v17  ;;  %v3050_v58 = vrot.slane %v3042_v45, %v6782_v17 }
 0x682   : > { %v7367_v43 = vpop.permute.xlu1 %2260 }
 0x683   : > { %v2834_v7 = vcombine.low %v2778_v28, %v2794_v31  ;;  %v2835_v55 = vcombine.high %v2778_v28, %v2794_v31  ;;  %v2851_v8 = vcombine.high %v2785_v50, %v2801_v30  ;;  %v2850_v22 = vcombine.low %v2785_v50, %v2801_v30 }
 0x684   : > { %v3107_v36 = vcombine.high %v3050_v58, %v3066_v6 }
 0x685   : > { %v2842_v14 = vrot.slane %v2834_v7, %v6785_v37  ;;  %v2849_v15 = vrot.slane %v2835_v55, %v6785_v37  ;;  %v2865_v4 = vrot.slane %v2851_v8, %v6785_v37  ;;  %v2858_v42 = vrot.slane %v2850_v22, %v6785_v37 }
 0x686   : > { %v7371_v54 = vpop.permute.xlu1 %2272  ;;  %v3018_v55 = vrot.slane %v3010_v51, %v6782_v17 }
 0x687   : > { %v2868_v47 = vcombine.low %v2817_v44, %v2849_v15  ;;  %v2869_v61 = vcombine.high %v2817_v44, %v2849_v15  ;;  %v2866_v11 = vcombine.low %v2810_v34, %v2842_v14  ;;  %v2867_v27 = vcombine.high %v2810_v34, %v2842_v14 }
 0x688   : > { %v2872_v40 = vcombine.low %v2833_v63, %v2865_v4  ;;  %v2873_v24 = vcombine.high %v2833_v63, %v2865_v4  ;;  %v2870_v1 = vcombine.low %v2826_v35, %v2858_v42  ;;  %v2871_v28 = vcombine.high %v2826_v35, %v2858_v42 }
 0x689   : > { %v5597_v29 = vpack.i.bf16 %v2869_v61, %v2868_v47  ;;  %v5573_v52 = vpack.i.bf16 %v2867_v27, %v2866_v11  ;;  %v3106_v44 = vcombine.low %v3050_v58, %v3066_v6  ;;  %v3075_v14 = vcombine.high %v3018_v55, %v3034_v48 }
 0x68a   : > { %v7384_v31 = vpop.permute.xlu1 %2284  ;;  %v5645_v7 = vpack.i.bf16 %v2873_v24, %v2872_v40  ;;  %v5621_v59 = vpack.i.bf16 %v2871_v28, %v2870_v1  ;;  %v3074_v15 = vcombine.low %v3018_v55, %v3034_v48  ;;  %v3121_v34 = vrot.slane %v3107_v36, %v6785_v37 }
 0x68b   : > { %5598 = vxpose.xlu1.b32.end [2/2] (short) (narrow) %v5597_v29, 32  ;;  %5574 = vxpose.xlu0.b32.end [2/2] (short) (narrow) %v5573_v52, 32  ;;  %v3114_v30 = vrot.slane %v3106_v44, %v6785_v37  ;;  %v3089_v47 = vrot.slane %v3075_v14, %v6785_v37  ;;  %v3011_v27 = vcombine.high %v7008_v20, %v7342_v53 }
 0x68c   : > { %v3082_v61 = vrot.slane %v3074_v15, %v6785_v37  ;;  %v3298_v63 = vcombine.low %v7367_v43, %v7384_v31  ;;  %v3299_v23 = vcombine.high %v7367_v43, %v7384_v31  ;;  %v3282_v1 = vcombine.low %v7068_v56, %v7371_v54 }
 0x68d   : > { %v3140_v50 = vcombine.low %v3089_v47, %v3121_v34  ;;  %v3141_v11 = vcombine.high %v3089_v47, %v3121_v34  ;;  %v3025_v19 = vrot.slane %v3011_v27, %v6782_v17  ;;  %v3283_v28 = vcombine.high %v7068_v56, %v7371_v54 }
 0x68e   : > { %v2301_v60 = vpop.permute.xlu1 %2300  ;;  %v3138_v26 = vcombine.low %v3082_v61, %v3114_v30  ;;  %v3139_v8 = vcombine.high %v3082_v61, %v3114_v30  ;;  %v3306_v43 = vrot.slane %v3298_v63, %v6782_v17  ;;  %v3290_v56 = vrot.slane %v3282_v1, %v6782_v17 }
 0x68f   : > { %v3297_v54 = vrot.slane %v3283_v28, %v6782_v17 }
 0x694   : > { %5644 = vxpose.xlu1.b32.start [1/2] (short) (narrow) %v7286_v57, 32  ;;  %5620 = vxpose.xlu0.b32.start [1/2] (short) (narrow) %v7288_v25, 32  ;;  %v3059_v57 = vcombine.high %v7352_v3, %v2323_v33  ;;  %v3027_v25 = vcombine.high %v7332_v16, %v7346_v13  ;;  %v2313_v3 = vpop.permute.xlu1 %2312  ;;  %v3057_v16 = vrot.slane %v3043_v21, %v6782_v17 }
 0x695   : > { %v5693_v13 = vpack.i.bf16 %v3141_v11, %v3140_v50  ;;  %v5669_v33 = vpack.i.bf16 %v3139_v8, %v3138_v26  ;;  %v3314_v45 = vcombine.low %v7077_v0, %v2313_v3  ;;  %v3315_v35 = vcombine.high %v7077_v0, %v2313_v3 }
 0x696   : > { %v3073_v29 = vrot.slane %v3059_v57, %v6782_v17  ;;  %v3041_v52 = vrot.slane %v3027_v25, %v6782_v17  ;;  %v3313_v0 = vrot.slane %v3299_v23, %v6782_v17  ;;  %v3347_v11 = vcombine.high %v3290_v56, %v3306_v43 }
 0x697   : > { %v3322_v31 = vrot.slane %v3314_v45, %v6782_v17 }
 0x698   : > { %5646 = vxpose.xlu1.b32.end [2/2] (short) (narrow) %v5645_v7, 32  ;;  %5622 = vxpose.xlu0.b32.end [2/2] (short) (narrow) %v5621_v59, 32  ;;  %v3122_v5 = vcombine.low %v3057_v16, %v3073_v29  ;;  %v3123_v22 = vcombine.high %v3057_v16, %v3073_v29  ;;  %v3090_v20 = vcombine.low %v3025_v19, %v3041_v52  ;;  %v2325_v62 = vpop.permute.xlu1 %2324 }
 0x699   : > { %v3091_v53 = vcombine.high %v3025_v19, %v3041_v52  ;;  %v3330_v4 = vcombine.low %v2301_v60, %v2325_v62  ;;  %v3331_v39 = vcombine.high %v2301_v60, %v2325_v62  ;;  %v3329_v7 = vrot.slane %v3315_v35, %v6782_v17 }
 0x69a   : > { %v3130_v32 = vrot.slane %v3122_v5, %v6785_v37  ;;  %v3098_v42 = vrot.slane %v3090_v20, %v6785_v37  ;;  %v3362_v14 = vcombine.low %v3297_v54, %v3313_v0  ;;  %v3363_v27 = vcombine.high %v3297_v54, %v3313_v0 }
 0x69b   : > { %v3338_v48 = vrot.slane %v3330_v4, %v6782_v17  ;;  %v3345_v58 = vrot.slane %v3331_v39, %v6782_v17  ;;  %v3361_v26 = vrot.slane %v3347_v11, %v6785_v37 }
 0x69c   : > { %v3142_v51 = vcombine.low %v3098_v42, %v3130_v32  ;;  %v3143_v6 = vcombine.high %v3098_v42, %v3130_v32  ;;  %v3377_v8 = vrot.slane %v3363_v27, %v6785_v37 }
 0x69d   : > { %v3378_v59 = vcombine.low %v3322_v31, %v3338_v48  ;;  %v3394_v44 = vcombine.low %v3329_v7, %v3345_v58  ;;  %v3379_v61 = vcombine.high %v3322_v31, %v3338_v48  ;;  %v3395_v21 = vcombine.high %v3329_v7, %v3345_v58 }
 0x69e   : > { %v5717_v36 = vpack.i.bf16 %v3143_v6, %v3142_v51 }
 0x69f   : > { %v3386_v15 = vrot.slane %v3378_v59, %v6785_v37  ;;  %v3402_v60 = vrot.slane %v3394_v44, %v6785_v37  ;;  %v3393_v29 = vrot.slane %v3379_v61, %v6785_v37  ;;  %v3409_v3 = vrot.slane %v3395_v21, %v6785_v37 }
 0x6a1   : > { %5692 = vxpose.xlu1.b32.start [1/2] (short) (narrow) %v7304_v18, 32  ;;  %5668 = vxpose.xlu0.b32.start [1/2] (short) (narrow) %v7306_v49, 32  ;;  %v3137_v18 = vrot.slane %v3123_v22, %v6785_v37  ;;  %v3105_v49 = vrot.slane %v3091_v53, %v6785_v37  ;;  %v3413_v52 = vcombine.high %v3361_v26, %v3393_v29 }
 0x6a2   : > { %v3412_v16 = vcombine.low %v3361_v26, %v3393_v29 }
 0x6a3   : > { %v3144_v40 = vcombine.low %v3105_v49, %v3137_v18  ;;  %v3145_v24 = vcombine.high %v3105_v49, %v3137_v18 }
 0x6a5   : > { %5694 = vxpose.xlu1.b32.end [2/2] (short) (narrow) %v5693_v13, 32  ;;  %5670 = vxpose.xlu0.b32.end [2/2] (short) (narrow) %v5669_v33, 32  ;;  %v5741_v55 = vpack.i.bf16 %v3145_v24, %v3144_v40 }
 0x6ae   : > { %5740 = vxpose.xlu1.b32.start [1/2] (short) (narrow) %v7318_v2, 32  ;;  %5716 = vxpose.xlu0.b32.start [1/2] (short) (narrow) %v7320_v41, 32  ;;  %v3346_v2 = vcombine.low %v3290_v56, %v3306_v43  ;;  %v3370_v41 = vrot.slane %v3362_v14, %v6785_v37 }
 0x6b0   : > { %v3354_v34 = vrot.slane %v3346_v2, %v6785_v37  ;;  %v3415_v30 = vcombine.high %v3370_v41, %v3402_v60  ;;  %v3414_v25 = vcombine.low %v3370_v41, %v3402_v60 }
 0x6b2   : > { %5742 = vxpose.xlu1.b32.end [2/2] (short) (narrow) %v5741_v55, 32  ;;  %5718 = vxpose.xlu0.b32.end [2/2] (short) (narrow) %v5717_v36, 32  ;;  %v3411_v57 = vcombine.high %v3354_v34, %v3386_v15  ;;  %v3410_v47 = vcombine.low %v3354_v34, %v3386_v15 }
 0x6b4   : > { %v5789_v17 = vpack.i.bf16 %v3411_v57, %v3415_v30  ;;  %v5765_v50 = vpack.i.bf16 %v3414_v25, %v3410_v47 }
 0x6bb   : > { %5788 = vxpose.xlu1.b32.start [1/2] (short) (narrow) %v7336_v46, 32  ;;  %5764 = vxpose.xlu0.b32.start [1/2] (short) (narrow) %v7338_v12, 32  ;;  %v3417_v46 = vcombine.high %v3377_v8, %v3409_v3  ;;  %v3416_v12 = vcombine.low %v3377_v8, %v3409_v3 }
 0x6bd   : > { %v5837_v19 = vpack.i.bf16 %v3413_v52, %v3417_v46  ;;  %v5813_v5 = vpack.i.bf16 %v3412_v16, %v3416_v12 }
 0x6bf   : > { %5790 = vxpose.xlu1.b32.end [2/2] (short) (narrow) %v5789_v17, 32  ;;  %5766 = vxpose.xlu0.b32.end [2/2] (short) (narrow) %v5765_v50, 32 }
 0x6c8   : > { %v5479_v13 = vpop.trf.xlu0  ;;  %5836 = vxpose.xlu1.b32.start [1/2] (short) (narrow) %v7340_v9, 32  ;;  %5812 = vxpose.xlu0.b32.start [1/2] (short) (narrow) %v7344_v38, 32 }
 0x6c9   : > { %v5480_v32 = vunpack.i.l.bf16 %v5479_v13  ;;  %v5483_v58 = vunpack.i.h.bf16 %v5479_v13 }
 0x6cb   : > { %v7444_v33 = vpop.trf.xlu1 }
 0x6cc   : > { %v5484_v22 = vpop.trf.xlu0  ;;  %5838 = vxpose.xlu1.b32.end [2/2] (short) (narrow) %v5837_v19, 32  ;;  %5814 = vxpose.xlu0.b32.end [2/2] (short) (narrow) %v5813_v5, 32  ;;  %v5504_v15 = vunpack.i.l.bf16 %v7444_v33  ;;  %v5507_v3 = vunpack.i.h.bf16 %v7444_v33 }
 0x6cd   : > { %v5485_v9 = vunpack.i.l.bf16 %v5484_v22  ;;  %v5488_v7 = vunpack.i.h.bf16 %v5484_v22 }
 0x6cf   : > { %v7446_v53 = vpop.trf.xlu1 }
 0x6d0   : > { %v5489_v20 = vpop.trf.xlu0  ;;  %v5509_v41 = vunpack.i.l.bf16 %v7446_v53  ;;  %v5512_v46 = vunpack.i.h.bf16 %v7446_v53 }
 0x6d1   : > { %v5490_v23 = vunpack.i.l.bf16 %v5489_v20  ;;  %v5493_v56 = vunpack.i.h.bf16 %v5489_v20 }
 0x6d3   : > { %v7448_v62 = vpop.trf.xlu1 }
 0x6d4   : > { %v5494_v37 = vpop.trf.xlu0  ;;  %v5514_v47 = vunpack.i.l.bf16 %v7448_v62  ;;  %v5517_v5 = vunpack.i.h.bf16 %v7448_v62 }
 0x6d5   : > { %v5495_v51 = vunpack.i.l.bf16 %v5494_v37  ;;  %v5498_v44 = vunpack.i.h.bf16 %v5494_v37 }
 0x6d7   : > { %v7450_v39 = vpop.trf.xlu1 }
 0x6d8   : > { %v5527_v18 = vpop.trf.xlu0  ;;  %v5519_v61 = vunpack.i.l.bf16 %v7450_v39 }
 0x6d9   : > { %v5528_v4 = vunpack.i.l.bf16 %v5527_v18  ;;  %v5531_v43 = vunpack.i.h.bf16 %v5527_v18 }
 0x6db   : > { %v5859_v38 = vpack.i.bf16 %v5480_v32, %v5528_v4  ;;  %v5551_v63 = vpop.trf.xlu1  ;;  %v5867_v36 = vpack.i.bf16 %v5483_v58, %v5531_v43  ;;  %v5522_v32 = vunpack.i.h.bf16 %v7450_v39 }
 0x6dc   : > { %v5532_v42 = vpop.trf.xlu0  ;;  %v5552_v60 = vunpack.i.l.bf16 %v5551_v63  ;;  %v5555_v26 = vunpack.i.h.bf16 %v5551_v63 }
 0x6dd   : > { %v5533_v49 = vunpack.i.l.bf16 %v5532_v42  ;;  %5860 = vxpose.xlu0.b32.start [1/16] (narrow) %v5859_v38, 16  ;;  %v5536_v55 = vunpack.i.h.bf16 %v5532_v42 }
 0x6de   : > { %v5875_v30 = vpack.i.bf16 %v5504_v15, %v5552_v60  ;;  %v5883_v13 = vpack.i.bf16 %v5507_v3, %v5555_v26 }
 0x6df   : > { %v5861_v45 = vpack.i.bf16 %v5485_v9, %v5533_v49  ;;  %v5556_v24 = vpop.trf.xlu1  ;;  %v5869_v59 = vpack.i.bf16 %v5488_v7, %v5536_v55 }
 0x6e0   : > { %v5537_v35 = vpop.trf.xlu0  ;;  %v5557_v57 = vunpack.i.l.bf16 %v5556_v24  ;;  %v5560_v16 = vunpack.i.h.bf16 %v5556_v24 }
 0x6e1   : > { %v5538_v40 = vunpack.i.l.bf16 %v5537_v35  ;;  %5862 = vxpose.xlu0.b32.cont [2/16] (narrow) %v5861_v45, 16  ;;  %v5541_v54 = vunpack.i.h.bf16 %v5537_v35 }
 0x6e2   : > { %v5877_v17 = vpack.i.bf16 %v5509_v41, %v5557_v57  ;;  %v5885_v37 = vpack.i.bf16 %v5512_v46, %v5560_v16 }
 0x6e3   : > { %v5863_v6 = vpack.i.bf16 %v5490_v23, %v5538_v40  ;;  %v5561_v48 = vpop.trf.xlu1  ;;  %v5871_v14 = vpack.i.bf16 %v5493_v56, %v5541_v54 }
 0x6e4   : > { %v5542_v1 = vpop.trf.xlu0  ;;  %v5562_v25 = vunpack.i.l.bf16 %v5561_v48  ;;  %v5565_v22 = vunpack.i.h.bf16 %v5561_v48 }
 0x6e5   : > { %v5543_v28 = vunpack.i.l.bf16 %v5542_v1  ;;  %5864 = vxpose.xlu0.b32.cont [3/16] (narrow) %v5863_v6, 16  ;;  %v5546_v2 = vunpack.i.h.bf16 %v5542_v1 }
 0x6e6   : > { %v5879_v50 = vpack.i.bf16 %v5514_v47, %v5562_v25  ;;  %v5887_v53 = vpack.i.bf16 %v5517_v5, %v5565_v22 }
 0x6e7   : > { %v5865_v0 = vpack.i.bf16 %v5495_v51, %v5543_v28  ;;  %v5566_v31 = vpop.trf.xlu1  ;;  %v5873_v34 = vpack.i.bf16 %v5498_v44, %v5546_v2 }
 0x6e8   : > { %v5567_v21 = vunpack.i.l.bf16 %v5566_v31  ;;  %v5570_v18 = vunpack.i.h.bf16 %v5566_v31 }
 0x6e9   : > { %5866 = vxpose.xlu0.b32.cont [4/16] (narrow) %v5865_v0, 16 }
 0x6ea   : > { %v5881_v29 = vpack.i.bf16 %v5519_v61, %v5567_v21  ;;  %v5889_v62 = vpack.i.bf16 %v5522_v32, %v5570_v18 }
 0x6ed   : > { %5868 = vxpose.xlu0.b32.cont [5/16] (narrow) %v5867_v36, 16 }
 0x6f1   : > { %5870 = vxpose.xlu0.b32.cont [6/16] (narrow) %v5869_v59, 16 }
 0x6f5   : > { %5872 = vxpose.xlu0.b32.cont [7/16] (narrow) %v5871_v14, 16 }
 0x6f9   : > { %5874 = vxpose.xlu0.b32.cont [8/16] (narrow) %v5873_v34, 16 }
 0x6fd   : > { %5876 = vxpose.xlu0.b32.cont [9/16] (narrow) %v5875_v30, 16 }
 0x701   : > { %5878 = vxpose.xlu0.b32.cont [10/16] (narrow) %v5877_v17, 16 }
 0x703   : > { %v7456_v11 = vpop.trf.xlu1  ;;  %v5575_v27 = vpop.trf.xlu0 }
 0x704   : > { %v5576_v38 = vunpack.i.l.bf16 %v5575_v27  ;;  %v5579_v36 = vunpack.i.h.bf16 %v5575_v27  ;;  %v5600_v61 = vunpack.i.l.bf16 %v7456_v11 }
 0x705   : > { %5880 = vxpose.xlu0.b32.cont [11/16] (narrow) %v5879_v50, 16 }
 0x707   : > { %v7459_v8 = vpop.trf.xlu1  ;;  %v5580_v52 = vpop.trf.xlu0 }
 0x708   : > { %v5581_v45 = vunpack.i.l.bf16 %v5580_v52  ;;  %v5584_v2 = vunpack.i.h.bf16 %v5580_v52  ;;  %v5605_v3 = vunpack.i.l.bf16 %v7459_v8 }
 0x709   : > { %5882 = vxpose.xlu0.b32.cont [12/16] (narrow) %v5881_v29, 16 }
 0x70b   : > { %v7462_v12 = vpop.trf.xlu1  ;;  %v5585_v19 = vpop.trf.xlu0 }
 0x70c   : > { %v5586_v51 = vunpack.i.l.bf16 %v5585_v19  ;;  %v5589_v41 = vunpack.i.h.bf16 %v5585_v19 }
 0x70d   : > { %5884 = vxpose.xlu0.b32.cont [13/16] (narrow) %v5883_v13, 16  ;;  %v5610_v13 = vunpack.i.l.bf16 %v7462_v12 }
 0x70f   : > { %v7465_v20 = vpop.trf.xlu1  ;;  %v5590_v33 = vpop.trf.xlu0 }
 0x710   : > { %v5591_v58 = vunpack.i.l.bf16 %v5590_v33  ;;  %v5594_v17 = vunpack.i.h.bf16 %v5590_v33  ;;  %v5615_v33 = vunpack.i.l.bf16 %v7465_v20 }
 0x711   : > { %5886 = vxpose.xlu0.b32.cont [14/16] (narrow) %v5885_v37, 16 }
 0x713   : > { %v7468_v4 = vpop.trf.xlu1  ;;  %v5623_v9 = vpop.trf.xlu0 }
 0x714   : > { %v5624_v42 = vunpack.i.l.bf16 %v5623_v9  ;;  %v5627_v0 = vunpack.i.h.bf16 %v5623_v9  ;;  %v5648_v21 = vunpack.i.l.bf16 %v7468_v4 }
 0x715   : > { %5888 = vxpose.xlu0.b32.cont [15/16] (narrow) %v5887_v53, 16 }
 0x716   : > { %v5901_v63 = vpack.i.bf16 %v5576_v38, %v5624_v42  ;;  %v5909_v59 = vpack.i.bf16 %v5579_v36, %v5627_v0  ;;  %v5917_v46 = vpack.i.bf16 %v5600_v61, %v5648_v21  ;;  %v5603_v38 = vunpack.i.h.bf16 %v7456_v11 }
 0x717   : > { %v7470_v49 = vpop.trf.xlu1  ;;  %v5628_v23 = vpop.trf.xlu0  ;;  %v5651_v42 = vunpack.i.h.bf16 %v7468_v4 }
 0x718   : > { %v5629_v35 = vunpack.i.l.bf16 %v5628_v23  ;;  %5902 = vxpose.xlu1.b32.start [1/16] (narrow) %v5901_v63, 16  ;;  %v5632_v56 = vunpack.i.h.bf16 %v5628_v23  ;;  %v5653_v26 = vunpack.i.l.bf16 %v7470_v49 }
 0x719   : > { %5890 = vxpose.xlu0.b32.end [16/16] (narrow) %v5889_v62, 16 }
 0x71a   : > { %v5903_v39 = vpack.i.bf16 %v5581_v45, %v5629_v35  ;;  %v5911_v60 = vpack.i.bf16 %v5584_v2, %v5632_v56  ;;  %v5919_v22 = vpack.i.bf16 %v5605_v3, %v5653_v26 }
 0x71b   : > { %v7472_v40 = vpop.trf.xlu1  ;;  %v5633_v24 = vpop.trf.xlu0 }
 0x71c   : > { %v5634_v6 = vunpack.i.l.bf16 %v5633_v24  ;;  %5904 = vxpose.xlu1.b32.cont [2/16] (narrow) %v5903_v39, 16  ;;  %v5637_v14 = vunpack.i.h.bf16 %v5633_v24  ;;  %v5658_v19 = vunpack.i.l.bf16 %v7472_v40  ;;  %v5608_v39 = vunpack.i.h.bf16 %v7459_v8 }
 0x71d   : > { %v5656_v24 = vunpack.i.h.bf16 %v7470_v49 }
 0x71e   : > { %v5905_v28 = vpack.i.bf16 %v5586_v51, %v5634_v6  ;;  %v5913_v47 = vpack.i.bf16 %v5589_v41, %v5637_v14  ;;  %v5921_v53 = vpack.i.bf16 %v5610_v13, %v5658_v19 }
 0x71f   : > { %v7474_v1 = vpop.trf.xlu1  ;;  %v5638_v48 = vpop.trf.xlu0  ;;  %v5927_v8 = vpack.i.bf16 %v5608_v39, %v5656_v24 }
 0x720   : > { %v5639_v43 = vunpack.i.l.bf16 %v5638_v48  ;;  %5906 = vxpose.xlu1.b32.cont [3/16] (narrow) %v5905_v28, 16  ;;  %v5642_v57 = vunpack.i.h.bf16 %v5638_v48  ;;  %v5663_v32 = vunpack.i.l.bf16 %v7474_v1  ;;  %v5925_v28 = vpack.i.bf16 %v5603_v38, %v5651_v42 }
 0x721   : > { %v5666_v2 = vunpack.i.h.bf16 %v7474_v1 }
 0x722   : > { %v5907_v7 = vpack.i.bf16 %v5591_v58, %v5639_v43  ;;  %v5915_v27 = vpack.i.bf16 %v5594_v17, %v5642_v57  ;;  %v5923_v23 = vpack.i.bf16 %v5615_v33, %v5663_v32  ;;  %v5613_v58 = vunpack.i.h.bf16 %v7462_v12 }
 0x723   : > { %v7476_v31 = vpop.trf.xlu1  ;;  %v7478_v55 = vpop.trf.xlu0  ;;  %v5661_v43 = vunpack.i.h.bf16 %v7472_v40 }
 0x724   : > { %5908 = vxpose.xlu1.b32.cont [4/16] (narrow) %v5907_v7, 16  ;;  %v5672_v3 = vunpack.i.l.bf16 %v7478_v55 }
 0x725   : > { %v5929_v12 = vpack.i.bf16 %v5613_v58, %v5661_v43 }
 0x727   : > { %v7480_v54 = vpop.trf.xlu1  ;;  %v7482_v44 = vpop.trf.xlu0 }
 0x728   : > { %5910 = vxpose.xlu1.b32.cont [5/16] (narrow) %v5909_v59, 16  ;;  %v5618_v59 = vunpack.i.h.bf16 %v7465_v20  ;;  %v5677_v32 = vunpack.i.l.bf16 %v7482_v44 }
 0x72b   : > { %v7484_v15 = vpop.trf.xlu1  ;;  %v7486_v34 = vpop.trf.xlu0 }
 0x72c   : > { %5912 = vxpose.xlu1.b32.cont [6/16] (narrow) %v5911_v60, 16 }
 0x72f   : > { %v7488_v30 = vpop.trf.xlu1  ;;  %v7490_v25 = vpop.trf.xlu0 }
 0x730   : > { %5914 = vxpose.xlu1.b32.cont [7/16] (narrow) %v5913_v47, 16  ;;  %v5931_v47 = vpack.i.bf16 %v5618_v59, %v5666_v2 }
 0x733   : > { %v7494_v50 = vpop.trf.xlu1  ;;  %v7496_v29 = vpop.trf.xlu0 }
 0x734   : > { %5916 = vxpose.xlu1.b32.cont [8/16] (narrow) %v5915_v27, 16  ;;  %v5720_v63 = vunpack.i.l.bf16 %v7496_v29  ;;  %v5723_v17 = vunpack.i.h.bf16 %v7496_v29  ;;  %v5744_v43 = vunpack.i.l.bf16 %v7494_v50 }
 0x737   : > { %v7500_v52 = vpop.trf.xlu1  ;;  %v7502_v16 = vpop.trf.xlu0 }
 0x738   : > { %5918 = vxpose.xlu1.b32.cont [9/16] (narrow) %v5917_v46, 16  ;;  %v5725_v51 = vunpack.i.l.bf16 %v7502_v16  ;;  %v5728_v26 = vunpack.i.h.bf16 %v7502_v16 }
 0x73b   : > { %v7506_v5 = vpop.trf.xlu1  ;;  %v7508_v37 = vpop.trf.xlu0 }
 0x73c   : > { %5920 = vxpose.xlu1.b32.cont [10/16] (narrow) %v5919_v22, 16  ;;  %v5730_v0 = vunpack.i.l.bf16 %v7508_v37 }
 0x73f   : > { %v7512_v18 = vpop.trf.xlu1  ;;  %v7514_v9 = vpop.trf.xlu0 }
 0x740   : > { %5922 = vxpose.xlu1.b32.cont [11/16] (narrow) %v5921_v53, 16  ;;  %v5735_v14 = vunpack.i.l.bf16 %v7514_v9  ;;  %v5733_v53 = vunpack.i.h.bf16 %v7508_v37  ;;  %v5738_v39 = vunpack.i.h.bf16 %v7514_v9 }
 0x743   : > { %v7519_v62 = vpop.trf.xlu1  ;;  %v5767_v45 = vpop.trf.xlu0 }
 0x744   : > { %v5771_v35 = vunpack.i.h.bf16 %v5767_v45  ;;  %5924 = vxpose.xlu1.b32.cont [12/16] (narrow) %v5923_v23, 16  ;;  %v5768_v61 = vunpack.i.l.bf16 %v5767_v45  ;;  %v5792_v21 = vunpack.i.l.bf16 %v7519_v62  ;;  %v5795_v58 = vunpack.i.h.bf16 %v7519_v62 }
 0x746   : > { %v5943_v11 = vpack.i.bf16 %v5771_v35, %v5720_v63  ;;  %v5985_v29 = vpack.i.bf16 %v5768_v61, %v5672_v3  ;;  %v5951_v22 = vpack.i.bf16 %v5792_v21, %v5723_v17  ;;  %v5682_v35 = vunpack.i.l.bf16 %v7486_v34 }
 0x747   : > { %v7524_v6 = vpop.trf.xlu1  ;;  %v5772_v48 = vpop.trf.xlu0  ;;  %v5754_v17 = vunpack.i.l.bf16 %v7506_v5 }
 0x748   : > { %v5776_v4 = vunpack.i.h.bf16 %v5772_v48  ;;  %5926 = vxpose.xlu1.b32.cont [13/16] (narrow) %v5925_v28, 16  ;;  %5944 = vxpose.xlu0.b32.start [1/16] (narrow) %v5943_v11, 16  ;;  %v5773_v46 = vunpack.i.l.bf16 %v5772_v48  ;;  %v5797_v13 = vunpack.i.l.bf16 %v7524_v6  ;;  %v5800_v59 = vunpack.i.h.bf16 %v7524_v6 }
 0x74a   : > { %v5945_v49 = vpack.i.bf16 %v5776_v4, %v5725_v51  ;;  %v5987_v16 = vpack.i.bf16 %v5773_v46, %v5677_v32  ;;  %v5953_v23 = vpack.i.bf16 %v5797_v13, %v5728_v26  ;;  %v5687_v4 = vunpack.i.l.bf16 %v7490_v25  ;;  %v7580_v13 = vld [vmem:[%s7733_s8] sm:$0xff]  }
 0x74b   : > { %v7529_v7 = vpop.trf.xlu1  ;;  %v5777_v36 = vpop.trf.xlu0  ;;  %v5685_v46 = vunpack.i.h.bf16 %v7486_v34  ;;  %v5747_v34 = vunpack.i.h.bf16 %v7494_v50  ;;  %v7596_v50 = vld [vmem:[%s7733_s8 + $0x8] sm:$0xff]  }
 0x74c   : > { %v5781_v56 = vunpack.i.h.bf16 %v5777_v36  ;;  %5928 = vxpose.xlu1.b32.cont [14/16] (narrow) %v5927_v8, 16  ;;  %5946 = vxpose.xlu0.b32.cont [2/16] (narrow) %v5945_v49, 16  ;;  %v5778_v38 = vunpack.i.l.bf16 %v5777_v36  ;;  %v5802_v42 = vunpack.i.l.bf16 %v7529_v7  ;;  %v5675_v49 = vunpack.i.h.bf16 %v7478_v55 }
 0x74d   : > { %v5805_v61 = vunpack.i.h.bf16 %v7529_v7 }
 0x74e   : > { %v5947_v40 = vpack.i.bf16 %v5781_v56, %v5730_v0  ;;  %v5989_v37 = vpack.i.bf16 %v5778_v38, %v5682_v35  ;;  %v5955_v11 = vpack.i.bf16 %v5802_v42, %v5733_v53  ;;  %v5749_v56 = vunpack.i.l.bf16 %v7500_v52 }
 0x74f   : > { %v7534_v60 = vpop.trf.xlu1  ;;  %v5782_v41 = vpop.trf.xlu0  ;;  %v5993_v2 = vpack.i.bf16 %v5795_v58, %v5675_v49  ;;  %v5690_v53 = vunpack.i.h.bf16 %v7490_v25  ;;  %v5752_v25 = vunpack.i.h.bf16 %v7500_v52 }
 0x750   : > { %v5786_v57 = vunpack.i.h.bf16 %v5782_v41  ;;  %5930 = vxpose.xlu1.b32.cont [15/16] (narrow) %v5929_v12, 16  ;;  %5948 = vxpose.xlu0.b32.cont [3/16] (narrow) %v5947_v40, 16  ;;  %v5783_v24 = vunpack.i.l.bf16 %v5782_v41  ;;  %v5807_v51 = vunpack.i.l.bf16 %v7534_v60  ;;  %v5680_v41 = vunpack.i.h.bf16 %v7482_v44 }
 0x751   : > { %v5759_v44 = vunpack.i.l.bf16 %v7512_v18  ;;  %v5810_v7 = vunpack.i.h.bf16 %v7534_v60 }
 0x752   : > { %v5949_v20 = vpack.i.bf16 %v5786_v57, %v5735_v14  ;;  %v5991_v9 = vpack.i.bf16 %v5783_v24, %v5687_v4  ;;  %v5957_v8 = vpack.i.bf16 %v5807_v51, %v5738_v39  ;;  %v5995_v21 = vpack.i.bf16 %v5800_v59, %v5680_v41 }
 0x753   : > { %v7538_v27 = vpop.trf.xlu1  ;;  %v7540_v1 = vpop.trf.xlu0  ;;  %v5701_v51 = vunpack.i.l.bf16 %v7480_v54  ;;  %v5699_v59 = vunpack.i.h.bf16 %v7476_v31  ;;  %v5714_v41 = vunpack.i.h.bf16 %v7488_v30 }
 0x754   : > { %5932 = vxpose.xlu1.b32.end [16/16] (narrow) %v5931_v47, 16  ;;  %5950 = vxpose.xlu0.b32.cont [4/16] (narrow) %v5949_v20, 16  ;;  %v5816_v0 = vunpack.i.l.bf16 %v7540_v1  ;;  %v5819_v38 = vunpack.i.h.bf16 %v7540_v1  ;;  %v5840_v42 = vunpack.i.l.bf16 %v7538_v27  ;;  %v5843_v49 = vunpack.i.h.bf16 %v7538_v27 }
 0x756   : > { %v5959_v12 = vpack.i.bf16 %v5816_v0, %v5744_v43  ;;  %v5967_v24 = vpack.i.bf16 %v5840_v42, %v5747_v34  ;;  %v5762_v43 = vunpack.i.h.bf16 %v7512_v18 }
 0x757   : > { %v7545_v19 = vpop.trf.xlu1  ;;  %v7547_v33 = vpop.trf.xlu0 }
 0x758   : > { %5986 = vxpose.xlu1.b32.start [1/16] (narrow) %v5985_v29, 16  ;;  %5952 = vxpose.xlu0.b32.cont [5/16] (narrow) %v5951_v22, 16  ;;  %v5821_v14 = vunpack.i.l.bf16 %v7547_v33  ;;  %v5997_v22 = vpack.i.bf16 %v5805_v61, %v5685_v46  ;;  %v5824_v35 = vunpack.i.h.bf16 %v7547_v33  ;;  %v5845_v1 = vunpack.i.l.bf16 %v7545_v19 }
 0x759   : > { %v5706_v33 = vunpack.i.l.bf16 %v7484_v15  ;;  %v5848_v18 = vunpack.i.h.bf16 %v7545_v19 }
 0x75a   : > { %v5961_v20 = vpack.i.bf16 %v5821_v14, %v5749_v56  ;;  %v6003_v4 = vpack.i.bf16 %v5824_v35, %v5701_v51  ;;  %v5969_v58 = vpack.i.bf16 %v5845_v1, %v5752_v25 }
 0x75b   : > { %v7552_v63 = vpop.trf.xlu1  ;;  %v7554_v45 = vpop.trf.xlu0 }
 0x75c   : > { %5988 = vxpose.xlu1.b32.cont [2/16] (narrow) %v5987_v16, 16  ;;  %5954 = vxpose.xlu0.b32.cont [6/16] (narrow) %v5953_v23, 16  ;;  %v5826_v6 = vunpack.i.l.bf16 %v7554_v45  ;;  %v5999_v16 = vpack.i.bf16 %v5810_v7, %v5690_v53  ;;  %v5696_v23 = vunpack.i.l.bf16 %v7476_v31  ;;  %v5829_v52 = vunpack.i.h.bf16 %v7554_v45 }
 0x75d   : > { %v5711_v45 = vunpack.i.l.bf16 %v7488_v30  ;;  %v5853_v14 = vunpack.i.h.bf16 %v7552_v63 }
 0x75e   : > { %v5963_v32 = vpack.i.bf16 %v5826_v6, %v5754_v17  ;;  %v6001_v39 = vpack.i.bf16 %v5819_v38, %v5696_v23 }
 0x75f   : > { %v7559_v28 = vpop.trf.xlu1  ;;  %v7561_v48 = vpop.trf.xlu0 }
 0x760   : > { %5990 = vxpose.xlu1.b32.cont [3/16] (narrow) %v5989_v37, 16  ;;  %5956 = vxpose.xlu0.b32.cont [7/16] (narrow) %v5955_v11, 16  ;;  %v5831_v29 = vunpack.i.l.bf16 %v7561_v48  ;;  %v5757_v37 = vunpack.i.h.bf16 %v7506_v5  ;;  %v5850_v11 = vunpack.i.l.bf16 %v7552_v63  ;;  %v5834_v0 = vunpack.i.h.bf16 %v7561_v48 }
 0x761   : > { %v5855_v5 = vunpack.i.l.bf16 %v7559_v28  ;;  %v5704_v48 = vunpack.i.h.bf16 %v7480_v54  ;;  %v5858_v27 = vunpack.i.h.bf16 %v7559_v28 }
 0x762   : > { %v5965_v60 = vpack.i.bf16 %v5831_v29, %v5759_v44 }
 0x763   : > { %v5891_v36 = vpop.trf.xlu0  ;;  %v5973_v56 = vpack.i.bf16 %v5855_v5, %v5762_v43  ;;  %v6015_v31 = vpack.i.bf16 %v5858_v27, %v5714_v41 }
 0x764   : > { %5992 = vxpose.xlu1.b32.cont [4/16] (narrow) %v5991_v9, 16  ;;  %5958 = vxpose.xlu0.b32.cont [8/16] (narrow) %v5957_v8, 16  ;;  %v5895_v62 = vunpack.i.h.bf16 %v5891_v36  ;;  %v5892_v40 = vunpack.i.l.bf16 %v5891_v36  ;;  %v6005_v9 = vpack.i.bf16 %v5829_v52, %v5706_v33  ;;  %v5971_v8 = vpack.i.bf16 %v5850_v11, %v5757_v37 }
 0x765   : > { %v6007_v36 = vpack.i.bf16 %v5834_v0, %v5711_v45 }
 0x767   : > { %v5896_v57 = vpop.trf.xlu0 }
 0x768   : > { %5994 = vxpose.xlu1.b32.cont [5/16] (narrow) %v5993_v2, 16  ;;  %5960 = vxpose.xlu0.b32.cont [9/16] (narrow) %v5959_v12, 16  ;;  %v5900_v47 = vunpack.i.h.bf16 %v5896_v57  ;;  %v5897_v55 = vunpack.i.l.bf16 %v5896_v57  ;;  %v6009_v2 = vpack.i.bf16 %v5843_v49, %v5699_v59  ;;  %v6011_v12 = vpack.i.bf16 %v5848_v18, %v5704_v48 }
 0x76a   : > { %v4703_v3 = vpack.c.bf16 %v5897_v55, %v5892_v40  ;;  %v4702_v26 = vpack.c.bf16 %v5900_v47, %v5895_v62  ;;  %v5709_v62 = vunpack.i.h.bf16 %v7484_v15 }
 0x76c   : > { %5996 = vxpose.xlu1.b32.cont [6/16] (narrow) %v5995_v21, 16  ;;  %5962 = vxpose.xlu0.b32.cont [10/16] (narrow) %v5961_v20, 16  ;;  %v6013_v40 = vpack.i.bf16 %v5853_v14, %v5709_v62 }
 0x76d   : > { %4740 = vmatprep.subr.bf16.mxu1 %v4703_v3 }
 0x76e   : > { %4741 = vmatpush1.bf16.msra.mxu1 %v4702_v26 }
 0x770   : > { %5998 = vxpose.xlu1.b32.cont [7/16] (narrow) %v5997_v22, 16  ;;  %5964 = vxpose.xlu0.b32.cont [11/16] (narrow) %v5963_v32, 16 }
 0x771   : > { %5090 = vmatmul.mubr.msk.bf16.vlgmr.msra.gmra.mxu1 %vm478_vm4, %v7580_v13 }
 0x772   : > { %4768 = vmatprep.mubr.bf16.mxu1 %v6114_v10 }
 0x774   : > { %6000 = vxpose.xlu1.b32.cont [8/16] (narrow) %v5999_v16, 16  ;;  %5966 = vxpose.xlu0.b32.cont [12/16] (narrow) %v5965_v60, 16 }
 0x778   : > { %6002 = vxpose.xlu1.b32.cont [9/16] (narrow) %v6001_v39, 16  ;;  %5968 = vxpose.xlu0.b32.cont [13/16] (narrow) %v5967_v24, 16 }
 0x779   : > { %5091 = vmatmul.mubr.msk.bf16.gmra.mxu1 %vm478_vm4, %v7596_v50 }
 0x77a   : > { %4811 = vmatprep.mubr.bf16.mxu1 %v6114_v10 }
 0x77c   : > { %6004 = vxpose.xlu1.b32.cont [10/16] (narrow) %v6003_v4, 16  ;;  %5970 = vxpose.xlu0.b32.cont [14/16] (narrow) %v5969_v58, 16 }
 0x780   : > { %6006 = vxpose.xlu1.b32.cont [11/16] (narrow) %v6005_v9, 16  ;;  %5972 = vxpose.xlu0.b32.cont [15/16] (narrow) %v5971_v8, 16 }
 0x784   : > { %6008 = vxpose.xlu1.b32.cont [12/16] (narrow) %v6007_v36, 16  ;;  %5974 = vxpose.xlu0.b32.end [16/16] (narrow) %v5973_v56, 16 }
 0x788   : > { %6010 = vxpose.xlu1.b32.cont [13/16] (narrow) %v6009_v2, 16 }
 0x78c   : > { %6012 = vxpose.xlu1.b32.cont [14/16] (narrow) %v6011_v12, 16 }
 0x790   : > { %6014 = vxpose.xlu1.b32.cont [15/16] (narrow) %v6013_v40, 16 }
 0x794   : > { %6016 = vxpose.xlu1.b32.end [16/16] (narrow) %v6015_v31, 16  ;;  %v5933_v57 = vpop.trf.xlu1 }
 0x795   : > { %v5937_v19 = vunpack.i.h.bf16 %v5933_v57  ;;  %v5934_v47 = vunpack.i.l.bf16 %v5933_v57 }
 0x798   : > { %v5938_v55 = vpop.trf.xlu1 }
 0x799   : > { %v5942_v54 = vunpack.i.h.bf16 %v5938_v55  ;;  %v5939_v17 = vunpack.i.l.bf16 %v5938_v55 }
 0x79b   : > { %v4705_v61 = vpack.c.bf16 %v5939_v17, %v5934_v47  ;;  %v4704_v63 = vpack.c.bf16 %v5942_v54, %v5937_v19 }
 0x79d   : > { %4793 = vmatprep.subr.bf16.mxu1 %v4705_v61 }
 0x79e   : > { %4794 = vmatpush1.bf16.msra.mxu1 %v4704_v63 }
 0x7a1   : > { %5092 = vmatmul.mubr.msk.bf16.vlgmr.msra.gmra.mxu1 %vm478_vm4, %v7580_v13 }
 0x7a2   : > { %4821 = vmatprep.mubr.bf16.mxu1 %v6114_v10 }
 0x7a9   : > { %5093 = vmatmul.mubr.msk.bf16.gmra.mxu1 %vm478_vm4, %v7596_v50 }
 0x7aa   : > { %4917 = vmatprep.mubr.bf16.mxu1 %v6114_v10 }
 0x7c4   : > { %v5975_v15 = vpop.trf.xlu0 }
 0x7c5   : > { %v5979_v30 = vunpack.i.h.bf16 %v5975_v15  ;;  %v5976_v28 = vunpack.i.l.bf16 %v5975_v15 }
 0x7c8   : > { %v5980_v21 = vpop.trf.xlu0 }
 0x7c9   : > { %v5984_v6 = vunpack.i.h.bf16 %v5980_v21  ;;  %v5981_v20 = vunpack.i.l.bf16 %v5980_v21 }
 0x7cb   : > { %v4707_v3 = vpack.c.bf16 %v5981_v20, %v5976_v28  ;;  %v4709_v26 = vpack.c.bf16 %v5984_v6, %v5979_v30 }
 0x7cd   : > { %4846 = vmatprep.subr.bf16.mxu0 %v4707_v3  ;;  %4899 = vmatprep.subr.bf16.mxu1 %v4709_v26 }
 0x7d4   : > { %v6017_v46 = vpop.trf.xlu1 }
 0x7d5   : > { %v6021_v44 = vunpack.i.h.bf16 %v6017_v46  ;;  %v6018_v7 = vunpack.i.l.bf16 %v6017_v46 }
 0x7d8   : > { %v6022_v29 = vpop.trf.xlu1 }
 0x7d9   : > { %v6026_v22 = vunpack.i.h.bf16 %v6022_v29  ;;  %v6023_v32 = vunpack.i.l.bf16 %v6022_v29 }
 0x7db   : > { %v4706_v53 = vpack.c.bf16 %v6023_v32, %v6018_v7  ;;  %v4708_v34 = vpack.c.bf16 %v6026_v22, %v6021_v44 }
 0x7dd   : > { %4847 = vmatpush1.bf16.msra.mxu0 %v4706_v53  ;;  %4900 = vmatpush1.bf16.msra.mxu1 %v4708_v34 }
 0x7e0   : > { %5094 = vmatmul.mubr.msk.bf16.vlgmr.msra.gmra.mxu0 %vm478_vm4, %v7580_v13  ;;  %5096 = vmatmul.mubr.msk.bf16.vlgmr.msra.gmra.mxu1 %vm478_vm4, %v7580_v13 }
 0x7e1   : > { %4874 = vmatprep.mubr.bf16.mxu0 %v6114_v10  ;;  %4927 = vmatprep.mubr.bf16.mxu1 %v6114_v10 }
 0x7e8   : > { %5095 = vmatmul.mubr.msk.bf16.gmra.mxu0 %vm478_vm4, %v7596_v50  ;;  %5097 = vmatmul.mubr.msk.bf16.gmra.mxu1 %vm478_vm4, %v7596_v50 }
 0x831   : > { %v4760_v38 = vpop.f32.mrf.mxu1 }
 0x832   : > { %4938 = vst [vmem:[%s7639_s12] sm:$0xff] %v4760_v38 }
 0x833   : > { %v4762_v10 = vpop.f32.mrf.mxu1 }
 0x834   : > { %4939 = vst [vmem:[%s7639_s12 + $0x8] sm:$0xff] %v4762_v10 }
 0x835   : > { %v4764_v13 = vpop.f32.mrf.mxu1 }
 0x836   : > { %4946 = vst [vmem:[%s7639_s12 + $0x40] sm:$0xff] %v4764_v13 }
 0x837   : > { %v4766_v42 = vpop.f32.mrf.mxu1 }
 0x838   : > { %4947 = vst [vmem:[%s7639_s12 + $0x48] sm:$0xff] %v4766_v42 }
 0x839   : > { %v4770_v16 = vpop.f32.mrf.mxu1 }
 0x83a   : > { %4954 = vst [vmem:[%s7639_s12 + $0x80] sm:$0xff] %v4770_v16 }
 0x83b   : > { %v4772_v60 = vpop.f32.mrf.mxu1 }
 0x83c   : > { %4955 = vst [vmem:[%s7639_s12 + $0x88] sm:$0xff] %v4772_v60 }
 0x83d   : > { %v4774_v23 = vpop.f32.mrf.mxu1 }
 0x83e   : > { %4962 = vst [vmem:[%s7639_s12 + $0xc0] sm:$0xff] %v4774_v23 }
 0x83f   : > { %v4776_v25 = vpop.f32.mrf.mxu1 }
 0x840   : > { %4963 = vst [vmem:[%s7639_s12 + $0xc8] sm:$0xff] %v4776_v25 }
 0x861   : > { %v4813_v50 = vpop.f32.mrf.mxu1 }
 0x862   : > { %4940 = vst [vmem:[%s7639_s12 + $0x10] sm:$0xff] %v4813_v50 }
 0x863   : > { %v4815_v35 = vpop.f32.mrf.mxu1 }
 0x864   : > { %4941 = vst [vmem:[%s7639_s12 + $0x18] sm:$0xff] %v4815_v35 }
 0x865   : > { %v4817_v1 = vpop.f32.mrf.mxu1 }
 0x866   : > { %4948 = vst [vmem:[%s7639_s12 + $0x50] sm:$0xff] %v4817_v1 }
 0x867   : > { %v4819_v39 = vpop.f32.mrf.mxu1 }
 0x868   : > { %4949 = vst [vmem:[%s7639_s12 + $0x58] sm:$0xff] %v4819_v39 }
 0x869   : > { %v4823_v24 = vpop.f32.mrf.mxu1 }
 0x86a   : > { %4956 = vst [vmem:[%s7639_s12 + $0x90] sm:$0xff] %v4823_v24 }
 0x86b   : > { %v4825_v51 = vpop.f32.mrf.mxu1 }
 0x86c   : > { %4957 = vst [vmem:[%s7639_s12 + $0x98] sm:$0xff] %v4825_v51 }
 0x86d   : > { %v4827_v37 = vpop.f32.mrf.mxu1 }
 0x86e   : > { %4964 = vst [vmem:[%s7639_s12 + $0xd0] sm:$0xff] %v4827_v37 }
 0x86f   : > { %v4829_v52 = vpop.f32.mrf.mxu1 }
 0x870   : > { %4965 = vst [vmem:[%s7639_s12 + $0xd8] sm:$0xff] %v4829_v52 }
 0x8a0   : > { %v4866_v11 = vpop.f32.mrf.mxu0  ;;  %v4919_v4 = vpop.f32.mrf.mxu1 }
 0x8a1   : > { %4942 = vst [vmem:[%s7639_s12 + $0x20] sm:$0xff] %v4866_v11  ;;  %4944 = vst [vmem:[%s7639_s12 + $0x30] sm:$0xff] %v4919_v4 }
 0x8a2   : > { %v4868_v58 = vpop.f32.mrf.mxu0  ;;  %v4921_v33 = vpop.f32.mrf.mxu1 }
 0x8a3   : > { %4943 = vst [vmem:[%s7639_s12 + $0x28] sm:$0xff] %v4868_v58  ;;  %4945 = vst [vmem:[%s7639_s12 + $0x38] sm:$0xff] %v4921_v33 }
 0x8a4   : > { %v4870_v43 = vpop.f32.mrf.mxu0  ;;  %v4923_v0 = vpop.f32.mrf.mxu1 }
 0x8a5   : > { %4950 = vst [vmem:[%s7639_s12 + $0x60] sm:$0xff] %v4870_v43  ;;  %4952 = vst [vmem:[%s7639_s12 + $0x70] sm:$0xff] %v4923_v0 }
 0x8a6   : > { %v4872_v5 = vpop.f32.mrf.mxu0  ;;  %v4925_v9 = vpop.f32.mrf.mxu1 }
 0x8a7   : > { %4951 = vst [vmem:[%s7639_s12 + $0x68] sm:$0xff] %v4872_v5  ;;  %4953 = vst [vmem:[%s7639_s12 + $0x78] sm:$0xff] %v4925_v9 }
 0x8a8   : > { %v4876_v8 = vpop.f32.mrf.mxu0  ;;  %v4929_v45 = vpop.f32.mrf.mxu1 }
 0x8a9   : > { %4958 = vst [vmem:[%s7639_s12 + $0xa0] sm:$0xff] %v4876_v8  ;;  %4960 = vst [vmem:[%s7639_s12 + $0xb0] sm:$0xff] %v4929_v45 }
 0x8aa   : > { %v4878_v49 = vpop.f32.mrf.mxu0  ;;  %v4931_v36 = vpop.f32.mrf.mxu1 }
 0x8ab   : > { %4959 = vst [vmem:[%s7639_s12 + $0xa8] sm:$0xff] %v4878_v49  ;;  %4961 = vst [vmem:[%s7639_s12 + $0xb8] sm:$0xff] %v4931_v36 }
 0x8ac   : > { %v4880_v56 = vpop.f32.mrf.mxu0  ;;  %v4933_v59 = vpop.f32.mrf.mxu1 }
 0x8ad   : > { %4966 = vst [vmem:[%s7639_s12 + $0xe0] sm:$0xff] %v4880_v56  ;;  %4968 = vst [vmem:[%s7639_s12 + $0xf0] sm:$0xff] %v4933_v59 }
 0x8ae   : > { %v4882_v18 = vpop.f32.mrf.mxu0  ;;  %v4935_v2 = vpop.f32.mrf.mxu1 }
 0x8af   : > { %4967 = vst [vmem:[%s7639_s12 + $0xe8] sm:$0xff] %v4882_v18  ;;  %4969 = vst [vmem:[%s7639_s12 + $0xf8] sm:$0xff] %v4935_v2 }
 0x8b0   : > { %6052 = shalt.err (!%p6049_p3)
}
 0x8b1   : > { %s6053_s22 = scalar_lea.hbm %s7674_s16, 4096  ;;  %s6057_s15 = scalar_lea.hbm %s7736_s11, 8192 }
 0x8b2   : > { %p6054_p4 = scmp.ne.s32.totalorder %s7674_s16, %s6053_s22  ;;  %p6058_p9 = scmp.lt.s32.totalorder %s7674_s16, %s7736_s11 }
 0x8b3   : > { %p6059_p10 = scmp.lt.s32.totalorder %s6057_s15, %s6053_s22 }
 0x8b4   : > { %p6055_p7 = pnand %p6054_p4, %p6219_p5 }
 0x8b5   : > { %p6060_p11 = por %p6059_p10, %p6058_p9 }
 0x8b6   : > { %p6056_p8 = pneg %p6055_p7 }
 0x8b8   : > { %p6061_p12 = pnand %p6060_p11, %p6056_p8 }
 0x8ba   : > { %6064 = shalt.err (!%p6061_p12)
}
 0x8bb   : > { %s6120_s30 = smov 1024  }
 0x8bc   : > { %5127 = dma.vmem_to_hbm [thread:$0]  (%p6219_p5), %s7678_s29, 4096, %s7674_s16, %s7684_s21, %s6120_s30, %s6120_s30, %s6117_s13  }
 0x8bd PF: > { %p5133_p13 = scmp.ge.s32.totalorder %s6099_s20, 2  ;;  %s4999_s14 = sand.u32 1, %s6087_s17  }
 0x8be   : > { %s5000_s25 = scalar_lea.sflag [#allocation3], %s4999_s14 }
 0x8bf   : > { %p5130_p0 = pnand %p5133_p13, %p6223_p6 }
 0x8c1   : > { %p5131_p1 = pneg %p5130_p0 }
 0x8c3   : > { %6082 = dma.done.wait (%p5131_p1), %s5000_s25, 4096  }
 0x8c4   : > { %6084 = vsyncadd (%p5131_p1), %s5000_s25, 4294963200  ;;  %p21_p2 = scmp.ge.s32.totalorder %s6206_s23, 4   ;;  %s7782_s17 = smov %s6091_s18 }
 0x8c5   : > { %s7783_s18 = smov %s6095_s19  ;;  %s7784_s19 = smov %s6217_s26 }
 0x8c6   : > { %s7785_s20 = smov %s6206_s23  ;;  %23 = sbr.rel (!%p21_p2) target bundleno = 6 (0x6), region = 99 }
 0x8cb   :  { %5005 = vsyncpa [#allocation3], 1 }
 0x8cc   :  { %5007 = vsyncpa [#allocation3 + $0x1], 1 }

</bundles_post_ra>
